<compile_context>
chip_gen: v7x
topology: tpu7x:2x2x1
jax: 0.10.0
libtpu: 0.0.40
codegen_flags: <defaults>
</compile_context>

<pallas_src>
import functools

import jax
import jax.numpy as jnp
from jax.experimental import pallas as pl

EPS = 1e-5             # PyTorch BatchNorm2d default eps
LANE = 128             # channel dims padded to lane width -> lane-dense stores
MAX_FUSED_ROWS = 2048  # single-tile fused path: (2048, 1152) bf16 ~ 4.5 MiB
EXPANSION = 4          # Bottleneck expansion (block.expansion)


# ---------------------------------------------------------------------------
# small helpers (host-side XLA glue)
# ---------------------------------------------------------------------------
def _rup(n, m):
    return (n + m - 1) // m * m


def _pad_rows(x, mp):
    if x.shape[0] == mp:
        return x
    return jnp.pad(x, ((0, mp - x.shape[0]), (0, 0)))


def _pad_channels(x, cp):
    if x.shape[-1] == cp:
        return x
    pad = [(0, 0)] * (x.ndim - 1) + [(0, cp - x.shape[-1])]
    return jnp.pad(x, pad)


def _prep_input(x_nchw):
    x = jnp.transpose(x_nchw, (0, 2, 3, 1)).astype(jnp.float32)   # NCHW -> NHWC
    return _pad_channels(x, _rup(x.shape[-1], LANE)).astype(jnp.bfloat16)


def _im2col_3x3(x, stride):
    """3x3 / pad=1 conv lowering: (N,H,W,C) -> (N*Ho*Wo, 9*C).

    Built with XLA strided slices in the wrapper; at MNIST scale this is at
    most ~1 MiB and lets each conv run as ONE big MXU matmul inside the fused
    kernel (instead of 9 tiny matmuls + stride-2 selection matmuls per row).
    """
    n, h, w, c = x.shape
    ho = (h - 1) // stride + 1
    wo = (w - 1) // stride + 1
    xp = jnp.pad(x, ((0, 0), (1, 1), (1, 1), (0, 0)))
    cols = []
    for dh in range(3):
        for dw in range(3):
            tap = xp[:, dh:dh + stride * (ho - 1) + 1:stride,
                     dw:dw + stride * (wo - 1) + 1:stride, :]
            cols.append(tap.reshape(n * ho * wo, c))
    return jnp.concatenate(cols, axis=1), (n, ho, wo)


# ---------------------------------------------------------------------------
# Pallas kernels (each one is a fully fused conv + BN + [residual] + ReLU)
# ---------------------------------------------------------------------------
def _batch_stats_scale_shift(y, gamma, beta, m):
    """Training-mode BN scale/shift from the f32 accumulator y.

    Rows >= m are zero padding: they contribute 0 to the sum, and are masked
    out of the (mean-shifted) variance.  At the test shapes m == y.shape[0],
    so the mask is compiled out.
    """
    inv_m = 1.0 / m
    mean = jnp.sum(y, axis=0, keepdims=True) * inv_m
    d = y - mean
    if y.shape[0] != m:                       # static Python condition
        rows = jax.lax.broadcasted_iota(jnp.int32, (y.shape[0], 1), 0)
        d = jnp.where(rows < m, d, 0.0)
    var = jnp.sum(d * d, axis=0, keepdims=True) * inv_m
    scale = gamma * jax.lax.rsqrt(var + EPS)
    shift = beta - mean * scale
    return scale, shift


def _conv_bn_act_kernel(x_ref, w_ref, g_ref, b_ref, o_ref, *, m):
    """Fused y = x @ w -> exact-batch-stats BN -> ReLU -> single bf16 store."""
    y = jnp.dot(x_ref[...], w_ref[...], preferred_element_type=jnp.float32)
    scale, shift = _batch_stats_scale_shift(y, g_ref[...], b_ref[...], m)
    o_ref[...] = jnp.maximum(y * scale + shift, 0.0).astype(o_ref.dtype)


def _conv_bn_addres_act_kernel(x_ref, r_ref, w_ref, g_ref, b_ref, o_ref, *, m):
    """Fused conv3 + BN + identity-shortcut add + ReLU."""
    y = jnp.dot(x_ref[...], w_ref[...], preferred_element_type=jnp.float32)
    scale, shift = _batch_stats_scale_shift(y, g_ref[...], b_ref[...], m)
    o = y * scale + shift + r_ref[...].astype(jnp.float32)
    o_ref[...] = jnp.maximum(o, 0.0).astype(o_ref.dtype)


def _conv_proj_bn_add_act_kernel(x_ref, r_ref, w_ref, wr_ref, g_ref, b_ref,
                                 gr_ref, br_ref, o_ref, *, m):
    """Fused conv3 + BN3 + projection-shortcut matmul + BNs + add + ReLU."""
    y = jnp.dot(x_ref[...], w_ref[...], preferred_element_type=jnp.float32)
    z = jnp.dot(r_ref[...], wr_ref[...], preferred_element_type=jnp.float32)
    sc, sh = _batch_stats_scale_shift(y, g_ref[...], b_ref[...], m)
    scr, shr = _batch_stats_scale_shift(z, gr_ref[...], br_ref[...], m)
    o = (y * sc + sh) + (z * scr + shr)
    o_ref[...] = jnp.maximum(o, 0.0).astype(o_ref.dtype)


def _head_kernel(x_ref, w_ref, b_ref, o_ref, *, inv_hw):
    """Adaptive avgpool(1,1) + linear classifier."""
    feat = jnp.sum(x_ref[...].astype(jnp.float32), axis=1) * inv_hw   # (N, C)
    o_ref[...] = (jnp.dot(feat.astype(jnp.bfloat16), w_ref[...],
                          preferred_element_type=jnp.float32) + b_ref[...])


# ---------------------------------------------------------------------------
# pallas_call wrappers (single fused tile per layer at this problem size)
# ---------------------------------------------------------------------------
def _row_spec(mp, c):
    return pl.BlockSpec((mp, c), lambda i: (0, 0))


def _vec_spec(c):
    return pl.BlockSpec((1, c), lambda i: (0, 0))


def conv_bn_act(x2d, w, gamma, beta):
    m, k = x2d.shape
    c = w.shape[1]
    mp = _rup(m, 8)
    assert mp <= MAX_FUSED_ROWS, (m, k)   # see TODO(synk) at the top
    out = pl.pallas_call(
        functools.partial(_conv_bn_act_kernel, m=m),
        out_shape=jax.ShapeDtypeStruct((mp, c), jnp.bfloat16),
        grid=(1,),
        in_specs=[_row_spec(mp, k),
                  pl.BlockSpec((k, c), lambda i: (0, 0)),
                  _vec_spec(c), _vec_spec(c)],
        out_specs=_row_spec(mp, c),
    )(_pad_rows(x2d, mp), w, gamma.reshape(1, c), beta.reshape(1, c))
    return out[:m]


def conv_bn_addres_act(x2d, res2d, w, gamma, beta):
    m, k = x2d.shape
    c = w.shape[1]
    mp = _rup(m, 8)
    assert mp <= MAX_FUSED_ROWS, (m, k)
    out = pl.pallas_call(
        functools.partial(_conv_bn_addres_act_kernel, m=m),
        out_shape=jax.ShapeDtypeStruct((mp, c), jnp.bfloat16),
        grid=(1,),
        in_specs=[_row_spec(mp, k), _row_spec(mp, c),
                  pl.BlockSpec((k, c), lambda i: (0, 0)),
                  _vec_spec(c), _vec_spec(c)],
        out_specs=_row_spec(mp, c),
    )(_pad_rows(x2d, mp), _pad_rows(res2d, mp), w,
      gamma.reshape(1, c), beta.reshape(1, c))
    return out[:m]


def conv_proj_bn_add_act(x2d, r2d, w, wr, gamma, beta, gammar, betar):
    m, k = x2d.shape
    kr = r2d.shape[1]
    c = w.shape[1]
    mp = _rup(m, 8)
    assert mp <= MAX_FUSED_ROWS, (m, k, kr)
    out = pl.pallas_call(
        functools.partial(_conv_proj_bn_add_act_kernel, m=m),
        out_shape=jax.ShapeDtypeStruct((mp, c), jnp.bfloat16),
        grid=(1,),
        in_specs=[_row_spec(mp, k), _row_spec(mp, kr),
                  pl.BlockSpec((k, c), lambda i: (0, 0)),
                  pl.BlockSpec((kr, c), lambda i: (0, 0)),
                  _vec_spec(c), _vec_spec(c), _vec_spec(c), _vec_spec(c)],
        out_specs=_row_spec(mp, c),
    )(_pad_rows(x2d, mp), _pad_rows(r2d, mp), w, wr,
      gamma.reshape(1, c), beta.reshape(1, c),
      gammar.reshape(1, c), betar.reshape(1, c))
    return out[:m]


def conv3x3_bn_act(x, w2d, gamma, beta, stride):
    xcols, (n, ho, wo) = _im2col_3x3(x, stride)
    out = conv_bn_act(xcols, w2d, gamma, beta)
    return out.reshape(n, ho, wo, -1)


# ---------------------------------------------------------------------------
# network forward (Pallas kernels on the hot path)
# ---------------------------------------------------------------------------
def bottleneck(x, blk):
    p, stride = blk["p"], blk["stride"]
    n, h, w, cin = x.shape
    a1 = conv_bn_act(x.reshape(-1, cin), p["w1"], p["g1"], p["b1"])
    a1 = a1.reshape(n, h, w, -1)
    a2 = conv3x3_bn_act(a1, p["w2"], p["g2"], p["b2"], stride)
    _, ho, wo, cmid = a2.shape
    m = n * ho * wo
    a2f = a2.reshape(m, cmid)
    cout = p["w3"].shape[1]
    if p["has_proj"]:
        # Projection shortcut: its matmul, its BN, the add and the ReLU all
        # run inside the one fused conv3 kernel (no extra HBM round trip).
        xs = x[:, ::stride, ::stride, :].reshape(m, cin)
        out = conv_proj_bn_add_act(a2f, xs, p["w3"], p["ws"],
                                   p["g3"], p["b3"], p["gs"], p["bs"])
    else:
        out = conv_bn_addres_act(a2f, x.reshape(m, cin),
                                 p["w3"], p["g3"], p["b3"])
    return out.reshape(n, ho, wo, cout)


def head(a, hp, num_classes):
    n, ho, wo, c = a.shape
    hw = ho * wo
    cp = hp["w"].shape[1]
    out = pl.pallas_call(
        functools.partial(_head_kernel, inv_hw=1.0 / hw),
        out_shape=jax.ShapeDtypeStruct((n, cp), jnp.float32),
        grid=(1,),
        in_specs=[pl.BlockSpec((n, hw, c), lambda i: (0, 0, 0)),
                  pl.BlockSpec((c, cp), lambda i: (0, 0)),
                  pl.BlockSpec((1, cp), lambda i: (0, 0))],
        out_specs=pl.BlockSpec((n, cp), lambda i: (0, 0)),
    )(a.reshape(n, hw, c), hp["w"], hp["b"].reshape(1, cp))
    return out[:, :num_classes]


def resnet_forward(x_nchw, params, num_classes=10):
    x = _prep_input(x_nchw)
    a = conv3x3_bn_act(x, params["stem"]["w"], params["stem"]["g"],
                       params["stem"]["b"], stride=2)
    for blk in params["blocks"]:
        a = bottleneck(a, blk)
    return head(a, params["head"], num_classes)


# ---------------------------------------------------------------------------
# parameters (random, deterministic), padded to lane-dense layouts
# ---------------------------------------------------------------------------
def _pad_mat(w, rows, cols):
    out = jnp.zeros((rows, cols), jnp.float32).at[:w.shape[0], :w.shape[1]].set(w)
    return out.astype(jnp.bfloat16)


def _pad_w9(w, cinp, coutp):
    # (9, cin, cout) real -> (9*cinp, coutp) bf16, matching the im2col layout.
    out = jnp.zeros((9, cinp, coutp), jnp.float32)
    out = out.at[:, :w.shape[1], :w.shape[2]].set(w)
    return out.reshape(9 * cinp, coutp).astype(jnp.bfloat16)


def _pad_vec(v, c):
    return jnp.zeros((c,), jnp.float32).at[:v.shape[0]].set(v.astype(jnp.float32))


def _init_bottleneck(key, in_planes, planes, stride):
    out_p = EXPANSION * planes
    cin_p, mid_p, cout_p = _rup(in_planes, LANE), _rup(planes, LANE), _rup(out_p, LANE)
    ks = jax.random.split(key, 4)
    p = {
        "w1": _pad_mat(0.1 * jax.random.normal(ks[0], (in_planes, planes)), cin_p, mid_p),
        "g1": _pad_vec(jnp.ones((planes,)), mid_p),
        "b1": jnp.zeros((mid_p,), jnp.float32),
        "w2": _pad_w9(0.1 * jax.random.normal(ks[1], (9, planes, planes)), mid_p, mid_p),
        "g2": _pad_vec(jnp.ones((planes,)), mid_p),
        "b2": jnp.zeros((mid_p,), jnp.float32),
        "w3": _pad_mat(0.1 * jax.random.normal(ks[2], (planes, out_p)), mid_p, cout_p),
        "g3": _pad_vec(jnp.ones((out_p,)), cout_p),
        "b3": jnp.zeros((cout_p,), jnp.float32),
        "has_proj": (stride != 1) or (in_planes != out_p),
    }
    if p["has_proj"]:
        p["ws"] = _pad_mat(0.1 * jax.random.normal(ks[3], (in_planes, out_p)), cin_p, cout_p)
        p["gs"] = _pad_vec(jnp.ones((out_p,)), cout_p)
        p["bs"] = jnp.zeros((cout_p,), jnp.float32)
    return p


def init_resnet_params(key, num_blocks=(2,), base_feats=16, num_classes=10, in_ch=1):
    keys = jax.random.split(key, 2 + sum(num_blocks))
    stem_cout = 16
    stem = {
        "w": _pad_w9(0.1 * jax.random.normal(keys[0], (9, in_ch, stem_cout)),
                     _rup(in_ch, LANE), _rup(stem_cout, LANE)),
        "g": _pad_vec(jnp.ones((stem_cout,)), _rup(stem_cout, LANE)),
        "b": jnp.zeros((_rup(stem_cout, LANE),), jnp.float32),
    }
    blocks = []
    in_planes = 16
    ki = 1
    for idx, nblk in enumerate(num_blocks):
        planes = base_feats * (idx + 1)
        for s in [2] + [1] * (nblk - 1):
            blocks.append({"p": _init_bottleneck(keys[ki], in_planes, planes, s),
                           "stride": s})
            in_planes = planes * EXPANSION
            ki += 1
    feat = in_planes                      # = base_feats * len(num_blocks) * 4
    hd = {
        "w": _pad_mat(0.1 * jax.random.normal(keys[ki], (feat, num_classes)),
                      _rup(feat, LANE), _rup(num_classes, LANE)),
        "b": _pad_vec(jnp.zeros((num_classes,)), _rup(num_classes, LANE)),
    }
    return {"stem": stem, "blocks": blocks, "head": hd}


# ---------------------------------------------------------------------------
# pure-JAX reference (same math / same dtype policy) for correctness check
# ---------------------------------------------------------------------------
def _ref_bn_scale_shift(y, gamma, beta):
    m = y.shape[0]
    mean = jnp.sum(y, axis=0, keepdims=True) / m
    var = jnp.sum((y - mean) ** 2, axis=0, keepdims=True) / m
    scale = gamma * jax.lax.rsqrt(var + EPS)
    return scale, beta - mean * scale


def _ref_conv_bn_act(x2d, w, gamma, beta):
    y = jnp.dot(x2d, w, preferred_element_type=jnp.float32)
    sc, sh = _ref_bn_scale_shift(y, gamma, beta)
    return jnp.maximum(y * sc + sh, 0.0).astype(jnp.bfloat16)


def _ref_bottleneck(x, blk):
    p, stride = blk["p"], blk["stride"]
    n, h, w, cin = x.shape
    a1 = _ref_conv_bn_act(x.reshape(-1, cin), p["w1"], p["g1"], p["b1"])
    a1 = a1.reshape(n, h, w, -1)
    xcols, (_, ho, wo) = _im2col_3x3(a1, stride)
    a2 = _ref_conv_bn_act(xcols, p["w2"], p["g2"], p["b2"])
    m = n * ho * wo
    cout = p["w3"].shape[1]
    y = jnp.dot(a2, p["w3"], preferred_element_type=jnp.float32)
    sc, sh = _ref_bn_scale_shift(y, p["g3"], p["b3"])
    o = y * sc + sh
    if p["has_proj"]:
        xs = x[:, ::stride, ::stride, :].reshape(m, cin)
        z = jnp.dot(xs, p["ws"], preferred_element_type=jnp.float32)
        scr, shr = _ref_bn_scale_shift(z, p["gs"], p["bs"])
        r = z * scr + shr
    else:
        r = x.reshape(m, cin).astype(jnp.float32)
    return jnp.maximum(o + r, 0.0).astype(jnp.bfloat16).reshape(n, ho, wo, cout)


def ref_forward(x_nchw, params, num_classes=10):
    x = _prep_input(x_nchw)
    xcols, (n, ho, wo) = _im2col_3x3(x, 2)
    a = _ref_conv_bn_act(xcols, params["stem"]["w"], params["stem"]["g"],
                         params["stem"]["b"]).reshape(n, ho, wo, -1)
    for blk in params["blocks"]:
        a = _ref_bottleneck(a, blk)
    n, ho, wo, c = a.shape
    feat = a.astype(jnp.float32).reshape(n, ho * wo, c).sum(axis=1) * (1.0 / (ho * wo))
    logits = jnp.dot(feat.astype(jnp.bfloat16), params["head"]["w"],
                     preferred_element_type=jnp.float32) + params["head"]["b"]
    return logits[:, :num_classes]


# ---------------------------------------------------------------------------
if __name__ == "__main__":
    # ResNet(Bottleneck, num_blocks=[2], base_feats=16, num_classes=10) on a
    # small MNIST-like input (2, 1, 16, 16).
    num_blocks = (2,)
    base_feats = 16
    num_classes = 10

    key = jax.random.PRNGKey(0)
    kx, kp = jax.random.split(key)
    x = jax.random.normal(kx, (2, 1, 16, 16), jnp.float32)   # NCHW like PyTorch
    params = init_resnet_params(kp, num_blocks, base_feats, num_classes)

    # jit the whole forward so the (tiny) XLA glue between the 8 fused
    # pallas_calls is compiled/fused away instead of eagerly dispatched.
    fwd = jax.jit(lambda inp: resnet_forward(inp, params, num_classes))
    ref_fn = jax.jit(lambda inp: ref_forward(inp, params, num_classes))

    out = jax.block_until_ready(fwd(x))
    ref = jax.block_until_ready(ref_fn(x))

    assert out.shape == (2, num_classes), out.shape
    err = float(jnp.max(jnp.abs(out - ref)))
    assert err < 3e-2, err

    print("KERNEL_OK")
</pallas_src>

<mosaic_0001>
module attributes {stable_mosaic.version = 11 : i64} {
  func.func @_conv_bn_act_kernel(%arg0: i32, %arg1: memref<128x1152xbf16, #tpu.memory_space<vmem>>, %arg2: memref<1152x128xbf16, #tpu.memory_space<vmem>>, %arg3: memref<1x128xf32, #tpu.memory_space<vmem>>, %arg4: memref<1x128xf32, #tpu.memory_space<vmem>>, %arg5: memref<128x128xbf16, #tpu.memory_space<vmem>>) attributes {dimension_semantics = [#tpu.dimension_semantics<arbitrary>], iteration_bounds = array<i64: 1>, scalar_prefetch = 0 : i64, scratch_operands = 0 : i64, tpu.core_type = #tpu.core_type<tc>, window_params = [{pipeline_mode = #tpu.pipeline_mode<synchronous>, transform_indices = @transform_0, window_bounds = array<i64: 128, 1152>}, {pipeline_mode = #tpu.pipeline_mode<synchronous>, transform_indices = @transform_1, window_bounds = array<i64: 1152, 128>}, {pipeline_mode = #tpu.pipeline_mode<synchronous>, transform_indices = @transform_2, window_bounds = array<i64: 1, 128>}, {pipeline_mode = #tpu.pipeline_mode<synchronous>, transform_indices = @transform_3, window_bounds = array<i64: 1, 128>}, {pipeline_mode = #tpu.pipeline_mode<synchronous>, transform_indices = @transform_4, window_bounds = array<i64: 128, 128>}]} {
    %c0 = arith.constant 0 : index
    %c0_0 = arith.constant 0 : index
    %0 = vector.load %arg1[%c0, %c0_0] : memref<128x1152xbf16, #tpu.memory_space<vmem>>, vector<128x1152xbf16>
    %c0_1 = arith.constant 0 : index
    %c0_2 = arith.constant 0 : index
    %1 = vector.load %arg2[%c0_1, %c0_2] : memref<1152x128xbf16, #tpu.memory_space<vmem>>, vector<1152x128xbf16>
    %cst = arith.constant dense<0.000000e+00> : vector<128x128xf32>
    %2 = tpu.matmul %0, %1, %cst {dimension_numbers = #tpu.dot_dimension_numbers<[1], [0], [0], [1], [0, 0, 1, 1], [], []>} : vector<128x1152xbf16>, vector<1152x128xbf16>, vector<128x128xf32> -> vector<128x128xf32>
    %c0_3 = arith.constant 0 : index
    %c0_4 = arith.constant 0 : index
    %3 = vector.load %arg3[%c0_3, %c0_4] : memref<1x128xf32, #tpu.memory_space<vmem>>, vector<1x128xf32>
    %c0_5 = arith.constant 0 : index
    %c0_6 = arith.constant 0 : index
    %4 = vector.load %arg4[%c0_5, %c0_6] : memref<1x128xf32, #tpu.memory_space<vmem>>, vector<1x128xf32>
    %cst_7 = arith.constant dense<0.000000e+00> : vector<128xf32>
    %5 = vector.multi_reduction <add>, %2, %cst_7 [0] : vector<128x128xf32> to vector<128xf32>
    %6 = vector.shape_cast %5 : vector<128xf32> to vector<1x128xf32>
    %cst_8 = arith.constant 7.812500e-03 : f32
    %7 = vector.broadcast %cst_8 : f32 to vector<1x128xf32>
    %8 = arith.mulf %6, %7 : vector<1x128xf32>
    %9 = vector.broadcast %8 : vector<1x128xf32> to vector<128x128xf32>
    %10 = arith.subf %2, %9 : vector<128x128xf32>
    %11 = arith.mulf %10, %10 : vector<128x128xf32>
    %cst_9 = arith.constant dense<0.000000e+00> : vector<128xf32>
    %12 = vector.multi_reduction <add>, %11, %cst_9 [0] : vector<128x128xf32> to vector<128xf32>
    %13 = vector.shape_cast %12 : vector<128xf32> to vector<1x128xf32>
    %cst_10 = arith.constant 7.812500e-03 : f32
    %14 = vector.broadcast %cst_10 : f32 to vector<1x128xf32>
    %15 = arith.mulf %13, %14 : vector<1x128xf32>
    %cst_11 = arith.constant 9.99999974E-6 : f32
    %16 = vector.broadcast %cst_11 : f32 to vector<1x128xf32>
    %17 = arith.addf %15, %16 : vector<1x128xf32>
    %18 = math.rsqrt %17 : vector<1x128xf32>
    %19 = arith.mulf %3, %18 : vector<1x128xf32>
    %20 = arith.mulf %8, %19 : vector<1x128xf32>
    %21 = arith.subf %4, %20 : vector<1x128xf32>
    %22 = vector.broadcast %19 : vector<1x128xf32> to vector<128x128xf32>
    %23 = arith.mulf %2, %22 : vector<128x128xf32>
    %24 = vector.broadcast %21 : vector<1x128xf32> to vector<128x128xf32>
    %25 = arith.addf %23, %24 : vector<128x128xf32>
    %cst_12 = arith.constant 0.000000e+00 : f32
    %26 = vector.broadcast %cst_12 : f32 to vector<128x128xf32>
    %27 = arith.maximumf %25, %26 : vector<128x128xf32>
    %28 = arith.truncf %27 : vector<128x128xf32> to vector<128x128xbf16>
    %c0_13 = arith.constant 0 : index
    %c0_14 = arith.constant 0 : index
    %29 = vector.load %arg5[%c0_13, %c0_14] : memref<128x128xbf16, #tpu.memory_space<vmem>>, vector<128x128xbf16>
    tpu.vector_store %arg5[%c0_13, %c0_14], %28 {strides = array<i32>} : memref<128x128xbf16, #tpu.memory_space<vmem>>, vector<128x128xbf16>,
    return
  }
  func.func @transform_0(%arg0: i32) -> (i32, i32) {
    %c0_i32 = arith.constant 0 : i32
    %c0_i32_0 = arith.constant 0 : i32
    %c0_i32_1 = arith.constant 0 : i32
    return %c0_i32, %c0_i32_0 : i32, i32
  }
  func.func @transform_1(%arg0: i32) -> (i32, i32) {
    %c0_i32 = arith.constant 0 : i32
    %c0_i32_0 = arith.constant 0 : i32
    %c0_i32_1 = arith.constant 0 : i32
    return %c0_i32, %c0_i32_0 : i32, i32
  }
  func.func @transform_2(%arg0: i32) -> (i32, i32) {
    %c0_i32 = arith.constant 0 : i32
    %c0_i32_0 = arith.constant 0 : i32
    %c0_i32_1 = arith.constant 0 : i32
    return %c0_i32, %c0_i32_0 : i32, i32
  }
  func.func @transform_3(%arg0: i32) -> (i32, i32) {
    %c0_i32 = arith.constant 0 : i32
    %c0_i32_0 = arith.constant 0 : i32
    %c0_i32_1 = arith.constant 0 : i32
    return %c0_i32, %c0_i32_0 : i32, i32
  }
  func.func @transform_4(%arg0: i32) -> (i32, i32) {
    %c0_i32 = arith.constant 0 : i32
    %c0_i32_0 = arith.constant 0 : i32
    %c0_i32_1 = arith.constant 0 : i32
    return %c0_i32, %c0_i32_0 : i32, i32
  }
}

module attributes {stable_mosaic.version = 11 : i64} {
  func.func @_conv_bn_act_kernel(%arg0: i32, %arg1: memref<128x128xbf16, #tpu.memory_space<vmem>>, %arg2: memref<128x128xbf16, #tpu.memory_space<vmem>>, %arg3: memref<1x128xf32, #tpu.memory_space<vmem>>, %arg4: memref<1x128xf32, #tpu.memory_space<vmem>>, %arg5: memref<128x128xbf16, #tpu.memory_space<vmem>>) attributes {dimension_semantics = [#tpu.dimension_semantics<arbitrary>], iteration_bounds = array<i64: 1>, scalar_prefetch = 0 : i64, scratch_operands = 0 : i64, tpu.core_type = #tpu.core_type<tc>, window_params = [{pipeline_mode = #tpu.pipeline_mode<synchronous>, transform_indices = @transform_0, window_bounds = array<i64: 128, 128>}, {pipeline_mode = #tpu.pipeline_mode<synchronous>, transform_indices = @transform_1, window_bounds = array<i64: 128, 128>}, {pipeline_mode = #tpu.pipeline_mode<synchronous>, transform_indices = @transform_2, window_bounds = array<i64: 1, 128>}, {pipeline_mode = #tpu.pipeline_mode<synchronous>, transform_indices = @transform_3, window_bounds = array<i64: 1, 128>}, {pipeline_mode = #tpu.pipeline_mode<synchronous>, transform_indices = @transform_4, window_bounds = array<i64: 128, 128>}]} {
    %c0 = arith.constant 0 : index
    %c0_0 = arith.constant 0 : index
    %0 = vector.load %arg1[%c0, %c0_0] : memref<128x128xbf16, #tpu.memory_space<vmem>>, vector<128x128xbf16>
    %c0_1 = arith.constant 0 : index
    %c0_2 = arith.constant 0 : index
    %1 = vector.load %arg2[%c0_1, %c0_2] : memref<128x128xbf16, #tpu.memory_space<vmem>>, vector<128x128xbf16>
    %cst = arith.constant dense<0.000000e+00> : vector<128x128xf32>
    %2 = tpu.matmul %0, %1, %cst {dimension_numbers = #tpu.dot_dimension_numbers<[1], [0], [0], [1], [0, 0, 1, 1], [], []>} : vector<128x128xbf16>, vector<128x128xbf16>, vector<128x128xf32> -> vector<128x128xf32>
    %c0_3 = arith.constant 0 : index
    %c0_4 = arith.constant 0 : index
    %3 = vector.load %arg3[%c0_3, %c0_4] : memref<1x128xf32, #tpu.memory_space<vmem>>, vector<1x128xf32>
    %c0_5 = arith.constant 0 : index
    %c0_6 = arith.constant 0 : index
    %4 = vector.load %arg4[%c0_5, %c0_6] : memref<1x128xf32, #tpu.memory_space<vmem>>, vector<1x128xf32>
    %cst_7 = arith.constant dense<0.000000e+00> : vector<128xf32>
    %5 = vector.multi_reduction <add>, %2, %cst_7 [0] : vector<128x128xf32> to vector<128xf32>
    %6 = vector.shape_cast %5 : vector<128xf32> to vector<1x128xf32>
    %cst_8 = arith.constant 7.812500e-03 : f32
    %7 = vector.broadcast %cst_8 : f32 to vector<1x128xf32>
    %8 = arith.mulf %6, %7 : vector<1x128xf32>
    %9 = vector.broadcast %8 : vector<1x128xf32> to vector<128x128xf32>
    %10 = arith.subf %2, %9 : vector<128x128xf32>
    %11 = arith.mulf %10, %10 : vector<128x128xf32>
    %cst_9 = arith.constant dense<0.000000e+00> : vector<128xf32>
    %12 = vector.multi_reduction <add>, %11, %cst_9 [0] : vector<128x128xf32> to vector<128xf32>
    %13 = vector.shape_cast %12 : vector<128xf32> to vector<1x128xf32>
    %cst_10 = arith.constant 7.812500e-03 : f32
    %14 = vector.broadcast %cst_10 : f32 to vector<1x128xf32>
    %15 = arith.mulf %13, %14 : vector<1x128xf32>
    %cst_11 = arith.constant 9.99999974E-6 : f32
    %16 = vector.broadcast %cst_11 : f32 to vector<1x128xf32>
    %17 = arith.addf %15, %16 : vector<1x128xf32>
    %18 = math.rsqrt %17 : vector<1x128xf32>
    %19 = arith.mulf %3, %18 : vector<1x128xf32>
    %20 = arith.mulf %8, %19 : vector<1x128xf32>
    %21 = arith.subf %4, %20 : vector<1x128xf32>
    %22 = vector.broadcast %19 : vector<1x128xf32> to vector<128x128xf32>
    %23 = arith.mulf %2, %22 : vector<128x128xf32>
    %24 = vector.broadcast %21 : vector<1x128xf32> to vector<128x128xf32>
    %25 = arith.addf %23, %24 : vector<128x128xf32>
    %cst_12 = arith.constant 0.000000e+00 : f32
    %26 = vector.broadcast %cst_12 : f32 to vector<128x128xf32>
    %27 = arith.maximumf %25, %26 : vector<128x128xf32>
    %28 = arith.truncf %27 : vector<128x128xf32> to vector<128x128xbf16>
    %c0_13 = arith.constant 0 : index
    %c0_14 = arith.constant 0 : index
    %29 = vector.load %arg5[%c0_13, %c0_14] : memref<128x128xbf16, #tpu.memory_space<vmem>>, vector<128x128xbf16>
    tpu.vector_store %arg5[%c0_13, %c0_14], %28 {strides = array<i32>} : memref<128x128xbf16, #tpu.memory_space<vmem>>, vector<128x128xbf16>,
    return
  }
  func.func @transform_0(%arg0: i32) -> (i32, i32) {
    %c0_i32 = arith.constant 0 : i32
    %c0_i32_0 = arith.constant 0 : i32
    %c0_i32_1 = arith.constant 0 : i32
    return %c0_i32, %c0_i32_0 : i32, i32
  }
  func.func @transform_1(%arg0: i32) -> (i32, i32) {
    %c0_i32 = arith.constant 0 : i32
    %c0_i32_0 = arith.constant 0 : i32
    %c0_i32_1 = arith.constant 0 : i32
    return %c0_i32, %c0_i32_0 : i32, i32
  }
  func.func @transform_2(%arg0: i32) -> (i32, i32) {
    %c0_i32 = arith.constant 0 : i32
    %c0_i32_0 = arith.constant 0 : i32
    %c0_i32_1 = arith.constant 0 : i32
    return %c0_i32, %c0_i32_0 : i32, i32
  }
  func.func @transform_3(%arg0: i32) -> (i32, i32) {
    %c0_i32 = arith.constant 0 : i32
    %c0_i32_0 = arith.constant 0 : i32
    %c0_i32_1 = arith.constant 0 : i32
    return %c0_i32, %c0_i32_0 : i32, i32
  }
  func.func @transform_4(%arg0: i32) -> (i32, i32) {
    %c0_i32 = arith.constant 0 : i32
    %c0_i32_0 = arith.constant 0 : i32
    %c0_i32_1 = arith.constant 0 : i32
    return %c0_i32, %c0_i32_0 : i32, i32
  }
}

module attributes {stable_mosaic.version = 11 : i64} {
  func.func @_conv_proj_bn_add_act_kernel(%arg0: i32, %arg1: memref<32x128xbf16, #tpu.memory_space<vmem>>, %arg2: memref<32x128xbf16, #tpu.memory_space<vmem>>, %arg3: memref<128x128xbf16, #tpu.memory_space<vmem>>, %arg4: memref<128x128xbf16, #tpu.memory_space<vmem>>, %arg5: memref<1x128xf32, #tpu.memory_space<vmem>>, %arg6: memref<1x128xf32, #tpu.memory_space<vmem>>, %arg7: memref<1x128xf32, #tpu.memory_space<vmem>>, %arg8: memref<1x128xf32, #tpu.memory_space<vmem>>, %arg9: memref<32x128xbf16, #tpu.memory_space<vmem>>) attributes {dimension_semantics = [#tpu.dimension_semantics<arbitrary>], iteration_bounds = array<i64: 1>, scalar_prefetch = 0 : i64, scratch_operands = 0 : i64, tpu.core_type = #tpu.core_type<tc>, window_params = [{pipeline_mode = #tpu.pipeline_mode<synchronous>, transform_indices = @transform_0, window_bounds = array<i64: 32, 128>}, {pipeline_mode = #tpu.pipeline_mode<synchronous>, transform_indices = @transform_1, window_bounds = array<i64: 32, 128>}, {pipeline_mode = #tpu.pipeline_mode<synchronous>, transform_indices = @transform_2, window_bounds = array<i64: 128, 128>}, {pipeline_mode = #tpu.pipeline_mode<synchronous>, transform_indices = @transform_3, window_bounds = array<i64: 128, 128>}, {pipeline_mode = #tpu.pipeline_mode<synchronous>, transform_indices = @transform_4, window_bounds = array<i64: 1, 128>}, {pipeline_mode = #tpu.pipeline_mode<synchronous>, transform_indices = @transform_5, window_bounds = array<i64: 1, 128>}, {pipeline_mode = #tpu.pipeline_mode<synchronous>, transform_indices = @transform_6, window_bounds = array<i64: 1, 128>}, {pipeline_mode = #tpu.pipeline_mode<synchronous>, transform_indices = @transform_7, window_bounds = array<i64: 1, 128>}, {pipeline_mode = #tpu.pipeline_mode<synchronous>, transform_indices = @transform_8, window_bounds = array<i64: 32, 128>}]} {
    %c0 = arith.constant 0 : index
    %c0_0 = arith.constant 0 : index
    %0 = vector.load %arg1[%c0, %c0_0] : memref<32x128xbf16, #tpu.memory_space<vmem>>, vector<32x128xbf16>
    %c0_1 = arith.constant 0 : index
    %c0_2 = arith.constant 0 : index
    %1 = vector.load %arg3[%c0_1, %c0_2] : memref<128x128xbf16, #tpu.memory_space<vmem>>, vector<128x128xbf16>
    %cst = arith.constant dense<0.000000e+00> : vector<32x128xf32>
    %2 = tpu.matmul %0, %1, %cst {dimension_numbers = #tpu.dot_dimension_numbers<[1], [0], [0], [1], [0, 0, 1, 1], [], []>} : vector<32x128xbf16>, vector<128x128xbf16>, vector<32x128xf32> -> vector<32x128xf32>
    %c0_3 = arith.constant 0 : index
    %c0_4 = arith.constant 0 : index
    %3 = vector.load %arg2[%c0_3, %c0_4] : memref<32x128xbf16, #tpu.memory_space<vmem>>, vector<32x128xbf16>
    %c0_5 = arith.constant 0 : index
    %c0_6 = arith.constant 0 : index
    %4 = vector.load %arg4[%c0_5, %c0_6] : memref<128x128xbf16, #tpu.memory_space<vmem>>, vector<128x128xbf16>
    %cst_7 = arith.constant dense<0.000000e+00> : vector<32x128xf32>
    %5 = tpu.matmul %3, %4, %cst_7 {dimension_numbers = #tpu.dot_dimension_numbers<[1], [0], [0], [1], [0, 0, 1, 1], [], []>} : vector<32x128xbf16>, vector<128x128xbf16>, vector<32x128xf32> -> vector<32x128xf32>
    %c0_8 = arith.constant 0 : index
    %c0_9 = arith.constant 0 : index
    %6 = vector.load %arg5[%c0_8, %c0_9] : memref<1x128xf32, #tpu.memory_space<vmem>>, vector<1x128xf32>
    %c0_10 = arith.constant 0 : index
    %c0_11 = arith.constant 0 : index
    %7 = vector.load %arg6[%c0_10, %c0_11] : memref<1x128xf32, #tpu.memory_space<vmem>>, vector<1x128xf32>
    %cst_12 = arith.constant dense<0.000000e+00> : vector<128xf32>
    %8 = vector.multi_reduction <add>, %2, %cst_12 [0] : vector<32x128xf32> to vector<128xf32>
    %9 = vector.shape_cast %8 : vector<128xf32> to vector<1x128xf32>
    %cst_13 = arith.constant 3.125000e-02 : f32
    %10 = vector.broadcast %cst_13 : f32 to vector<1x128xf32>
    %11 = arith.mulf %9, %10 : vector<1x128xf32>
    %12 = vector.broadcast %11 : vector<1x128xf32> to vector<32x128xf32>
    %13 = arith.subf %2, %12 : vector<32x128xf32>
    %14 = arith.mulf %13, %13 : vector<32x128xf32>
    %cst_14 = arith.constant dense<0.000000e+00> : vector<128xf32>
    %15 = vector.multi_reduction <add>, %14, %cst_14 [0] : vector<32x128xf32> to vector<128xf32>
    %16 = vector.shape_cast %15 : vector<128xf32> to vector<1x128xf32>
    %cst_15 = arith.constant 3.125000e-02 : f32
    %17 = vector.broadcast %cst_15 : f32 to vector<1x128xf32>
    %18 = arith.mulf %16, %17 : vector<1x128xf32>
    %cst_16 = arith.constant 9.99999974E-6 : f32
    %19 = vector.broadcast %cst_16 : f32 to vector<1x128xf32>
    %20 = arith.addf %18, %19 : vector<1x128xf32>
    %21 = math.rsqrt %20 : vector<1x128xf32>
    %22 = arith.mulf %6, %21 : vector<1x128xf32>
    %23 = arith.mulf %11, %22 : vector<1x128xf32>
    %24 = arith.subf %7, %23 : vector<1x128xf32>
    %c0_17 = arith.constant 0 : index
    %c0_18 = arith.constant 0 : index
    %25 = vector.load %arg7[%c0_17, %c0_18] : memref<1x128xf32, #tpu.memory_space<vmem>>, vector<1x128xf32>
    %c0_19 = arith.constant 0 : index
    %c0_20 = arith.constant 0 : index
    %26 = vector.load %arg8[%c0_19, %c0_20] : memref<1x128xf32, #tpu.memory_space<vmem>>, vector<1x128xf32>
    %cst_21 = arith.constant dense<0.000000e+00> : vector<128xf32>
    %27 = vector.multi_reduction <add>, %5, %cst_21 [0] : vector<32x128xf32> to vector<128xf32>
    %28 = vector.shape_cast %27 : vector<128xf32> to vector<1x128xf32>
    %cst_22 = arith.constant 3.125000e-02 : f32
    %29 = vector.broadcast %cst_22 : f32 to vector<1x128xf32>
    %30 = arith.mulf %28, %29 : vector<1x128xf32>
    %31 = vector.broadcast %30 : vector<1x128xf32> to vector<32x128xf32>
    %32 = arith.subf %5, %31 : vector<32x128xf32>
    %33 = arith.mulf %32, %32 : vector<32x128xf32>
    %cst_23 = arith.constant dense<0.000000e+00> : vector<128xf32>
    %34 = vector.multi_reduction <add>, %33, %cst_23 [0] : vector<32x128xf32> to vector<128xf32>
    %35 = vector.shape_cast %34 : vector<128xf32> to vector<1x128xf32>
    %cst_24 = arith.constant 3.125000e-02 : f32
    %36 = vector.broadcast %cst_24 : f32 to vector<1x128xf32>
    %37 = arith.mulf %35, %36 : vector<1x128xf32>
    %cst_25 = arith.constant 9.99999974E-6 : f32
    %38 = vector.broadcast %cst_25 : f32 to vector<1x128xf32>
    %39 = arith.addf %37, %38 : vector<1x128xf32>
    %40 = math.rsqrt %39 : vector<1x128xf32>
    %41 = arith.mulf %25, %40 : vector<1x128xf32>
    %42 = arith.mulf %30, %41 : vector<1x128xf32>
    %43 = arith.subf %26, %42 : vector<1x128xf32>
    %44 = vector.broadcast %22 : vector<1x128xf32> to vector<32x128xf32>
    %45 = arith.mulf %2, %44 : vector<32x128xf32>
    %46 = vector.broadcast %24 : vector<1x128xf32> to vector<32x128xf32>
    %47 = arith.addf %45, %46 : vector<32x128xf32>
    %48 = vector.broadcast %41 : vector<1x128xf32> to vector<32x128xf32>
    %49 = arith.mulf %5, %48 : vector<32x128xf32>
    %50 = vector.broadcast %43 : vector<1x128xf32> to vector<32x128xf32>
    %51 = arith.addf %49, %50 : vector<32x128xf32>
    %52 = arith.addf %47, %51 : vector<32x128xf32>
    %cst_26 = arith.constant 0.000000e+00 : f32
    %53 = vector.broadcast %cst_26 : f32 to vector<32x128xf32>
    %54 = arith.maximumf %52, %53 : vector<32x128xf32>
    %55 = arith.truncf %54 : vector<32x128xf32> to vector<32x128xbf16>
    %c0_27 = arith.constant 0 : index
    %c0_28 = arith.constant 0 : index
    %56 = vector.load %arg9[%c0_27, %c0_28] : memref<32x128xbf16, #tpu.memory_space<vmem>>, vector<32x128xbf16>
    tpu.vector_store %arg9[%c0_27, %c0_28], %55 {strides = array<i32>} : memref<32x128xbf16, #tpu.memory_space<vmem>>, vector<32x128xbf16>,
    return
  }
  func.func @transform_0(%arg0: i32) -> (i32, i32) {
    %c0_i32 = arith.constant 0 : i32
    %c0_i32_0 = arith.constant 0 : i32
    %c0_i32_1 = arith.constant 0 : i32
    return %c0_i32, %c0_i32_0 : i32, i32
  }
  func.func @transform_1(%arg0: i32) -> (i32, i32) {
    %c0_i32 = arith.constant 0 : i32
    %c0_i32_0 = arith.constant 0 : i32
    %c0_i32_1 = arith.constant 0 : i32
    return %c0_i32, %c0_i32_0 : i32, i32
  }
  func.func @transform_2(%arg0: i32) -> (i32, i32) {
    %c0_i32 = arith.constant 0 : i32
    %c0_i32_0 = arith.constant 0 : i32
    %c0_i32_1 = arith.constant 0 : i32
    return %c0_i32, %c0_i32_0 : i32, i32
  }
  func.func @transform_3(%arg0: i32) -> (i32, i32) {
    %c0_i32 = arith.constant 0 : i32
    %c0_i32_0 = arith.constant 0 : i32
    %c0_i32_1 = arith.constant 0 : i32
    return %c0_i32, %c0_i32_0 : i32, i32
  }
  func.func @transform_4(%arg0: i32) -> (i32, i32) {
    %c0_i32 = arith.constant 0 : i32
    %c0_i32_0 = arith.constant 0 : i32
    %c0_i32_1 = arith.constant 0 : i32
    return %c0_i32, %c0_i32_0 : i32, i32
  }
  func.func @transform_5(%arg0: i32) -> (i32, i32) {
    %c0_i32 = arith.constant 0 : i32
    %c0_i32_0 = arith.constant 0 : i32
    %c0_i32_1 = arith.constant 0 : i32
    return %c0_i32, %c0_i32_0 : i32, i32
  }
  func.func @transform_6(%arg0: i32) -> (i32, i32) {
    %c0_i32 = arith.constant 0 : i32
    %c0_i32_0 = arith.constant 0 : i32
    %c0_i32_1 = arith.constant 0 : i32
    return %c0_i32, %c0_i32_0 : i32, i32
  }
  func.func @transform_7(%arg0: i32) -> (i32, i32) {
    %c0_i32 = arith.constant 0 : i32
    %c0_i32_0 = arith.constant 0 : i32
    %c0_i32_1 = arith.constant 0 : i32
    return %c0_i32, %c0_i32_0 : i32, i32
  }
  func.func @transform_8(%arg0: i32) -> (i32, i32) {
    %c0_i32 = arith.constant 0 : i32
    %c0_i32_0 = arith.constant 0 : i32
    %c0_i32_1 = arith.constant 0 : i32
    return %c0_i32, %c0_i32_0 : i32, i32
  }
}

module attributes {stable_mosaic.version = 11 : i64} {
  func.func @_conv_bn_act_kernel(%arg0: i32, %arg1: memref<32x1152xbf16, #tpu.memory_space<vmem>>, %arg2: memref<1152x128xbf16, #tpu.memory_space<vmem>>, %arg3: memref<1x128xf32, #tpu.memory_space<vmem>>, %arg4: memref<1x128xf32, #tpu.memory_space<vmem>>, %arg5: memref<32x128xbf16, #tpu.memory_space<vmem>>) attributes {dimension_semantics = [#tpu.dimension_semantics<arbitrary>], iteration_bounds = array<i64: 1>, scalar_prefetch = 0 : i64, scratch_operands = 0 : i64, tpu.core_type = #tpu.core_type<tc>, window_params = [{pipeline_mode = #tpu.pipeline_mode<synchronous>, transform_indices = @transform_0, window_bounds = array<i64: 32, 1152>}, {pipeline_mode = #tpu.pipeline_mode<synchronous>, transform_indices = @transform_1, window_bounds = array<i64: 1152, 128>}, {pipeline_mode = #tpu.pipeline_mode<synchronous>, transform_indices = @transform_2, window_bounds = array<i64: 1, 128>}, {pipeline_mode = #tpu.pipeline_mode<synchronous>, transform_indices = @transform_3, window_bounds = array<i64: 1, 128>}, {pipeline_mode = #tpu.pipeline_mode<synchronous>, transform_indices = @transform_4, window_bounds = array<i64: 32, 128>}]} {
    %c0 = arith.constant 0 : index
    %c0_0 = arith.constant 0 : index
    %0 = vector.load %arg1[%c0, %c0_0] : memref<32x1152xbf16, #tpu.memory_space<vmem>>, vector<32x1152xbf16>
    %c0_1 = arith.constant 0 : index
    %c0_2 = arith.constant 0 : index
    %1 = vector.load %arg2[%c0_1, %c0_2] : memref<1152x128xbf16, #tpu.memory_space<vmem>>, vector<1152x128xbf16>
    %cst = arith.constant dense<0.000000e+00> : vector<32x128xf32>
    %2 = tpu.matmul %0, %1, %cst {dimension_numbers = #tpu.dot_dimension_numbers<[1], [0], [0], [1], [0, 0, 1, 1], [], []>} : vector<32x1152xbf16>, vector<1152x128xbf16>, vector<32x128xf32> -> vector<32x128xf32>
    %c0_3 = arith.constant 0 : index
    %c0_4 = arith.constant 0 : index
    %3 = vector.load %arg3[%c0_3, %c0_4] : memref<1x128xf32, #tpu.memory_space<vmem>>, vector<1x128xf32>
    %c0_5 = arith.constant 0 : index
    %c0_6 = arith.constant 0 : index
    %4 = vector.load %arg4[%c0_5, %c0_6] : memref<1x128xf32, #tpu.memory_space<vmem>>, vector<1x128xf32>
    %cst_7 = arith.constant dense<0.000000e+00> : vector<128xf32>
    %5 = vector.multi_reduction <add>, %2, %cst_7 [0] : vector<32x128xf32> to vector<128xf32>
    %6 = vector.shape_cast %5 : vector<128xf32> to vector<1x128xf32>
    %cst_8 = arith.constant 3.125000e-02 : f32
    %7 = vector.broadcast %cst_8 : f32 to vector<1x128xf32>
    %8 = arith.mulf %6, %7 : vector<1x128xf32>
    %9 = vector.broadcast %8 : vector<1x128xf32> to vector<32x128xf32>
    %10 = arith.subf %2, %9 : vector<32x128xf32>
    %11 = arith.mulf %10, %10 : vector<32x128xf32>
    %cst_9 = arith.constant dense<0.000000e+00> : vector<128xf32>
    %12 = vector.multi_reduction <add>, %11, %cst_9 [0] : vector<32x128xf32> to vector<128xf32>
    %13 = vector.shape_cast %12 : vector<128xf32> to vector<1x128xf32>
    %cst_10 = arith.constant 3.125000e-02 : f32
    %14 = vector.broadcast %cst_10 : f32 to vector<1x128xf32>
    %15 = arith.mulf %13, %14 : vector<1x128xf32>
    %cst_11 = arith.constant 9.99999974E-6 : f32
    %16 = vector.broadcast %cst_11 : f32 to vector<1x128xf32>
    %17 = arith.addf %15, %16 : vector<1x128xf32>
    %18 = math.rsqrt %17 : vector<1x128xf32>
    %19 = arith.mulf %3, %18 : vector<1x128xf32>
    %20 = arith.mulf %8, %19 : vector<1x128xf32>
    %21 = arith.subf %4, %20 : vector<1x128xf32>
    %22 = vector.broadcast %19 : vector<1x128xf32> to vector<32x128xf32>
    %23 = arith.mulf %2, %22 : vector<32x128xf32>
    %24 = vector.broadcast %21 : vector<1x128xf32> to vector<32x128xf32>
    %25 = arith.addf %23, %24 : vector<32x128xf32>
    %cst_12 = arith.constant 0.000000e+00 : f32
    %26 = vector.broadcast %cst_12 : f32 to vector<32x128xf32>
    %27 = arith.maximumf %25, %26 : vector<32x128xf32>
    %28 = arith.truncf %27 : vector<32x128xf32> to vector<32x128xbf16>
    %c0_13 = arith.constant 0 : index
    %c0_14 = arith.constant 0 : index
    %29 = vector.load %arg5[%c0_13, %c0_14] : memref<32x128xbf16, #tpu.memory_space<vmem>>, vector<32x128xbf16>
    tpu.vector_store %arg5[%c0_13, %c0_14], %28 {strides = array<i32>} : memref<32x128xbf16, #tpu.memory_space<vmem>>, vector<32x128xbf16>,
    return
  }
  func.func @transform_0(%arg0: i32) -> (i32, i32) {
    %c0_i32 = arith.constant 0 : i32
    %c0_i32_0 = arith.constant 0 : i32
    %c0_i32_1 = arith.constant 0 : i32
    return %c0_i32, %c0_i32_0 : i32, i32
  }
  func.func @transform_1(%arg0: i32) -> (i32, i32) {
    %c0_i32 = arith.constant 0 : i32
    %c0_i32_0 = arith.constant 0 : i32
    %c0_i32_1 = arith.constant 0 : i32
    return %c0_i32, %c0_i32_0 : i32, i32
  }
  func.func @transform_2(%arg0: i32) -> (i32, i32) {
    %c0_i32 = arith.constant 0 : i32
    %c0_i32_0 = arith.constant 0 : i32
    %c0_i32_1 = arith.constant 0 : i32
    return %c0_i32, %c0_i32_0 : i32, i32
  }
  func.func @transform_3(%arg0: i32) -> (i32, i32) {
    %c0_i32 = arith.constant 0 : i32
    %c0_i32_0 = arith.constant 0 : i32
    %c0_i32_1 = arith.constant 0 : i32
    return %c0_i32, %c0_i32_0 : i32, i32
  }
  func.func @transform_4(%arg0: i32) -> (i32, i32) {
    %c0_i32 = arith.constant 0 : i32
    %c0_i32_0 = arith.constant 0 : i32
    %c0_i32_1 = arith.constant 0 : i32
    return %c0_i32, %c0_i32_0 : i32, i32
  }
}

module attributes {stable_mosaic.version = 11 : i64} {
  func.func @_conv_bn_act_kernel(%arg0: i32, %arg1: memref<32x128xbf16, #tpu.memory_space<vmem>>, %arg2: memref<128x128xbf16, #tpu.memory_space<vmem>>, %arg3: memref<1x128xf32, #tpu.memory_space<vmem>>, %arg4: memref<1x128xf32, #tpu.memory_space<vmem>>, %arg5: memref<32x128xbf16, #tpu.memory_space<vmem>>) attributes {dimension_semantics = [#tpu.dimension_semantics<arbitrary>], iteration_bounds = array<i64: 1>, scalar_prefetch = 0 : i64, scratch_operands = 0 : i64, tpu.core_type = #tpu.core_type<tc>, window_params = [{pipeline_mode = #tpu.pipeline_mode<synchronous>, transform_indices = @transform_0, window_bounds = array<i64: 32, 128>}, {pipeline_mode = #tpu.pipeline_mode<synchronous>, transform_indices = @transform_1, window_bounds = array<i64: 128, 128>}, {pipeline_mode = #tpu.pipeline_mode<synchronous>, transform_indices = @transform_2, window_bounds = array<i64: 1, 128>}, {pipeline_mode = #tpu.pipeline_mode<synchronous>, transform_indices = @transform_3, window_bounds = array<i64: 1, 128>}, {pipeline_mode = #tpu.pipeline_mode<synchronous>, transform_indices = @transform_4, window_bounds = array<i64: 32, 128>}]} {
    %c0 = arith.constant 0 : index
    %c0_0 = arith.constant 0 : index
    %0 = vector.load %arg1[%c0, %c0_0] : memref<32x128xbf16, #tpu.memory_space<vmem>>, vector<32x128xbf16>
    %c0_1 = arith.constant 0 : index
    %c0_2 = arith.constant 0 : index
    %1 = vector.load %arg2[%c0_1, %c0_2] : memref<128x128xbf16, #tpu.memory_space<vmem>>, vector<128x128xbf16>
    %cst = arith.constant dense<0.000000e+00> : vector<32x128xf32>
    %2 = tpu.matmul %0, %1, %cst {dimension_numbers = #tpu.dot_dimension_numbers<[1], [0], [0], [1], [0, 0, 1, 1], [], []>} : vector<32x128xbf16>, vector<128x128xbf16>, vector<32x128xf32> -> vector<32x128xf32>
    %c0_3 = arith.constant 0 : index
    %c0_4 = arith.constant 0 : index
    %3 = vector.load %arg3[%c0_3, %c0_4] : memref<1x128xf32, #tpu.memory_space<vmem>>, vector<1x128xf32>
    %c0_5 = arith.constant 0 : index
    %c0_6 = arith.constant 0 : index
    %4 = vector.load %arg4[%c0_5, %c0_6] : memref<1x128xf32, #tpu.memory_space<vmem>>, vector<1x128xf32>
    %cst_7 = arith.constant dense<0.000000e+00> : vector<128xf32>
    %5 = vector.multi_reduction <add>, %2, %cst_7 [0] : vector<32x128xf32> to vector<128xf32>
    %6 = vector.shape_cast %5 : vector<128xf32> to vector<1x128xf32>
    %cst_8 = arith.constant 3.125000e-02 : f32
    %7 = vector.broadcast %cst_8 : f32 to vector<1x128xf32>
    %8 = arith.mulf %6, %7 : vector<1x128xf32>
    %9 = vector.broadcast %8 : vector<1x128xf32> to vector<32x128xf32>
    %10 = arith.subf %2, %9 : vector<32x128xf32>
    %11 = arith.mulf %10, %10 : vector<32x128xf32>
    %cst_9 = arith.constant dense<0.000000e+00> : vector<128xf32>
    %12 = vector.multi_reduction <add>, %11, %cst_9 [0] : vector<32x128xf32> to vector<128xf32>
    %13 = vector.shape_cast %12 : vector<128xf32> to vector<1x128xf32>
    %cst_10 = arith.constant 3.125000e-02 : f32
    %14 = vector.broadcast %cst_10 : f32 to vector<1x128xf32>
    %15 = arith.mulf %13, %14 : vector<1x128xf32>
    %cst_11 = arith.constant 9.99999974E-6 : f32
    %16 = vector.broadcast %cst_11 : f32 to vector<1x128xf32>
    %17 = arith.addf %15, %16 : vector<1x128xf32>
    %18 = math.rsqrt %17 : vector<1x128xf32>
    %19 = arith.mulf %3, %18 : vector<1x128xf32>
    %20 = arith.mulf %8, %19 : vector<1x128xf32>
    %21 = arith.subf %4, %20 : vector<1x128xf32>
    %22 = vector.broadcast %19 : vector<1x128xf32> to vector<32x128xf32>
    %23 = arith.mulf %2, %22 : vector<32x128xf32>
    %24 = vector.broadcast %21 : vector<1x128xf32> to vector<32x128xf32>
    %25 = arith.addf %23, %24 : vector<32x128xf32>
    %cst_12 = arith.constant 0.000000e+00 : f32
    %26 = vector.broadcast %cst_12 : f32 to vector<32x128xf32>
    %27 = arith.maximumf %25, %26 : vector<32x128xf32>
    %28 = arith.truncf %27 : vector<32x128xf32> to vector<32x128xbf16>
    %c0_13 = arith.constant 0 : index
    %c0_14 = arith.constant 0 : index
    %29 = vector.load %arg5[%c0_13, %c0_14] : memref<32x128xbf16, #tpu.memory_space<vmem>>, vector<32x128xbf16>
    tpu.vector_store %arg5[%c0_13, %c0_14], %28 {strides = array<i32>} : memref<32x128xbf16, #tpu.memory_space<vmem>>, vector<32x128xbf16>,
    return
  }
  func.func @transform_0(%arg0: i32) -> (i32, i32) {
    %c0_i32 = arith.constant 0 : i32
    %c0_i32_0 = arith.constant 0 : i32
    %c0_i32_1 = arith.constant 0 : i32
    return %c0_i32, %c0_i32_0 : i32, i32
  }
  func.func @transform_1(%arg0: i32) -> (i32, i32) {
    %c0_i32 = arith.constant 0 : i32
    %c0_i32_0 = arith.constant 0 : i32
    %c0_i32_1 = arith.constant 0 : i32
    return %c0_i32, %c0_i32_0 : i32, i32
  }
  func.func @transform_2(%arg0: i32) -> (i32, i32) {
    %c0_i32 = arith.constant 0 : i32
    %c0_i32_0 = arith.constant 0 : i32
    %c0_i32_1 = arith.constant 0 : i32
    return %c0_i32, %c0_i32_0 : i32, i32
  }
  func.func @transform_3(%arg0: i32) -> (i32, i32) {
    %c0_i32 = arith.constant 0 : i32
    %c0_i32_0 = arith.constant 0 : i32
    %c0_i32_1 = arith.constant 0 : i32
    return %c0_i32, %c0_i32_0 : i32, i32
  }
  func.func @transform_4(%arg0: i32) -> (i32, i32) {
    %c0_i32 = arith.constant 0 : i32
    %c0_i32_0 = arith.constant 0 : i32
    %c0_i32_1 = arith.constant 0 : i32
    return %c0_i32, %c0_i32_0 : i32, i32
  }
}

module attributes {stable_mosaic.version = 11 : i64} {
  func.func @_conv_bn_addres_act_kernel(%arg0: i32, %arg1: memref<32x128xbf16, #tpu.memory_space<vmem>>, %arg2: memref<32x128xbf16, #tpu.memory_space<vmem>>, %arg3: memref<128x128xbf16, #tpu.memory_space<vmem>>, %arg4: memref<1x128xf32, #tpu.memory_space<vmem>>, %arg5: memref<1x128xf32, #tpu.memory_space<vmem>>, %arg6: memref<32x128xbf16, #tpu.memory_space<vmem>>) attributes {dimension_semantics = [#tpu.dimension_semantics<arbitrary>], iteration_bounds = array<i64: 1>, scalar_prefetch = 0 : i64, scratch_operands = 0 : i64, tpu.core_type = #tpu.core_type<tc>, window_params = [{pipeline_mode = #tpu.pipeline_mode<synchronous>, transform_indices = @transform_0, window_bounds = array<i64: 32, 128>}, {pipeline_mode = #tpu.pipeline_mode<synchronous>, transform_indices = @transform_1, window_bounds = array<i64: 32, 128>}, {pipeline_mode = #tpu.pipeline_mode<synchronous>, transform_indices = @transform_2, window_bounds = array<i64: 128, 128>}, {pipeline_mode = #tpu.pipeline_mode<synchronous>, transform_indices = @transform_3, window_bounds = array<i64: 1, 128>}, {pipeline_mode = #tpu.pipeline_mode<synchronous>, transform_indices = @transform_4, window_bounds = array<i64: 1, 128>}, {pipeline_mode = #tpu.pipeline_mode<synchronous>, transform_indices = @transform_5, window_bounds = array<i64: 32, 128>}]} {
    %c0 = arith.constant 0 : index
    %c0_0 = arith.constant 0 : index
    %0 = vector.load %arg1[%c0, %c0_0] : memref<32x128xbf16, #tpu.memory_space<vmem>>, vector<32x128xbf16>
    %c0_1 = arith.constant 0 : index
    %c0_2 = arith.constant 0 : index
    %1 = vector.load %arg3[%c0_1, %c0_2] : memref<128x128xbf16, #tpu.memory_space<vmem>>, vector<128x128xbf16>
    %cst = arith.constant dense<0.000000e+00> : vector<32x128xf32>
    %2 = tpu.matmul %0, %1, %cst {dimension_numbers = #tpu.dot_dimension_numbers<[1], [0], [0], [1], [0, 0, 1, 1], [], []>} : vector<32x128xbf16>, vector<128x128xbf16>, vector<32x128xf32> -> vector<32x128xf32>
    %c0_3 = arith.constant 0 : index
    %c0_4 = arith.constant 0 : index
    %3 = vector.load %arg4[%c0_3, %c0_4] : memref<1x128xf32, #tpu.memory_space<vmem>>, vector<1x128xf32>
    %c0_5 = arith.constant 0 : index
    %c0_6 = arith.constant 0 : index
    %4 = vector.load %arg5[%c0_5, %c0_6] : memref<1x128xf32, #tpu.memory_space<vmem>>, vector<1x128xf32>
    %cst_7 = arith.constant dense<0.000000e+00> : vector<128xf32>
    %5 = vector.multi_reduction <add>, %2, %cst_7 [0] : vector<32x128xf32> to vector<128xf32>
    %6 = vector.shape_cast %5 : vector<128xf32> to vector<1x128xf32>
    %cst_8 = arith.constant 3.125000e-02 : f32
    %7 = vector.broadcast %cst_8 : f32 to vector<1x128xf32>
    %8 = arith.mulf %6, %7 : vector<1x128xf32>
    %9 = vector.broadcast %8 : vector<1x128xf32> to vector<32x128xf32>
    %10 = arith.subf %2, %9 : vector<32x128xf32>
    %11 = arith.mulf %10, %10 : vector<32x128xf32>
    %cst_9 = arith.constant dense<0.000000e+00> : vector<128xf32>
    %12 = vector.multi_reduction <add>, %11, %cst_9 [0] : vector<32x128xf32> to vector<128xf32>
    %13 = vector.shape_cast %12 : vector<128xf32> to vector<1x128xf32>
    %cst_10 = arith.constant 3.125000e-02 : f32
    %14 = vector.broadcast %cst_10 : f32 to vector<1x128xf32>
    %15 = arith.mulf %13, %14 : vector<1x128xf32>
    %cst_11 = arith.constant 9.99999974E-6 : f32
    %16 = vector.broadcast %cst_11 : f32 to vector<1x128xf32>
    %17 = arith.addf %15, %16 : vector<1x128xf32>
    %18 = math.rsqrt %17 : vector<1x128xf32>
    %19 = arith.mulf %3, %18 : vector<1x128xf32>
    %20 = arith.mulf %8, %19 : vector<1x128xf32>
    %21 = arith.subf %4, %20 : vector<1x128xf32>
    %22 = vector.broadcast %19 : vector<1x128xf32> to vector<32x128xf32>
    %23 = arith.mulf %2, %22 : vector<32x128xf32>
    %24 = vector.broadcast %21 : vector<1x128xf32> to vector<32x128xf32>
    %25 = arith.addf %23, %24 : vector<32x128xf32>
    %c0_12 = arith.constant 0 : index
    %c0_13 = arith.constant 0 : index
    %26 = vector.load %arg2[%c0_12, %c0_13] : memref<32x128xbf16, #tpu.memory_space<vmem>>, vector<32x128xbf16>
    %27 = arith.extf %26 : vector<32x128xbf16> to vector<32x128xf32>
    %28 = arith.addf %25, %27 : vector<32x128xf32>
    %cst_14 = arith.constant 0.000000e+00 : f32
    %29 = vector.broadcast %cst_14 : f32 to vector<32x128xf32>
    %30 = arith.maximumf %28, %29 : vector<32x128xf32>
    %31 = arith.truncf %30 : vector<32x128xf32> to vector<32x128xbf16>
    %c0_15 = arith.constant 0 : index
    %c0_16 = arith.constant 0 : index
    %32 = vector.load %arg6[%c0_15, %c0_16] : memref<32x128xbf16, #tpu.memory_space<vmem>>, vector<32x128xbf16>
    tpu.vector_store %arg6[%c0_15, %c0_16], %31 {strides = array<i32>} : memref<32x128xbf16, #tpu.memory_space<vmem>>, vector<32x128xbf16>,
    return
  }
  func.func @transform_0(%arg0: i32) -> (i32, i32) {
    %c0_i32 = arith.constant 0 : i32
    %c0_i32_0 = arith.constant 0 : i32
    %c0_i32_1 = arith.constant 0 : i32
    return %c0_i32, %c0_i32_0 : i32, i32
  }
  func.func @transform_1(%arg0: i32) -> (i32, i32) {
    %c0_i32 = arith.constant 0 : i32
    %c0_i32_0 = arith.constant 0 : i32
    %c0_i32_1 = arith.constant 0 : i32
    return %c0_i32, %c0_i32_0 : i32, i32
  }
  func.func @transform_2(%arg0: i32) -> (i32, i32) {
    %c0_i32 = arith.constant 0 : i32
    %c0_i32_0 = arith.constant 0 : i32
    %c0_i32_1 = arith.constant 0 : i32
    return %c0_i32, %c0_i32_0 : i32, i32
  }
  func.func @transform_3(%arg0: i32) -> (i32, i32) {
    %c0_i32 = arith.constant 0 : i32
    %c0_i32_0 = arith.constant 0 : i32
    %c0_i32_1 = arith.constant 0 : i32
    return %c0_i32, %c0_i32_0 : i32, i32
  }
  func.func @transform_4(%arg0: i32) -> (i32, i32) {
    %c0_i32 = arith.constant 0 : i32
    %c0_i32_0 = arith.constant 0 : i32
    %c0_i32_1 = arith.constant 0 : i32
    return %c0_i32, %c0_i32_0 : i32, i32
  }
  func.func @transform_5(%arg0: i32) -> (i32, i32) {
    %c0_i32 = arith.constant 0 : i32
    %c0_i32_0 = arith.constant 0 : i32
    %c0_i32_1 = arith.constant 0 : i32
    return %c0_i32, %c0_i32_0 : i32, i32
  }
}

module attributes {stable_mosaic.version = 11 : i64} {
  func.func @_head_kernel(%arg0: i32, %arg1: memref<2x16x128xbf16, #tpu.memory_space<vmem>>, %arg2: memref<128x128xbf16, #tpu.memory_space<vmem>>, %arg3: memref<1x128xf32, #tpu.memory_space<vmem>>, %arg4: memref<2x128xf32, #tpu.memory_space<vmem>>) attributes {dimension_semantics = [#tpu.dimension_semantics<arbitrary>], iteration_bounds = array<i64: 1>, scalar_prefetch = 0 : i64, scratch_operands = 0 : i64, tpu.core_type = #tpu.core_type<tc>, window_params = [{pipeline_mode = #tpu.pipeline_mode<synchronous>, transform_indices = @transform_0, window_bounds = array<i64: 2, 16, 128>}, {pipeline_mode = #tpu.pipeline_mode<synchronous>, transform_indices = @transform_1, window_bounds = array<i64: 128, 128>}, {pipeline_mode = #tpu.pipeline_mode<synchronous>, transform_indices = @transform_2, window_bounds = array<i64: 1, 128>}, {pipeline_mode = #tpu.pipeline_mode<synchronous>, transform_indices = @transform_3, window_bounds = array<i64: 2, 128>}]} {
    %c0 = arith.constant 0 : index
    %c0_0 = arith.constant 0 : index
    %c0_1 = arith.constant 0 : index
    %0 = vector.load %arg1[%c0, %c0_0, %c0_1] : memref<2x16x128xbf16, #tpu.memory_space<vmem>>, vector<2x16x128xbf16>
    %1 = arith.extf %0 : vector<2x16x128xbf16> to vector<2x16x128xf32>
    %cst = arith.constant dense<0.000000e+00> : vector<2x128xf32>
    %2 = vector.multi_reduction <add>, %1, %cst [1] : vector<2x16x128xf32> to vector<2x128xf32>
    %cst_2 = arith.constant 6.250000e-02 : f32
    %3 = vector.broadcast %cst_2 : f32 to vector<2x128xf32>
    %4 = arith.mulf %2, %3 : vector<2x128xf32>
    %5 = arith.truncf %4 : vector<2x128xf32> to vector<2x128xbf16>
    %c0_3 = arith.constant 0 : index
    %c0_4 = arith.constant 0 : index
    %6 = vector.load %arg2[%c0_3, %c0_4] : memref<128x128xbf16, #tpu.memory_space<vmem>>, vector<128x128xbf16>
    %cst_5 = arith.constant dense<0.000000e+00> : vector<2x128xf32>
    %7 = tpu.matmul %5, %6, %cst_5 {dimension_numbers = #tpu.dot_dimension_numbers<[1], [0], [0], [1], [0, 0, 1, 1], [], []>} : vector<2x128xbf16>, vector<128x128xbf16>, vector<2x128xf32> -> vector<2x128xf32>
    %c0_6 = arith.constant 0 : index
    %c0_7 = arith.constant 0 : index
    %8 = vector.load %arg3[%c0_6, %c0_7] : memref<1x128xf32, #tpu.memory_space<vmem>>, vector<1x128xf32>
    %9 = vector.broadcast %8 : vector<1x128xf32> to vector<2x128xf32>
    %10 = arith.addf %7, %9 : vector<2x128xf32>
    %c0_8 = arith.constant 0 : index
    %c0_9 = arith.constant 0 : index
    %11 = vector.load %arg4[%c0_8, %c0_9] : memref<2x128xf32, #tpu.memory_space<vmem>>, vector<2x128xf32>
    tpu.vector_store %arg4[%c0_8, %c0_9], %10 {strides = array<i32>} : memref<2x128xf32, #tpu.memory_space<vmem>>, vector<2x128xf32>,
    return
  }
  func.func @transform_0(%arg0: i32) -> (i32, i32, i32) {
    %c0_i32 = arith.constant 0 : i32
    %c0_i32_0 = arith.constant 0 : i32
    %c0_i32_1 = arith.constant 0 : i32
    %c0_i32_2 = arith.constant 0 : i32
    return %c0_i32, %c0_i32_0, %c0_i32_1 : i32, i32, i32
  }
  func.func @transform_1(%arg0: i32) -> (i32, i32) {
    %c0_i32 = arith.constant 0 : i32
    %c0_i32_0 = arith.constant 0 : i32
    %c0_i32_1 = arith.constant 0 : i32
    return %c0_i32, %c0_i32_0 : i32, i32
  }
  func.func @transform_2(%arg0: i32) -> (i32, i32) {
    %c0_i32 = arith.constant 0 : i32
    %c0_i32_0 = arith.constant 0 : i32
    %c0_i32_1 = arith.constant 0 : i32
    return %c0_i32, %c0_i32_0 : i32, i32
  }
  func.func @transform_3(%arg0: i32) -> (i32, i32) {
    %c0_i32 = arith.constant 0 : i32
    %c0_i32_0 = arith.constant 0 : i32
    %c0_i32_1 = arith.constant 0 : i32
    return %c0_i32, %c0_i32_0 : i32, i32
  }
}

</mosaic_0001>

<bundles_post_ra>
// kernel: _lambda_.9
= control target key start
LH: loop header
LB: loop body
LE: loop exit
PB: predicated region body
PF: predicated region fallthrough
CT: control target
= control target key end

     0   :  { %s849_s1 = inlined_call_operand.vmem [shape: bf16[128,128], index: 1, kind: input, shape index: {}]   ;;  %s850_s0 = inlined_call_operand.vmem [shape: bf16[128,128], index: 0, kind: input, shape index: {}]   ;;  %s851_s2 = inlined_call_operand.vmem [shape: f32[1,128], index: 2, kind: input, shape index: {}]   ;;  %s852_s3 = inlined_call_operand.vmem [shape: f32[1,128], index: 3, kind: input, shape index: {}]   ;;  %s853_s4 = inlined_call_operand.vmem [shape: bf16[128,128], index: 4, kind: output, shape index: {}]  }
   0x1   :  { %v629_v0 = vld [vmem:[%s849_s1] sm:$0xff]   ;;  %v630_v1 = vld [vmem:[%s849_s1 + $0x8] sm:$0xff]   ;;  %v631_v2 = vld [vmem:[%s849_s1 + $0x10] sm:$0xff]  }
   0x2   :  { %581 = vmatprep.subr.bf16.mxu0 %v629_v0  ;;  %613 = vmatprep.subr.bf16.mxu1 %v629_v0  ;;  %v632_v3 = vld [vmem:[%s849_s1 + $0x18] sm:$0xff]   ;;  %v637_v4 = vld [vmem:[%s850_s0] sm:$0xff]   ;;  %v634_v7 = vld [vmem:[%s849_s1 + $0x28] sm:$0xff]  }
   0x3   :  { %582 = vmatpush3.bf16.msra.mxu0 %v629_v0  ;;  %621 = vmatpush3.bf16.msra.mxu1 %v629_v0  ;;  %v633_v5 = vld [vmem:[%s849_s1 + $0x20] sm:$0xff]   ;;  %v635_v8 = vld [vmem:[%s849_s1 + $0x30] sm:$0xff]   ;;  %v636_v9 = vld [vmem:[%s849_s1 + $0x38] sm:$0xff]  }
   0x4   :  { %583 = vmatprep.subr.bf16.mxu0 %v630_v1  ;;  %614 = vmatprep.subr.bf16.mxu1 %v630_v1  ;;  %v641_v6 = vld [vmem:[%s850_s0 + $0x20] sm:$0xff]   ;;  %v638_v10 = vld [vmem:[%s850_s0 + $0x8] sm:$0xff]   ;;  %v639_v12 = vld [vmem:[%s850_s0 + $0x10] sm:$0xff]  }
   0x5   :  { %597 = vmatprep.mubr.bf16.mxu0 %v637_v4  ;;  %605 = vmatprep.mubr.bf16.mxu1 %v641_v6  ;;  %v642_v11 = vld [vmem:[%s850_s0 + $0x28] sm:$0xff]   ;;  %v643_v13 = vld [vmem:[%s850_s0 + $0x30] sm:$0xff]   ;;  %v640_v14 = vld [vmem:[%s850_s0 + $0x18] sm:$0xff]  }
   0x6   :  { %v644_v15 = vld [vmem:[%s850_s0 + $0x38] sm:$0xff]  }
   0x7   :  { %584 = vmatpush3.bf16.msra.mxu0 %v630_v1  ;;  %622 = vmatpush3.bf16.msra.mxu1 %v630_v1 }
   0x8   :  { %585 = vmatprep.subr.bf16.mxu0 %v631_v2  ;;  %615 = vmatprep.subr.bf16.mxu1 %v631_v2 }
   0xb   :  { %586 = vmatpush3.bf16.msra.mxu0 %v631_v2  ;;  %623 = vmatpush3.bf16.msra.mxu1 %v631_v2 }
   0xc   :  { %587 = vmatprep.subr.bf16.mxu0 %v632_v3  ;;  %616 = vmatprep.subr.bf16.mxu1 %v632_v3 }
   0xf   :  { %588 = vmatpush3.bf16.msra.mxu0 %v632_v3  ;;  %624 = vmatpush3.bf16.msra.mxu1 %v632_v3 }
  0x10   :  { %589 = vmatprep.subr.bf16.mxu0 %v633_v5  ;;  %617 = vmatprep.subr.bf16.mxu1 %v633_v5 }
  0x13   :  { %590 = vmatpush3.bf16.msra.mxu0 %v633_v5  ;;  %625 = vmatpush3.bf16.msra.mxu1 %v633_v5 }
  0x14   :  { %591 = vmatprep.subr.bf16.mxu0 %v634_v7  ;;  %618 = vmatprep.subr.bf16.mxu1 %v634_v7 }
  0x17   :  { %592 = vmatpush3.bf16.msra.mxu0 %v634_v7  ;;  %626 = vmatpush3.bf16.msra.mxu1 %v634_v7 }
  0x18   :  { %593 = vmatprep.subr.bf16.mxu0 %v635_v8  ;;  %619 = vmatprep.subr.bf16.mxu1 %v635_v8 }
  0x1b   :  { %594 = vmatpush3.bf16.msra.mxu0 %v635_v8  ;;  %627 = vmatpush3.bf16.msra.mxu1 %v635_v8 }
  0x1c   :  { %595 = vmatprep.subr.bf16.mxu0 %v636_v9  ;;  %620 = vmatprep.subr.bf16.mxu1 %v636_v9 }
  0x1f   :  { %596 = vmatpush3.bf16.msra.mxu0 %v636_v9  ;;  %628 = vmatpush3.bf16.msra.mxu1 %v636_v9 }
  0x22   :  { %598 = vmatmul.mubr.bf16.vlgmr.msra.gmra.mrb[0].mxu0 %v638_v10  ;;  %606 = vmatmul.mubr.bf16.vlgmr.msra.gmra.mrb[0].mxu1 %v642_v11 }
  0x23   :  { %601 = vmatprep.mubr.bf16.mxu0 %v639_v12  ;;  %609 = vmatprep.mubr.bf16.mxu1 %v643_v13 }
  0x2a   :  { %602 = vmatmul.mubr.bf16.gmra.mrb[4].mxu0 %v640_v14  ;;  %610 = vmatmul.mubr.bf16.gmra.mrb[4].mxu1 %v644_v15 }
  0xf5   :  { %v720_v16 = vpop.f32.mrb[0].mxu0  ;;  %v722_v17 = vpop.f32.mrb[0].mxu1 }
  0xf6   :  { %v724_v18 = vpop.f32.mrb[1].mxu0  ;;  %v726_v19 = vpop.f32.mrb[1].mxu1 }
  0xf7   :  { %v728_v20 = vpop.f32.mrb[2].mxu0  ;;  %v730_v21 = vpop.f32.mrb[2].mxu1 }
  0xf8   :  { %v732_v22 = vpop.f32.mrb[3].mxu0  ;;  %v734_v23 = vpop.f32.mrb[3].mxu1 }
  0xf9   :  { %v245_v24 = vadd.f32 %v732_v22, %v724_v18 }
  0xfb   :  { %v246_v25 = vadd.f32 %v720_v16, %v245_v24 }
  0xfd   :  { %v739_v26 = vpop.f32.mrb[4].mxu0  ;;  %v247_v27 = vadd.f32 %v728_v20, %v246_v25  ;;  %v742_v28 = vpop.f32.mrb[4].mxu1 }
  0xfe   :  { %v744_v29 = vpop.f32.mrb[5].mxu0  ;;  %v746_v30 = vpop.f32.mrb[5].mxu1 }
  0xff   :  { %v248_v31 = vadd.f32 %v247_v27, %v744_v29  ;;  %v749_v32 = vpop.f32.mrb[6].mxu0  ;;  %v751_v33 = vpop.f32.mrb[6].mxu1 }
 0x100   :  { %v753_v34 = vpop.f32.mrb[7].mxu0  ;;  %v755_v35 = vpop.f32.mrb[7].mxu1 }
 0x101   :  { %v249_v36 = vadd.f32 %v248_v31, %v753_v34 }
 0x103   :  { %v250_v37 = vadd.f32 %v739_v26, %v249_v36 }
 0x105   :  { %v251_v38 = vadd.f32 %v749_v32, %v250_v37 }
 0x107   :  { %v252_v39 = vadd.f32 %v251_v38, %v726_v19 }
 0x109   :  { %v253_v40 = vadd.f32 %v252_v39, %v734_v23 }
 0x10b   :  { %v254_v41 = vadd.f32 %v722_v17, %v253_v40 }
 0x10d   :  { %v255_v42 = vadd.f32 %v730_v21, %v254_v41 }
 0x10f   :  { %v256_v43 = vadd.f32 %v255_v42, %v746_v30 }
 0x111   :  { %v257_v44 = vadd.f32 %v256_v43, %v755_v35 }
 0x113   :  { %v258_v45 = vadd.f32 %v742_v28, %v257_v44 }
 0x115   :  { %v259_v46 = vadd.f32 %v751_v33, %v258_v45 }
 0x117   :  { %v260_v47 = vrot.slane %v259_v46, 4 }
 0x119   :  { %v261_v48 = vadd.f32 %v260_v47, %v259_v46 }
 0x11b   :  { %v262_v49 = vrot.slane %v261_v48, 2 }
 0x11d   :  { %v263_v50 = vadd.f32 %v262_v49, %v261_v48 }
 0x11f   :  { %v264_v51 = vrot.slane %v263_v50, 1 }
 0x121   :  { %v265_v52 = vadd.f32 %v264_v51, %v263_v50 }
 0x123   :  { %v768_v53 = vmul.f32 0.0078125, %v265_v52 }
 0x125   :  { %v267_v54 = vsub.f32 %v724_v18, %v768_v53  ;;  %v268_v55 = vsub.f32 %v732_v22, %v768_v53  ;;  %v269_v56 = vsub.f32 %v720_v16, %v768_v53  ;;  %v270_v57 = vsub.f32 %v728_v20, %v768_v53 }
 0x126   :  { %v271_v58 = vsub.f32 %v744_v29, %v768_v53  ;;  %v272_v59 = vsub.f32 %v753_v34, %v768_v53  ;;  %v273_v60 = vsub.f32 %v739_v26, %v768_v53  ;;  %v274_v61 = vsub.f32 %v749_v32, %v768_v53 }
 0x127   :  { %v275_v62 = vsub.f32 %v726_v19, %v768_v53  ;;  %v276_v63 = vsub.f32 %v734_v23, %v768_v53  ;;  %v277_v0 = vsub.f32 %v722_v17, %v768_v53  ;;  %v278_v1 = vsub.f32 %v730_v21, %v768_v53 }
 0x128   :  { %v279_v2 = vsub.f32 %v746_v30, %v768_v53  ;;  %v280_v3 = vsub.f32 %v755_v35, %v768_v53  ;;  %v281_v4 = vsub.f32 %v742_v28, %v768_v53  ;;  %v282_v5 = vsub.f32 %v751_v33, %v768_v53 }
 0x129   :  { %v283_v6 = vmul.f32 %v267_v54, %v267_v54  ;;  %v284_v7 = vmul.f32 %v268_v55, %v268_v55  ;;  %v285_v8 = vmul.f32 %v269_v56, %v269_v56  ;;  %v286_v10 = vmul.f32 %v270_v57, %v270_v57 }
 0x12a   :  { %v287_v12 = vmul.f32 %v271_v58, %v271_v58  ;;  %v288_v14 = vmul.f32 %v272_v59, %v272_v59  ;;  %v289_v24 = vmul.f32 %v273_v60, %v273_v60  ;;  %v290_v27 = vmul.f32 %v274_v61, %v274_v61 }
 0x12b   :  { %v299_v9 = vadd.f32 %v284_v7, %v283_v6  ;;  %v291_v36 = vmul.f32 %v275_v62, %v275_v62  ;;  %v292_v38 = vmul.f32 %v276_v63, %v276_v63  ;;  %v293_v40 = vmul.f32 %v277_v0, %v277_v0  ;;  %v243_v0 = vld [vmem:[%s851_s2] sm:$0x1] }
 0x12c   :  { %v294_v42 = vmul.f32 %v278_v1, %v278_v1  ;;  %v295_v44 = vmul.f32 %v279_v2, %v279_v2  ;;  %v296_v46 = vmul.f32 %v280_v3, %v280_v3  ;;  %v297_v48 = vmul.f32 %v281_v4, %v281_v4  ;;  %v244_v4 = vld [vmem:[%s852_s3] sm:$0x1] }
 0x12d   :  { %v300_v11 = vadd.f32 %v299_v9, %v285_v8  ;;  %v298_v50 = vmul.f32 %v282_v5, %v282_v5  ;;  %v327_v62 = vlaneseq }
 0x12f   :  { %v301_v13 = vadd.f32 %v300_v11, %v286_v10  ;;  %v328_v63 = vshrl.u32 %v327_v62, 7 }
 0x131   :  { %v302_v15 = vadd.f32 %v301_v13, %v287_v12  ;;  %v329_v1 = vsub.s32 0, %v328_v63 }
 0x133   :  { %v303_v25 = vadd.f32 %v302_v15, %v288_v14 }
 0x135   :  { %v304_v31 = vadd.f32 %v303_v25, %v289_v24 }
 0x137   :  { %v305_v37 = vadd.f32 %v304_v31, %v290_v27 }
 0x139   :  { %v306_v39 = vadd.f32 %v305_v37, %v291_v36 }
 0x13b   :  { %v307_v41 = vadd.f32 %v306_v39, %v292_v38 }
 0x13d   :  { %v308_v43 = vadd.f32 %v307_v41, %v293_v40 }
 0x13f   :  { %v309_v45 = vadd.f32 %v308_v43, %v294_v42 }
 0x141   :  { %v310_v47 = vadd.f32 %v309_v45, %v295_v44 }
 0x143   :  { %v311_v49 = vadd.f32 %v310_v47, %v296_v46 }
 0x145   :  { %v312_v51 = vadd.f32 %v311_v49, %v297_v48 }
 0x147   :  { %v313_v52 = vadd.f32 %v312_v51, %v298_v50 }
 0x149   :  { %v314_v54 = vrot.slane %v313_v52, 4 }
 0x14b   :  { %v315_v55 = vadd.f32 %v314_v54, %v313_v52 }
 0x14d   :  { %v316_v56 = vrot.slane %v315_v55, 2 }
 0x14f   :  { %v317_v57 = vadd.f32 %v316_v56, %v315_v55 }
 0x151   :  { %v318_v58 = vrot.slane %v317_v57, 1 }
 0x153   :  { %v319_v59 = vadd.f32 %v318_v58, %v317_v57 }
 0x155   :  { %v320_v60 = vmul.f32 0.0078125, %v319_v59 }
 0x157   :  { %v321_v61 = vadd.f32 1e-05, %v320_v60 }
 0x159   :  { %645 = vrsqrt.f32 %v321_v61 }
 0x163   :  { %v646_v2 = vpop.eup %645 }
 0x164   :  { %v323_v3 = vmul.f32 %v646_v2, %v243_v0 }
 0x166   :  { %v324_v5 = vmul.f32 %v323_v3, %v768_v53  ;;  %v330_v6 = vrot.slane %v323_v3, %v329_v1 }
 0x168   :  { %v325_v7 = vsub.f32 %v244_v4, %v324_v5  ;;  %v332_v8 = vmul.f32 %v330_v6, %v724_v18  ;;  %v333_v9 = vmul.f32 %v330_v6, %v732_v22  ;;  %v334_v10 = vmul.f32 %v720_v16, %v330_v6 }
 0x169   :  { %v335_v11 = vmul.f32 %v728_v20, %v330_v6  ;;  %v336_v12 = vmul.f32 %v330_v6, %v744_v29  ;;  %v337_v13 = vmul.f32 %v330_v6, %v753_v34  ;;  %v338_v14 = vmul.f32 %v739_v26, %v330_v6 }
 0x16a   :  { %v339_v15 = vmul.f32 %v749_v32, %v330_v6  ;;  %v340_v53 = vmul.f32 %v330_v6, %v726_v19  ;;  %v341_v24 = vmul.f32 %v330_v6, %v734_v23  ;;  %v342_v18 = vmul.f32 %v722_v17, %v330_v6 }
 0x16b   :  { %v343_v22 = vmul.f32 %v730_v21, %v330_v6  ;;  %v344_v16 = vmul.f32 %v330_v6, %v746_v30  ;;  %v345_v20 = vmul.f32 %v330_v6, %v755_v35  ;;  %v346_v29 = vmul.f32 %v742_v28, %v330_v6 }
 0x16c   :  { %v347_v34 = vmul.f32 %v751_v33, %v330_v6  ;;  %v352_v25 = vrot.slane %v325_v7, %v329_v1 }
 0x16e   :  { %v354_v26 = vadd.f32 %v352_v25, %v332_v8  ;;  %v355_v27 = vadd.f32 %v352_v25, %v333_v9  ;;  %v356_v32 = vadd.f32 %v352_v25, %v334_v10  ;;  %v357_v31 = vadd.f32 %v352_v25, %v335_v11 }
 0x16f   :  { %v358_v19 = vadd.f32 %v352_v25, %v336_v12  ;;  %v359_v36 = vadd.f32 %v352_v25, %v337_v13  ;;  %v360_v23 = vadd.f32 %v352_v25, %v338_v14  ;;  %v361_v37 = vadd.f32 %v352_v25, %v339_v15 }
 0x170   :  { %v362_v17 = vadd.f32 %v352_v25, %v340_v53  ;;  %v363_v38 = vadd.f32 %v352_v25, %v341_v24  ;;  %v364_v21 = vadd.f32 %v352_v25, %v342_v18  ;;  %v365_v39 = vadd.f32 %v352_v25, %v343_v22 }
 0x171   :  { %v366_v30 = vadd.f32 %v352_v25, %v344_v16  ;;  %v367_v40 = vadd.f32 %v352_v25, %v345_v20  ;;  %v368_v35 = vadd.f32 %v352_v25, %v346_v29  ;;  %v369_v41 = vadd.f32 %v352_v25, %v347_v34 }
 0x172   :  { %v370_v28 = vmax.f32 %v354_v26, 0.0  ;;  %v371_v42 = vmax.f32 %v355_v27, 0.0  ;;  %v372_v33 = vmax.f32 %v356_v32, 0.0  ;;  %v373_v43 = vmax.f32 %v357_v31, 0.0 }
 0x173   :  { %v374_v44 = vmax.f32 %v358_v19, 0.0  ;;  %v375_v45 = vmax.f32 %v359_v36, 0.0  ;;  %v376_v46 = vmax.f32 %v360_v23, 0.0  ;;  %v377_v47 = vmax.f32 %v361_v37, 0.0 }
 0x174   :  { %v378_v48 = vmax.f32 %v362_v17, 0.0  ;;  %v379_v49 = vmax.f32 %v363_v38, 0.0  ;;  %v380_v50 = vmax.f32 %v364_v21, 0.0  ;;  %v381_v51 = vmax.f32 %v365_v39, 0.0 }
 0x175   :  { %v382_v52 = vmax.f32 %v366_v30, 0.0  ;;  %v383_v54 = vmax.f32 %v367_v40, 0.0  ;;  %v384_v55 = vmax.f32 %v368_v35, 0.0  ;;  %v385_v56 = vmax.f32 %v369_v41, 0.0 }
 0x176   :  { %v521_v57 = vpack.c.bf16 %v371_v42, %v370_v28  ;;  %v526_v58 = vpack.c.bf16 %v373_v43, %v372_v33  ;;  %v531_v59 = vpack.c.bf16 %v375_v45, %v374_v44  ;;  %v536_v60 = vpack.c.bf16 %v377_v47, %v376_v46 }
 0x177   :  { %v541_v61 = vpack.c.bf16 %v379_v49, %v378_v48  ;;  %v546_v62 = vpack.c.bf16 %v381_v51, %v380_v50  ;;  %v551_v63 = vpack.c.bf16 %v383_v54, %v382_v52  ;;  %v556_v0 = vpack.c.bf16 %v385_v56, %v384_v55 }
 0x178   :  { %522 = vst [vmem:[%s853_s4] sm:$0xff] %v521_v57   ;;  %558 = vst [vmem:[%s853_s4 + $0x8] sm:$0xff] %v526_v58  }
 0x179   :  { %559 = vst [vmem:[%s853_s4 + $0x10] sm:$0xff] %v531_v59   ;;  %560 = vst [vmem:[%s853_s4 + $0x18] sm:$0xff] %v536_v60  }
 0x17a   :  { %561 = vst [vmem:[%s853_s4 + $0x20] sm:$0xff] %v541_v61   ;;  %562 = vst [vmem:[%s853_s4 + $0x28] sm:$0xff] %v546_v62  }
 0x17b   :  { %563 = vst [vmem:[%s853_s4 + $0x30] sm:$0xff] %v551_v63   ;;  %564 = vst [vmem:[%s853_s4 + $0x38] sm:$0xff] %v556_v0  }

// kernel: _lambda_.8
= control target key start
LH: loop header
LB: loop body
LE: loop exit
PB: predicated region body
PF: predicated region fallthrough
CT: control target
= control target key end

     0   :  { %s3136_s1 = inlined_call_operand.vmem [shape: bf16[1152,128], index: 1, kind: input, shape index: {}]   ;;  %s3137_s0 = inlined_call_operand.vmem [shape: bf16[128,1152], index: 0, kind: input, shape index: {}]   ;;  %s3138_s2 = inlined_call_operand.vmem [shape: f32[1,128], index: 2, kind: input, shape index: {}]   ;;  %s3139_s3 = inlined_call_operand.vmem [shape: f32[1,128], index: 3, kind: input, shape index: {}]   ;;  %s3140_s4 = inlined_call_operand.vmem [shape: bf16[128,128], index: 4, kind: output, shape index: {}]  }
   0x1   :  { %v2297_v0 = vld [vmem:[%s3136_s1 + $0x40] sm:$0xff]   ;;  %v2301_v4 = vld [vmem:[%s3136_s1 + $0x48] sm:$0xff]   ;;  %v2305_v8 = vld [vmem:[%s3136_s1 + $0x50] sm:$0xff]  }
   0x2   :  { %v2298_v1 = vld [vmem:[%s3136_s1 + $0xc0] sm:$0xff]   ;;  %1977 = vmatprep.subr.bf16.mxu0 %v2297_v0  ;;  %v2302_v5 = vld [vmem:[%s3136_s1 + $0xc8] sm:$0xff]   ;;  %v2306_v9 = vld [vmem:[%s3136_s1 + $0xd0] sm:$0xff]  }
   0x3   :  { %v2299_v2 = vld [vmem:[%s3136_s1] sm:$0xff]   ;;  %2041 = vmatprep.subr.bf16.mxu1 %v2298_v1  ;;  %v2303_v6 = vld [vmem:[%s3136_s1 + $0x8] sm:$0xff]   ;;  %v2307_v10 = vld [vmem:[%s3136_s1 + $0x10] sm:$0xff]  }
   0x4   :  { %v2300_v3 = vld [vmem:[%s3136_s1 + $0x80] sm:$0xff]   ;;  %1978 = vmatpush3.bf16.msra.mxu0 %v2299_v2  ;;  %v2304_v7 = vld [vmem:[%s3136_s1 + $0x88] sm:$0xff]   ;;  %v2308_v11 = vld [vmem:[%s3136_s1 + $0x90] sm:$0xff]  }
   0x5   :  { %2042 = vmatpush3.bf16.msra.mxu1 %v2300_v3  ;;  %1979 = vmatprep.subr.bf16.mxu0 %v2301_v4  ;;  %v2309_v12 = vld [vmem:[%s3136_s1 + $0x58] sm:$0xff]   ;;  %v2313_v16 = vld [vmem:[%s3136_s1 + $0x60] sm:$0xff]   ;;  %v2317_v20 = vld [vmem:[%s3136_s1 + $0x68] sm:$0xff]  }
   0x6   :  { %2043 = vmatprep.subr.bf16.mxu1 %v2302_v5  ;;  %v2310_v13 = vld [vmem:[%s3136_s1 + $0xd8] sm:$0xff]   ;;  %v2314_v17 = vld [vmem:[%s3136_s1 + $0xe0] sm:$0xff]   ;;  %v2318_v21 = vld [vmem:[%s3136_s1 + $0xe8] sm:$0xff]  }
   0x7   :  { %v2311_v14 = vld [vmem:[%s3136_s1 + $0x18] sm:$0xff]   ;;  %v2315_v18 = vld [vmem:[%s3136_s1 + $0x20] sm:$0xff]   ;;  %v2319_v22 = vld [vmem:[%s3136_s1 + $0x28] sm:$0xff]  }
   0x8   :  { %1980 = vmatpush3.bf16.msra.mxu0 %v2303_v6  ;;  %v2312_v15 = vld [vmem:[%s3136_s1 + $0x98] sm:$0xff]   ;;  %v2316_v19 = vld [vmem:[%s3136_s1 + $0xa0] sm:$0xff]   ;;  %v2320_v23 = vld [vmem:[%s3136_s1 + $0xa8] sm:$0xff]  }
   0x9   :  { %2044 = vmatpush3.bf16.msra.mxu1 %v2304_v7  ;;  %1981 = vmatprep.subr.bf16.mxu0 %v2305_v8  ;;  %v2321_v24 = vld [vmem:[%s3136_s1 + $0x70] sm:$0xff]   ;;  %v2325_v28 = vld [vmem:[%s3136_s1 + $0x78] sm:$0xff]   ;;  %v2329_v32 = vld [vmem:[%s3137_s0] ss:$36 sps:$4 sm:$0xff]  }
   0xa   :  { %2045 = vmatprep.subr.bf16.mxu1 %v2306_v9  ;;  %v2322_v25 = vld [vmem:[%s3136_s1 + $0xf0] sm:$0xff]   ;;  %v2326_v29 = vld [vmem:[%s3136_s1 + $0xf8] sm:$0xff]   ;;  %v2331_v33 = vld [vmem:[%s3137_s0 + $0x4] ss:$36 sps:$4 sm:$0xff]  }
   0xb   :  { %v2323_v26 = vld [vmem:[%s3136_s1 + $0x30] sm:$0xff]   ;;  %v2327_v30 = vld [vmem:[%s3136_s1 + $0x38] sm:$0xff]   ;;  %v2332_v34 = vld [vmem:[%s3137_s0 + $0x8] ss:$36 sps:$4 sm:$0xff]   ;;  %1074 = vmatprep.mubr.bf16.mxu0 %v2331_v33 }
   0xc   :  { %1982 = vmatpush3.bf16.msra.mxu0 %v2307_v10  ;;  %v2324_v27 = vld [vmem:[%s3136_s1 + $0xb0] sm:$0xff]   ;;  %v2328_v31 = vld [vmem:[%s3136_s1 + $0xb8] sm:$0xff]   ;;  %v2335_v36 = vld [vmem:[%s3136_s1 + $0x140] sm:$0xff]  }
   0xd   :  { %2046 = vmatpush3.bf16.msra.mxu1 %v2308_v11  ;;  %1983 = vmatprep.subr.bf16.mxu0 %v2309_v12  ;;  %v2334_v35 = vld [vmem:[%s3137_s0 + $0xc] ss:$36 sps:$4 sm:$0xff]   ;;  %v2336_v37 = vld [vmem:[%s3136_s1 + $0x100] sm:$0xff]   ;;  %v2339_v39 = vld [vmem:[%s3137_s0 + $0x54] ss:$36 sps:$4 sm:$0xff]  }
   0xe   :  { %2047 = vmatprep.subr.bf16.mxu1 %v2310_v13  ;;  %1171 = vmatprep.mubr.bf16.mxu1 %v2334_v35  ;;  %v2337_v38 = vld [vmem:[%s3137_s0 + $0x4c] ss:$36 sps:$4 sm:$0xff]   ;;  %v2345_v44 = vld [vmem:[%s3137_s0 + $0x94] ss:$36 sps:$4 sm:$0xff]   ;;  %v2347_v45 = vld [vmem:[%s3137_s0 + $0x9c] ss:$36 sps:$4 sm:$0xff]  }
   0xf   :  { %v2341_v40 = vld [vmem:[%s3137_s0 + $0x48] ss:$36 sps:$4 sm:$0xff]   ;;  %v2342_v41 = vld [vmem:[%s3137_s0 + $0x50] ss:$36 sps:$4 sm:$0xff]   ;;  %v2352_v47 = vld [vmem:[%s3136_s1 + $0x1c0] sm:$0xff]  }
  0x10   :  { %1984 = vmatpush3.bf16.msra.mxu0 %v2311_v14  ;;  %v2343_v42 = vld [vmem:[%s3136_s1 + $0x148] sm:$0xff]   ;;  %v2351_v46 = vld [vmem:[%s3136_s1 + $0x150] sm:$0xff]   ;;  %v2354_v50 = vld [vmem:[%s3136_s1 + $0x180] sm:$0xff]  }
  0x11   :  { %2048 = vmatpush3.bf16.msra.mxu1 %v2312_v15  ;;  %1985 = vmatprep.subr.bf16.mxu0 %v2313_v16  ;;  %v2344_v43 = vld [vmem:[%s3136_s1 + $0x108] sm:$0xff]   ;;  %v2349_v48 = vld [vmem:[%s3137_s0 + $0x90] ss:$36 sps:$4 sm:$0xff]   ;;  %v2350_v51 = vld [vmem:[%s3137_s0 + $0x98] ss:$36 sps:$4 sm:$0xff]  }
  0x12   :  { %2049 = vmatprep.subr.bf16.mxu1 %v2314_v17  ;;  %v2353_v49 = vld [vmem:[%s3136_s1 + $0x110] sm:$0xff]   ;;  %v2355_v52 = vld [vmem:[%s3137_s0 + $0xdc] ss:$36 sps:$4 sm:$0xff]   ;;  %v2357_v53 = vld [vmem:[%s3137_s0 + $0xe4] ss:$36 sps:$4 sm:$0xff]  }
  0x13   :  { %v2361_v54 = vld [vmem:[%s3136_s1 + $0x158] sm:$0xff]   ;;  %v2362_v55 = vld [vmem:[%s3136_s1 + $0x1c8] sm:$0xff]   ;;  %v2360_v59 = vld [vmem:[%s3137_s0 + $0xe0] ss:$36 sps:$4 sm:$0xff]  }
  0x14   :  { %1986 = vmatpush3.bf16.msra.mxu0 %v2315_v18  ;;  %v2363_v56 = vld [vmem:[%s3136_s1 + $0x118] sm:$0xff]   ;;  %v2364_v57 = vld [vmem:[%s3136_s1 + $0x188] sm:$0xff]   ;;  %v2371_v62 = vld [vmem:[%s3136_s1 + $0x160] sm:$0xff]  }
  0x15   :  { %2050 = vmatpush3.bf16.msra.mxu1 %v2316_v19  ;;  %1987 = vmatprep.subr.bf16.mxu0 %v2317_v20  ;;  %v2359_v58 = vld [vmem:[%s3137_s0 + $0xd8] ss:$36 sps:$4 sm:$0xff]   ;;  %v2365_v60 = vld [vmem:[%s3137_s0 + $0x124] ss:$36 sps:$4 sm:$0xff]   ;;  %v2367_v61 = vld [vmem:[%s3137_s0 + $0x12c] ss:$36 sps:$4 sm:$0xff]  }
  0x16   :  { %2051 = vmatprep.subr.bf16.mxu1 %v2318_v21  ;;  %v2372_v63 = vld [vmem:[%s3136_s1 + $0x1d0] sm:$0xff]   ;;  %v2373_v0 = vld [vmem:[%s3136_s1 + $0x120] sm:$0xff]   ;;  %v2370_v3 = vld [vmem:[%s3137_s0 + $0x128] ss:$36 sps:$4 sm:$0xff]  }
  0x17   :  { %v2374_v1 = vld [vmem:[%s3136_s1 + $0x190] sm:$0xff]   ;;  %v2369_v2 = vld [vmem:[%s3137_s0 + $0x120] ss:$36 sps:$4 sm:$0xff]   ;;  %v2381_v6 = vld [vmem:[%s3136_s1 + $0x168] sm:$0xff]  }
  0x18   :  { %1988 = vmatpush3.bf16.msra.mxu0 %v2319_v22  ;;  %v2375_v4 = vld [vmem:[%s3137_s0 + $0x16c] ss:$36 sps:$4 sm:$0xff]   ;;  %v2377_v5 = vld [vmem:[%s3137_s0 + $0x174] ss:$36 sps:$4 sm:$0xff]   ;;  %v2387_v14 = vld [vmem:[%s3137_s0 + $0x1bc] ss:$36 sps:$4 sm:$0xff]  }
  0x19   :  { %2052 = vmatpush3.bf16.msra.mxu1 %v2320_v23  ;;  %1989 = vmatprep.subr.bf16.mxu0 %v2321_v24  ;;  %v2382_v7 = vld [vmem:[%s3136_s1 + $0x1d8] sm:$0xff]   ;;  %v2383_v8 = vld [vmem:[%s3136_s1 + $0x128] sm:$0xff]   ;;  %v2380_v11 = vld [vmem:[%s3137_s0 + $0x170] ss:$36 sps:$4 sm:$0xff]  }
  0x1a   :  { %2053 = vmatprep.subr.bf16.mxu1 %v2322_v25  ;;  %v2384_v9 = vld [vmem:[%s3136_s1 + $0x198] sm:$0xff]   ;;  %v2379_v10 = vld [vmem:[%s3137_s0 + $0x168] ss:$36 sps:$4 sm:$0xff]   ;;  %v2391_v13 = vld [vmem:[%s3136_s1 + $0x170] sm:$0xff]  }
  0x1b   :  { %v2385_v12 = vld [vmem:[%s3137_s0 + $0x1b4] ss:$36 sps:$4 sm:$0xff]   ;;  %v2392_v15 = vld [vmem:[%s3136_s1 + $0x1e0] sm:$0xff]   ;;  %v2395_v18 = vld [vmem:[%s3136_s1 + $0x1e8] sm:$0xff]  }
  0x1c   :  { %1990 = vmatpush3.bf16.msra.mxu0 %v2323_v26  ;;  %v2393_v16 = vld [vmem:[%s3136_s1 + $0x130] sm:$0xff]   ;;  %v2394_v17 = vld [vmem:[%s3136_s1 + $0x1a0] sm:$0xff]   ;;  %v2396_v19 = vld [vmem:[%s3136_s1 + $0x1a8] sm:$0xff]  }
  0x1d   :  { %2054 = vmatpush3.bf16.msra.mxu1 %v2324_v27  ;;  %1991 = vmatprep.subr.bf16.mxu0 %v2325_v28  ;;  %v2389_v20 = vld [vmem:[%s3137_s0 + $0x1b0] ss:$36 sps:$4 sm:$0xff]   ;;  %v2390_v21 = vld [vmem:[%s3137_s0 + $0x1b8] ss:$36 sps:$4 sm:$0xff]   ;;  %v2399_v23 = vld [vmem:[%s3137_s0 + $0x204] ss:$36 sps:$4 sm:$0xff]  }
  0x1e   :  { %2055 = vmatprep.subr.bf16.mxu1 %v2326_v29  ;;  %v2397_v22 = vld [vmem:[%s3137_s0 + $0x1fc] ss:$36 sps:$4 sm:$0xff]   ;;  %v2404_v25 = vld [vmem:[%s3136_s1 + $0x1f0] sm:$0xff]  }
  0x1f   :  { %v2403_v24 = vld [vmem:[%s3136_s1 + $0x178] sm:$0xff]   ;;  %v2406_v27 = vld [vmem:[%s3136_s1 + $0x1b0] sm:$0xff]  }
  0x20   :  { %1992 = vmatpush3.bf16.msra.mxu0 %v2327_v30  ;;  %v2405_v26 = vld [vmem:[%s3136_s1 + $0x138] sm:$0xff]   ;;  %v2402_v30 = vld [vmem:[%s3137_s0 + $0x200] ss:$36 sps:$4 sm:$0xff]   ;;  %v2409_v35 = vld [vmem:[%s3137_s0 + $0x10] ss:$36 sps:$4 sm:$0xff]  }
  0x21   :  { %2056 = vmatpush3.bf16.msra.mxu1 %v2328_v31  ;;  %2105 = vmatprep.subr.bf16.mxu0 %v2335_v36  ;;  %v2407_v28 = vld [vmem:[%s3136_s1 + $0x1f8] sm:$0xff]  }
  0x22   :  { %2169 = vmatprep.subr.bf16.mxu1 %v2352_v47  ;;  %v2401_v29 = vld [vmem:[%s3137_s0 + $0x1f8] ss:$36 sps:$4 sm:$0xff]   ;;  %v2427_v47 = vld [vmem:[%s3137_s0 + $0xa0] ss:$36 sps:$4 sm:$0xff]  }
  0x23   :  { %1075 = vmatmul.mubr.bf16.vlgmr.msra.gmra.mrb[0].mxu0 %v2329_v32  ;;  %v2408_v31 = vld [vmem:[%s3136_s1 + $0x1b8] sm:$0xff]   ;;  %v2415_v32 = vld [vmem:[%s3136_s1 + $0x200] sm:$0xff]  }
  0x24   :  { %1172 = vmatmul.mubr.bf16.vlgmr.msra.gmra.mrb[0].mxu1 %v2332_v34  ;;  %2106 = vmatpush3.bf16.msra.mxu0 %v2336_v37  ;;  %v2411_v33 = vld [vmem:[%s3137_s0 + $0x14] ss:$36 sps:$4 sm:$0xff]   ;;  %v2414_v34 = vld [vmem:[%s3137_s0 + $0x1c] ss:$36 sps:$4 sm:$0xff]  }
  0x25   :  { %1082 = vmatprep.mubr.bf16.mxu0 %v2337_v38  ;;  %1179 = vmatprep.mubr.bf16.mxu1 %v2339_v39  ;;  %v2412_v36 = vld [vmem:[%s3137_s0 + $0x18] ss:$36 sps:$4 sm:$0xff]   ;;  %v2418_v38 = vld [vmem:[%s3137_s0 + $0x64] ss:$36 sps:$4 sm:$0xff]  }
  0x26   :  { %2107 = vmatprep.subr.bf16.mxu0 %v2343_v42  ;;  %2170 = vmatpush3.bf16.msra.mxu1 %v2354_v50  ;;  %v2416_v37 = vld [vmem:[%s3137_s0 + $0x5c] ss:$36 sps:$4 sm:$0xff]   ;;  %v2422_v39 = vld [vmem:[%s3136_s1 + $0x208] sm:$0xff]   ;;  %v2432_v50 = vld [vmem:[%s3137_s0 + $0xf4] ss:$36 sps:$4 sm:$0xff]  }
  0x27   :  { %2171 = vmatprep.subr.bf16.mxu1 %v2362_v55  ;;  %v2421_v42 = vld [vmem:[%s3137_s0 + $0x60] ss:$36 sps:$4 sm:$0xff]   ;;  %v2437_v55 = vld [vmem:[%s3137_s0 + $0x134] ss:$36 sps:$4 sm:$0xff]  }
  0x28   :  { %2108 = vmatpush3.bf16.msra.mxu0 %v2344_v43  ;;  %v2423_v43 = vld [vmem:[%s3137_s0 + $0xa4] ss:$36 sps:$4 sm:$0xff]  }
  0x29   :  { %2109 = vmatprep.subr.bf16.mxu0 %v2351_v46  ;;  %v2443_v46 = vld [vmem:[%s3136_s1 + $0x220] sm:$0xff]  }
  0x2a   :  { %2172 = vmatpush3.bf16.msra.mxu1 %v2364_v57  ;;  %v2464_v57 = vld [vmem:[%s3136_s1 + $0x238] sm:$0xff]  }
  0x2b   :  { %1083 = vmatmul.mubr.bf16.gmra.mrb[4].mxu0 %v2341_v40  ;;  %2173 = vmatprep.subr.bf16.mxu1 %v2372_v63  ;;  %v2429_v40 = vld [vmem:[%s3136_s1 + $0x210] sm:$0xff]   ;;  %v2449_v63 = vld [vmem:[%s3137_s0 + $0x180] ss:$36 sps:$4 sm:$0xff]  }
  0x2c   :  { %1180 = vmatmul.mubr.bf16.gmra.mrb[4].mxu1 %v2342_v41  ;;  %1090 = vmatprep.mubr.bf16.mxu0 %v2345_v44  ;;  %v2420_v41 = vld [vmem:[%s3137_s0 + $0x58] ss:$36 sps:$4 sm:$0xff]   ;;  %v2425_v44 = vld [vmem:[%s3137_s0 + $0xac] ss:$36 sps:$4 sm:$0xff]  }
  0x2d   :  { %1187 = vmatprep.mubr.bf16.mxu1 %v2347_v45  ;;  %2110 = vmatpush3.bf16.msra.mxu0 %v2353_v49  ;;  %v2436_v45 = vld [vmem:[%s3136_s1 + $0x218] sm:$0xff]   ;;  %v2430_v49 = vld [vmem:[%s3137_s0 + $0xec] ss:$36 sps:$4 sm:$0xff]  }
  0x2e   :  { %2111 = vmatprep.subr.bf16.mxu0 %v2361_v54  ;;  %2174 = vmatpush3.bf16.msra.mxu1 %v2374_v1  ;;  %v2435_v54 = vld [vmem:[%s3137_s0 + $0xf0] ss:$36 sps:$4 sm:$0xff]  }
  0x2f   :  { %2175 = vmatprep.subr.bf16.mxu1 %v2382_v7  ;;  %v2453_v1 = vld [vmem:[%s3137_s0 + $0x1cc] ss:$36 sps:$4 sm:$0xff]  }
  0x30   :  { %v2463_v7 = vld [vmem:[%s3137_s0 + $0x210] ss:$36 sps:$4 sm:$0xff]  }
  0x31   :  { %2112 = vmatpush3.bf16.msra.mxu0 %v2363_v56  ;;  %v2439_v56 = vld [vmem:[%s3137_s0 + $0x13c] ss:$36 sps:$4 sm:$0xff]  }
  0x32   :  { %2113 = vmatprep.subr.bf16.mxu0 %v2371_v62  ;;  %2176 = vmatpush3.bf16.msra.mxu1 %v2384_v9  ;;  %v2448_v62 = vld [vmem:[%s3137_s0 + $0x178] ss:$36 sps:$4 sm:$0xff]   ;;  %v2466_v9 = vld [vmem:[%s3137_s0 + $0x140] ss:$36 sps:$4 sm:$0xff]  }
  0x33   :  { %1091 = vmatmul.mubr.bf16.gmra.mrb[8].mxu0 %v2349_v48  ;;  %2177 = vmatprep.subr.bf16.mxu1 %v2392_v15  ;;  %v2428_v48 = vld [vmem:[%s3137_s0 + $0xa8] ss:$36 sps:$4 sm:$0xff]   ;;  %v2472_v15 = vld [vmem:[%s3137_s0 + $0x218] ss:$36 sps:$4 sm:$0xff]  }
  0x34   :  { %1188 = vmatmul.mubr.bf16.gmra.mrb[8].mxu1 %v2350_v51  ;;  %1098 = vmatprep.mubr.bf16.mxu0 %v2355_v52  ;;  %v2450_v51 = vld [vmem:[%s3136_s1 + $0x228] sm:$0xff]  }
  0x35   :  { %1195 = vmatprep.mubr.bf16.mxu1 %v2357_v53  ;;  %2114 = vmatpush3.bf16.msra.mxu0 %v2373_v0  ;;  %v2434_v52 = vld [vmem:[%s3137_s0 + $0xe8] ss:$36 sps:$4 sm:$0xff]   ;;  %v2457_v53 = vld [vmem:[%s3136_s1 + $0x230] sm:$0xff]  }
  0x36   :  { %2115 = vmatprep.subr.bf16.mxu0 %v2381_v6  ;;  %2178 = vmatpush3.bf16.msra.mxu1 %v2394_v17  ;;  %v2451_v0 = vld [vmem:[%s3137_s0 + $0x1c4] ss:$36 sps:$4 sm:$0xff]  }
  0x37   :  { %2179 = vmatprep.subr.bf16.mxu1 %v2395_v18  ;;  %v2462_v6 = vld [vmem:[%s3137_s0 + $0x208] ss:$36 sps:$4 sm:$0xff]  }
  0x39   :  { %2116 = vmatpush3.bf16.msra.mxu0 %v2383_v8  ;;  %v2465_v8 = vld [vmem:[%s3137_s0 + $0x20] ss:$36 sps:$4 sm:$0xff]  }
  0x3a   :  { %2117 = vmatprep.subr.bf16.mxu0 %v2391_v13  ;;  %2180 = vmatpush3.bf16.msra.mxu1 %v2396_v19  ;;  %v2470_v13 = vld [vmem:[%s3137_s0 + $0x1d0] ss:$36 sps:$4 sm:$0xff]  }
  0x3b   :  { %1099 = vmatmul.mubr.bf16.gmra.mrb[12].mxu0 %v2359_v58  ;;  %2181 = vmatprep.subr.bf16.mxu1 %v2404_v25  ;;  %v2441_v58 = vld [vmem:[%s3137_s0 + $0x130] ss:$36 sps:$4 sm:$0xff]  }
  0x3c   :  { %1196 = vmatmul.mubr.bf16.gmra.mrb[12].mxu1 %v2360_v59  ;;  %1106 = vmatprep.mubr.bf16.mxu0 %v2365_v60  ;;  %v2442_v59 = vld [vmem:[%s3137_s0 + $0x138] ss:$36 sps:$4 sm:$0xff]  }
  0x3d   :  { %1203 = vmatprep.mubr.bf16.mxu1 %v2367_v61  ;;  %2118 = vmatpush3.bf16.msra.mxu0 %v2393_v16  ;;  %v2444_v60 = vld [vmem:[%s3137_s0 + $0x17c] ss:$36 sps:$4 sm:$0xff]   ;;  %v2446_v61 = vld [vmem:[%s3137_s0 + $0x184] ss:$36 sps:$4 sm:$0xff]  }
  0x3e   :  { %2119 = vmatprep.subr.bf16.mxu0 %v2403_v24  ;;  %2182 = vmatpush3.bf16.msra.mxu1 %v2406_v27 }
  0x3f   :  { %2183 = vmatprep.subr.bf16.mxu1 %v2407_v28 }
  0x41   :  { %2120 = vmatpush3.bf16.msra.mxu0 %v2405_v26 }
  0x42   :  { %2249 = vmatprep.subr.bf16.mxu0 %v2415_v32  ;;  %2184 = vmatpush3.bf16.msra.mxu1 %v2408_v31 }
  0x43   :  { %1107 = vmatmul.mubr.bf16.gmra.mrb[16].mxu0 %v2369_v2  ;;  %2281 = vmatprep.subr.bf16.mxu1 %v2415_v32  ;;  %v2455_v2 = vld [vmem:[%s3137_s0 + $0x1c0] ss:$36 sps:$4 sm:$0xff]  }
  0x44   :  { %1204 = vmatmul.mubr.bf16.gmra.mrb[16].mxu1 %v2370_v3  ;;  %1114 = vmatprep.mubr.bf16.mxu0 %v2375_v4  ;;  %v2456_v3 = vld [vmem:[%s3137_s0 + $0x1c8] ss:$36 sps:$4 sm:$0xff]  }
  0x45   :  { %1211 = vmatprep.mubr.bf16.mxu1 %v2377_v5  ;;  %v2458_v4 = vld [vmem:[%s3137_s0 + $0x20c] ss:$36 sps:$4 sm:$0xff]   ;;  %v2460_v5 = vld [vmem:[%s3137_s0 + $0x214] ss:$36 sps:$4 sm:$0xff]  }
  0x4b   :  { %1115 = vmatmul.mubr.bf16.gmra.mrb[20].mxu0 %v2379_v10  ;;  %v2467_v10 = vld [vmem:[%s3137_s0 + $0x68] ss:$36 sps:$4 sm:$0xff]  }
  0x4c   :  { %1212 = vmatmul.mubr.bf16.gmra.mrb[20].mxu1 %v2380_v11  ;;  %1122 = vmatprep.mubr.bf16.mxu0 %v2385_v12  ;;  %v2468_v11 = vld [vmem:[%s3137_s0 + $0x188] ss:$36 sps:$4 sm:$0xff]   ;;  %v2469_v12 = vld [vmem:[%s3137_s0 + $0xb0] ss:$36 sps:$4 sm:$0xff]  }
  0x4d   :  { %1219 = vmatprep.mubr.bf16.mxu1 %v2387_v14  ;;  %v2471_v14 = vld [vmem:[%s3137_s0 + $0xf8] ss:$36 sps:$4 sm:$0xff]  }
  0x53   :  { %1123 = vmatmul.mubr.bf16.gmra.mrb[24].mxu0 %v2389_v20 }
  0x54   :  { %1220 = vmatmul.mubr.bf16.gmra.mrb[24].mxu1 %v2390_v21  ;;  %1130 = vmatprep.mubr.bf16.mxu0 %v2397_v22 }
  0x55   :  { %1227 = vmatprep.mubr.bf16.mxu1 %v2399_v23 }
  0x5b   :  { %1131 = vmatmul.mubr.bf16.gmra.mrb[28].mxu0 %v2401_v29 }
  0x5c   :  { %1228 = vmatmul.mubr.bf16.gmra.mrb[28].mxu1 %v2402_v30  ;;  %1268 = vmatprep.mubr.bf16.mxu0 %v2411_v33 }
  0x5d   :  { %1365 = vmatprep.mubr.bf16.mxu1 %v2414_v34 }
  0x63   :  { %1269 = vmatmul.mubr.bf16.vlgmr.msra.gmra.mrb[32].mxu0 %v2409_v35 }
  0x64   :  { %1366 = vmatmul.mubr.bf16.vlgmr.msra.gmra.mrb[32].mxu1 %v2412_v36  ;;  %2250 = vmatpush3.bf16.msra.mxu0 %v2415_v32 }
  0x65   :  { %1276 = vmatprep.mubr.bf16.mxu0 %v2416_v37  ;;  %1373 = vmatprep.mubr.bf16.mxu1 %v2418_v38 }
  0x66   :  { %2251 = vmatprep.subr.bf16.mxu0 %v2422_v39  ;;  %2289 = vmatpush3.bf16.msra.mxu1 %v2415_v32 }
  0x67   :  { %2282 = vmatprep.subr.bf16.mxu1 %v2422_v39 }
  0x68   :  { %2252 = vmatpush3.bf16.msra.mxu0 %v2422_v39 }
  0x69   :  { %2253 = vmatprep.subr.bf16.mxu0 %v2429_v40 }
  0x6a   :  { %2290 = vmatpush3.bf16.msra.mxu1 %v2422_v39 }
  0x6b   :  { %1277 = vmatmul.mubr.bf16.gmra.mrb[36].mxu0 %v2420_v41  ;;  %2283 = vmatprep.subr.bf16.mxu1 %v2429_v40 }
  0x6c   :  { %1374 = vmatmul.mubr.bf16.gmra.mrb[36].mxu1 %v2421_v42  ;;  %1284 = vmatprep.mubr.bf16.mxu0 %v2423_v43 }
  0x6d   :  { %1381 = vmatprep.mubr.bf16.mxu1 %v2425_v44  ;;  %2254 = vmatpush3.bf16.msra.mxu0 %v2429_v40 }
  0x6e   :  { %2255 = vmatprep.subr.bf16.mxu0 %v2436_v45  ;;  %2291 = vmatpush3.bf16.msra.mxu1 %v2429_v40 }
  0x6f   :  { %2284 = vmatprep.subr.bf16.mxu1 %v2436_v45 }
  0x71   :  { %2256 = vmatpush3.bf16.msra.mxu0 %v2436_v45 }
  0x72   :  { %2257 = vmatprep.subr.bf16.mxu0 %v2443_v46  ;;  %2292 = vmatpush3.bf16.msra.mxu1 %v2436_v45 }
  0x73   :  { %1285 = vmatmul.mubr.bf16.gmra.mrb[40].mxu0 %v2427_v47  ;;  %2285 = vmatprep.subr.bf16.mxu1 %v2443_v46 }
  0x74   :  { %1382 = vmatmul.mubr.bf16.gmra.mrb[40].mxu1 %v2428_v48  ;;  %1292 = vmatprep.mubr.bf16.mxu0 %v2430_v49 }
  0x75   :  { %1389 = vmatprep.mubr.bf16.mxu1 %v2432_v50  ;;  %2258 = vmatpush3.bf16.msra.mxu0 %v2443_v46 }
  0x76   :  { %2259 = vmatprep.subr.bf16.mxu0 %v2450_v51  ;;  %2293 = vmatpush3.bf16.msra.mxu1 %v2443_v46 }
  0x77   :  { %2286 = vmatprep.subr.bf16.mxu1 %v2450_v51 }
  0x79   :  { %2260 = vmatpush3.bf16.msra.mxu0 %v2450_v51 }
  0x7a   :  { %2261 = vmatprep.subr.bf16.mxu0 %v2457_v53  ;;  %2294 = vmatpush3.bf16.msra.mxu1 %v2450_v51 }
  0x7b   :  { %1293 = vmatmul.mubr.bf16.gmra.mrb[44].mxu0 %v2434_v52  ;;  %2287 = vmatprep.subr.bf16.mxu1 %v2457_v53 }
  0x7c   :  { %1390 = vmatmul.mubr.bf16.gmra.mrb[44].mxu1 %v2435_v54  ;;  %1300 = vmatprep.mubr.bf16.mxu0 %v2437_v55 }
  0x7d   :  { %1397 = vmatprep.mubr.bf16.mxu1 %v2439_v56  ;;  %2262 = vmatpush3.bf16.msra.mxu0 %v2457_v53 }
  0x7e   :  { %2263 = vmatprep.subr.bf16.mxu0 %v2464_v57  ;;  %2295 = vmatpush3.bf16.msra.mxu1 %v2457_v53 }
  0x7f   :  { %2288 = vmatprep.subr.bf16.mxu1 %v2464_v57 }
  0x81   :  { %2264 = vmatpush3.bf16.msra.mxu0 %v2464_v57 }
  0x82   :  { %2296 = vmatpush3.bf16.msra.mxu1 %v2464_v57 }
  0x83   :  { %1301 = vmatmul.mubr.bf16.gmra.mrb[48].mxu0 %v2441_v58 }
  0x84   :  { %1398 = vmatmul.mubr.bf16.gmra.mrb[48].mxu1 %v2442_v59  ;;  %1308 = vmatprep.mubr.bf16.mxu0 %v2444_v60 }
  0x85   :  { %1405 = vmatprep.mubr.bf16.mxu1 %v2446_v61 }
  0x8b   :  { %1309 = vmatmul.mubr.bf16.gmra.mrb[52].mxu0 %v2448_v62 }
  0x8c   :  { %1406 = vmatmul.mubr.bf16.gmra.mrb[52].mxu1 %v2449_v63  ;;  %1316 = vmatprep.mubr.bf16.mxu0 %v2451_v0 }
  0x8d   :  { %1413 = vmatprep.mubr.bf16.mxu1 %v2453_v1 }
  0x93   :  { %1317 = vmatmul.mubr.bf16.gmra.mrb[56].mxu0 %v2455_v2 }
  0x94   :  { %1414 = vmatmul.mubr.bf16.gmra.mrb[56].mxu1 %v2456_v3  ;;  %1324 = vmatprep.mubr.bf16.mxu0 %v2458_v4 }
  0x95   :  { %1421 = vmatprep.mubr.bf16.mxu1 %v2460_v5 }
  0x9b   :  { %1325 = vmatmul.mubr.bf16.gmra.mrb[60].mxu0 %v2462_v6 }
  0x9c   :  { %1422 = vmatmul.mubr.bf16.gmra.mrb[60].mxu1 %v2463_v7  ;;  %2265 = vmatprep.mubr.bf16.mxu0 %v2465_v8 }
  0x9d   :  { %2273 = vmatprep.mubr.bf16.mxu1 %v2466_v9 }
  0xa3   :  { %2266 = vmatmul.mubr.bf16.vlgmr.msra.gmra.mrb[64].mxu0 %v2467_v10 }
  0xa4   :  { %2274 = vmatmul.mubr.bf16.vlgmr.msra.gmra.mrb[64].mxu1 %v2468_v11  ;;  %2269 = vmatprep.mubr.bf16.mxu0 %v2469_v12 }
  0xa5   :  { %2277 = vmatprep.mubr.bf16.mxu1 %v2470_v13 }
  0xab   :  { %2270 = vmatmul.mubr.bf16.gmra.mrb[68].mxu0 %v2471_v14 }
  0xac   :  { %2278 = vmatmul.mubr.bf16.gmra.mrb[68].mxu1 %v2472_v15 }
  0xf6   :  { %v1993_v16 = vpop.f32.mrb[0].mxu0 }
  0xf7   :  { %v2057_v17 = vpop.f32.mrb[0].mxu1  ;;  %v1994_v18 = vpop.f32.mrb[1].mxu0 }
  0xf8   :  { %v1995_v19 = vadd.f32 %v1994_v18, %v1993_v16  ;;  %v2058_v20 = vpop.f32.mrb[1].mxu1  ;;  %v1996_v21 = vpop.f32.mrb[2].mxu0 }
  0xf9   :  { %v2059_v22 = vadd.f32 %v2058_v20, %v2057_v17  ;;  %v2060_v23 = vpop.f32.mrb[2].mxu1  ;;  %v1997_v24 = vpop.f32.mrb[3].mxu0 }
  0xfa   :  { %v1998_v25 = vadd.f32 %v1997_v24, %v1996_v21  ;;  %v2061_v26 = vpop.f32.mrb[3].mxu1 }
  0xfb   :  { %v2932_v27 = vadd.f32 %v2059_v22, %v1995_v19  ;;  %v2062_v28 = vadd.f32 %v2061_v26, %v2060_v23 }
  0xfd   :  { %v2934_v29 = vadd.f32 %v2062_v28, %v1998_v25 }
  0xfe   :  { %v1999_v30 = vpop.f32.mrb[4].mxu0 }
  0xff   :  { %v2063_v31 = vpop.f32.mrb[4].mxu1  ;;  %v2000_v32 = vpop.f32.mrb[5].mxu0 }
 0x100   :  { %v2001_v33 = vadd.f32 %v2000_v32, %v1999_v30  ;;  %v2064_v34 = vpop.f32.mrb[5].mxu1  ;;  %v2002_v35 = vpop.f32.mrb[6].mxu0 }
 0x101   :  { %v2065_v36 = vadd.f32 %v2064_v34, %v2063_v31  ;;  %v2066_v37 = vpop.f32.mrb[6].mxu1  ;;  %v2003_v38 = vpop.f32.mrb[7].mxu0 }
 0x102   :  { %v2004_v39 = vadd.f32 %v2003_v38, %v2002_v35  ;;  %v2067_v40 = vpop.f32.mrb[7].mxu1 }
 0x103   :  { %v2936_v41 = vadd.f32 %v2065_v36, %v2001_v33  ;;  %v2068_v42 = vadd.f32 %v2067_v40, %v2066_v37 }
 0x105   :  { %v2938_v43 = vadd.f32 %v2068_v42, %v2004_v39 }
 0x106   :  { %v2005_v44 = vpop.f32.mrb[8].mxu0 }
 0x107   :  { %v2069_v45 = vpop.f32.mrb[8].mxu1  ;;  %v2006_v46 = vpop.f32.mrb[9].mxu0 }
 0x108   :  { %v2007_v47 = vadd.f32 %v2006_v46, %v2005_v44  ;;  %v2070_v48 = vpop.f32.mrb[9].mxu1  ;;  %v2008_v49 = vpop.f32.mrb[10].mxu0 }
 0x109   :  { %v2071_v50 = vadd.f32 %v2070_v48, %v2069_v45  ;;  %v2072_v51 = vpop.f32.mrb[10].mxu1  ;;  %v2009_v52 = vpop.f32.mrb[11].mxu0 }
 0x10a   :  { %v2010_v53 = vadd.f32 %v2009_v52, %v2008_v49  ;;  %v2073_v54 = vpop.f32.mrb[11].mxu1 }
 0x10b   :  { %v2940_v55 = vadd.f32 %v2071_v50, %v2007_v47  ;;  %v2074_v56 = vadd.f32 %v2073_v54, %v2072_v51 }
 0x10d   :  { %v2942_v57 = vadd.f32 %v2074_v56, %v2010_v53 }
 0x10e   :  { %v2011_v58 = vpop.f32.mrb[12].mxu0 }
 0x10f   :  { %v2075_v59 = vpop.f32.mrb[12].mxu1  ;;  %v2012_v60 = vpop.f32.mrb[13].mxu0 }
 0x110   :  { %v2013_v61 = vadd.f32 %v2012_v60, %v2011_v58  ;;  %v2076_v62 = vpop.f32.mrb[13].mxu1  ;;  %v2014_v63 = vpop.f32.mrb[14].mxu0 }
 0x111   :  { %v2077_v0 = vadd.f32 %v2076_v62, %v2075_v59  ;;  %v2078_v1 = vpop.f32.mrb[14].mxu1  ;;  %v2015_v2 = vpop.f32.mrb[15].mxu0 }
 0x112   :  { %v2016_v3 = vadd.f32 %v2015_v2, %v2014_v63  ;;  %v2079_v4 = vpop.f32.mrb[15].mxu1 }
 0x113   :  { %v2944_v5 = vadd.f32 %v2077_v0, %v2013_v61  ;;  %v2080_v6 = vadd.f32 %v2079_v4, %v2078_v1 }
 0x115   :  { %v2946_v7 = vadd.f32 %v2080_v6, %v2016_v3 }
 0x116   :  { %v2017_v8 = vpop.f32.mrb[16].mxu0 }
 0x117   :  { %v2081_v9 = vpop.f32.mrb[16].mxu1  ;;  %v2018_v10 = vpop.f32.mrb[17].mxu0 }
 0x118   :  { %v2019_v11 = vadd.f32 %v2018_v10, %v2017_v8  ;;  %v2082_v12 = vpop.f32.mrb[17].mxu1  ;;  %v2020_v13 = vpop.f32.mrb[18].mxu0 }
 0x119   :  { %v2083_v14 = vadd.f32 %v2082_v12, %v2081_v9  ;;  %v2084_v15 = vpop.f32.mrb[18].mxu1  ;;  %v2021_v16 = vpop.f32.mrb[19].mxu0 }
 0x11a   :  { %v2022_v17 = vadd.f32 %v2021_v16, %v2020_v13  ;;  %v2085_v18 = vpop.f32.mrb[19].mxu1 }
 0x11b   :  { %v2948_v19 = vadd.f32 %v2083_v14, %v2019_v11  ;;  %v2086_v20 = vadd.f32 %v2085_v18, %v2084_v15 }
 0x11d   :  { %v2950_v21 = vadd.f32 %v2086_v20, %v2022_v17 }
 0x11e   :  { %v2023_v22 = vpop.f32.mrb[20].mxu0 }
 0x11f   :  { %v2087_v23 = vpop.f32.mrb[20].mxu1  ;;  %v2024_v24 = vpop.f32.mrb[21].mxu0 }
 0x120   :  { %v2025_v25 = vadd.f32 %v2024_v24, %v2023_v22  ;;  %v2088_v26 = vpop.f32.mrb[21].mxu1  ;;  %v2026_v28 = vpop.f32.mrb[22].mxu0 }
 0x121   :  { %v2089_v30 = vadd.f32 %v2088_v26, %v2087_v23  ;;  %v2090_v31 = vpop.f32.mrb[22].mxu1  ;;  %v2027_v32 = vpop.f32.mrb[23].mxu0 }
 0x122   :  { %v2028_v33 = vadd.f32 %v2027_v32, %v2026_v28  ;;  %v2091_v34 = vpop.f32.mrb[23].mxu1 }
 0x123   :  { %v2952_v35 = vadd.f32 %v2089_v30, %v2025_v25  ;;  %v2092_v36 = vadd.f32 %v2091_v34, %v2090_v31 }
 0x125   :  { %v2954_v37 = vadd.f32 %v2092_v36, %v2028_v33 }
 0x126   :  { %v2029_v38 = vpop.f32.mrb[24].mxu0 }
 0x127   :  { %v2093_v39 = vpop.f32.mrb[24].mxu1  ;;  %v2030_v40 = vpop.f32.mrb[25].mxu0 }
 0x128   :  { %v2031_v42 = vadd.f32 %v2030_v40, %v2029_v38  ;;  %v2094_v44 = vpop.f32.mrb[25].mxu1  ;;  %v2032_v45 = vpop.f32.mrb[26].mxu0 }
 0x129   :  { %v2095_v46 = vadd.f32 %v2094_v44, %v2093_v39  ;;  %v2096_v47 = vpop.f32.mrb[26].mxu1  ;;  %v2033_v48 = vpop.f32.mrb[27].mxu0 }
 0x12a   :  { %v2034_v49 = vadd.f32 %v2033_v48, %v2032_v45  ;;  %v2097_v50 = vpop.f32.mrb[27].mxu1 }
 0x12b   :  { %v2956_v51 = vadd.f32 %v2095_v46, %v2031_v42  ;;  %v2098_v52 = vadd.f32 %v2097_v50, %v2096_v47 }
 0x12d   :  { %v2958_v53 = vadd.f32 %v2098_v52, %v2034_v49 }
 0x12e   :  { %v2035_v54 = vpop.f32.mrb[28].mxu0 }
 0x12f   :  { %v2099_v56 = vpop.f32.mrb[28].mxu1  ;;  %v2036_v58 = vpop.f32.mrb[29].mxu0 }
 0x130   :  { %v2037_v59 = vadd.f32 %v2036_v58, %v2035_v54  ;;  %v2100_v60 = vpop.f32.mrb[29].mxu1  ;;  %v2038_v61 = vpop.f32.mrb[30].mxu0 }
 0x131   :  { %v2101_v62 = vadd.f32 %v2100_v60, %v2099_v56  ;;  %v2102_v63 = vpop.f32.mrb[30].mxu1  ;;  %v2039_v0 = vpop.f32.mrb[31].mxu0 }
 0x132   :  { %v2040_v1 = vadd.f32 %v2039_v0, %v2038_v61  ;;  %v2103_v2 = vpop.f32.mrb[31].mxu1 }
 0x133   :  { %v2960_v3 = vadd.f32 %v2101_v62, %v2037_v59  ;;  %v2104_v4 = vadd.f32 %v2103_v2, %v2102_v63 }
 0x135   :  { %v2962_v6 = vadd.f32 %v2104_v4, %v2040_v1 }
 0x136   :  { %v2121_v8 = vpop.f32.mrb[32].mxu0 }
 0x137   :  { %v2122_v9 = vpop.f32.mrb[33].mxu0  ;;  %v2185_v10 = vpop.f32.mrb[32].mxu1 }
 0x138   :  { %v2123_v11 = vadd.f32 %v2122_v9, %v2121_v8  ;;  %v2124_v12 = vpop.f32.mrb[34].mxu0  ;;  %v2186_v13 = vpop.f32.mrb[33].mxu1 }
 0x139   :  { %v2125_v14 = vpop.f32.mrb[35].mxu0  ;;  %v2187_v15 = vadd.f32 %v2186_v13, %v2185_v10  ;;  %v2188_v16 = vpop.f32.mrb[34].mxu1 }
 0x13a   :  { %v1271_v17 = vadd.f32 %v2123_v11, %v2932_v27  ;;  %v2126_v18 = vadd.f32 %v2125_v14, %v2124_v12  ;;  %v2189_v20 = vpop.f32.mrb[35].mxu1 }
 0x13b   :  { %v2190_v22 = vadd.f32 %v2189_v20, %v2188_v16 }
 0x13c   :  { %v1274_v23 = vadd.f32 %v2126_v18, %v2934_v29  ;;  %v2966_v24 = vadd.f32 %v2187_v15, %v1271_v17 }
 0x13e   :  { %v2127_v25 = vpop.f32.mrb[36].mxu0  ;;  %v2968_v26 = vadd.f32 %v2190_v22, %v1274_v23 }
 0x13f   :  { %v2128_v28 = vpop.f32.mrb[37].mxu0  ;;  %v2191_v30 = vpop.f32.mrb[36].mxu1 }
 0x140   :  { %v2129_v31 = vadd.f32 %v2128_v28, %v2127_v25  ;;  %v2130_v32 = vpop.f32.mrb[38].mxu0  ;;  %v2192_v33 = vpop.f32.mrb[37].mxu1 }
 0x141   :  { %v2131_v34 = vpop.f32.mrb[39].mxu0  ;;  %v2193_v36 = vadd.f32 %v2192_v33, %v2191_v30  ;;  %v2194_v38 = vpop.f32.mrb[38].mxu1 }
 0x142   :  { %v1279_v27 = vadd.f32 %v2129_v31, %v2936_v41  ;;  %v2132_v39 = vadd.f32 %v2131_v34, %v2130_v32  ;;  %v2195_v40 = vpop.f32.mrb[39].mxu1 }
 0x143   :  { %v2196_v42 = vadd.f32 %v2195_v40, %v2194_v38 }
 0x144   :  { %v1282_v29 = vadd.f32 %v2132_v39, %v2938_v43  ;;  %v2972_v44 = vadd.f32 %v2193_v36, %v1279_v27 }
 0x146   :  { %v2133_v45 = vpop.f32.mrb[40].mxu0  ;;  %v2974_v46 = vadd.f32 %v2196_v42, %v1282_v29 }
 0x147   :  { %v2134_v47 = vpop.f32.mrb[41].mxu0  ;;  %v2197_v48 = vpop.f32.mrb[40].mxu1 }
 0x148   :  { %v2135_v49 = vadd.f32 %v2134_v47, %v2133_v45  ;;  %v2136_v50 = vpop.f32.mrb[42].mxu0  ;;  %v2198_v52 = vpop.f32.mrb[41].mxu1 }
 0x149   :  { %v2137_v54 = vpop.f32.mrb[43].mxu0  ;;  %v2199_v56 = vadd.f32 %v2198_v52, %v2197_v48  ;;  %v2200_v58 = vpop.f32.mrb[42].mxu1 }
 0x14a   :  { %v1287_v41 = vadd.f32 %v2135_v49, %v2940_v55  ;;  %v2138_v59 = vadd.f32 %v2137_v54, %v2136_v50  ;;  %v2201_v60 = vpop.f32.mrb[43].mxu1 }
 0x14b   :  { %v2202_v61 = vadd.f32 %v2201_v60, %v2200_v58 }
 0x14c   :  { %v1290_v43 = vadd.f32 %v2138_v59, %v2942_v57  ;;  %v2978_v62 = vadd.f32 %v2199_v56, %v1287_v41 }
 0x14e   :  { %v2139_v63 = vpop.f32.mrb[44].mxu0  ;;  %v2980_v0 = vadd.f32 %v2202_v61, %v1290_v43 }
 0x14f   :  { %v2140_v1 = vpop.f32.mrb[45].mxu0  ;;  %v2203_v2 = vpop.f32.mrb[44].mxu1 }
 0x150   :  { %v2141_v4 = vadd.f32 %v2140_v1, %v2139_v63  ;;  %v2142_v8 = vpop.f32.mrb[46].mxu0  ;;  %v2204_v9 = vpop.f32.mrb[45].mxu1 }
 0x151   :  { %v2143_v10 = vpop.f32.mrb[47].mxu0  ;;  %v2205_v11 = vadd.f32 %v2204_v9, %v2203_v2  ;;  %v2206_v12 = vpop.f32.mrb[46].mxu1 }
 0x152   :  { %v1295_v55 = vadd.f32 %v2141_v4, %v2944_v5  ;;  %v2144_v13 = vadd.f32 %v2143_v10, %v2142_v8  ;;  %v2207_v14 = vpop.f32.mrb[47].mxu1 }
 0x153   :  { %v2208_v15 = vadd.f32 %v2207_v14, %v2206_v12 }
 0x154   :  { %v1298_v57 = vadd.f32 %v2144_v13, %v2946_v7  ;;  %v2984_v16 = vadd.f32 %v2205_v11, %v1295_v55 }
 0x156   :  { %v2145_v17 = vpop.f32.mrb[48].mxu0  ;;  %v2986_v18 = vadd.f32 %v2208_v15, %v1298_v57 }
 0x157   :  { %v2146_v20 = vpop.f32.mrb[49].mxu0  ;;  %v2209_v22 = vpop.f32.mrb[48].mxu1 }
 0x158   :  { %v2147_v23 = vadd.f32 %v2146_v20, %v2145_v17  ;;  %v2148_v25 = vpop.f32.mrb[50].mxu0  ;;  %v2210_v28 = vpop.f32.mrb[49].mxu1 }
 0x159   :  { %v2149_v30 = vpop.f32.mrb[51].mxu0  ;;  %v2211_v31 = vadd.f32 %v2210_v28, %v2209_v22  ;;  %v2212_v32 = vpop.f32.mrb[50].mxu1 }
 0x15a   :  { %v1303_v5 = vadd.f32 %v2147_v23, %v2948_v19  ;;  %v2150_v33 = vadd.f32 %v2149_v30, %v2148_v25  ;;  %v2213_v34 = vpop.f32.mrb[51].mxu1 }
 0x15b   :  { %v2214_v36 = vadd.f32 %v2213_v34, %v2212_v32 }
 0x15c   :  { %v1306_v7 = vadd.f32 %v2150_v33, %v2950_v21  ;;  %v1400_v38 = vadd.f32 %v2211_v31, %v1303_v5 }
 0x15e   :  { %v2151_v27 = vpop.f32.mrb[52].mxu0  ;;  %v2990_v39 = vadd.f32 %v2214_v36, %v1306_v7 }
 0x15f   :  { %v2152_v40 = vpop.f32.mrb[53].mxu0  ;;  %v2215_v42 = vpop.f32.mrb[52].mxu1 }
 0x160   :  { %v2153_v29 = vadd.f32 %v2152_v40, %v2151_v27  ;;  %v2154_v45 = vpop.f32.mrb[54].mxu0  ;;  %v2216_v47 = vpop.f32.mrb[53].mxu1 }
 0x161   :  { %v2155_v48 = vpop.f32.mrb[55].mxu0  ;;  %v2217_v49 = vadd.f32 %v2216_v47, %v2215_v42  ;;  %v2218_v50 = vpop.f32.mrb[54].mxu1 }
 0x162   :  { %v1311_v52 = vadd.f32 %v2153_v29, %v2952_v35  ;;  %v2156_v19 = vadd.f32 %v2155_v48, %v2154_v45  ;;  %v2219_v54 = vpop.f32.mrb[55].mxu1 }
 0x163   :  { %v2220_v56 = vadd.f32 %v2219_v54, %v2218_v50 }
 0x164   :  { %v1314_v58 = vadd.f32 %v2156_v19, %v2954_v37  ;;  %v1408_v21 = vadd.f32 %v2217_v49, %v1311_v52 }
 0x166   :  { %v2157_v41 = vpop.f32.mrb[56].mxu0  ;;  %v1411_v59 = vadd.f32 %v2220_v56, %v1314_v58 }
 0x167   :  { %v2158_v60 = vpop.f32.mrb[57].mxu0  ;;  %v2221_v61 = vpop.f32.mrb[56].mxu1 }
 0x168   :  { %v2159_v43 = vadd.f32 %v2158_v60, %v2157_v41  ;;  %v2160_v63 = vpop.f32.mrb[58].mxu0  ;;  %v2222_v1 = vpop.f32.mrb[57].mxu1 }
 0x169   :  { %v2161_v2 = vpop.f32.mrb[59].mxu0  ;;  %v2223_v4 = vadd.f32 %v2222_v1, %v2221_v61  ;;  %v2224_v8 = vpop.f32.mrb[58].mxu1 }
 0x16a   :  { %v1319_v9 = vadd.f32 %v2159_v43, %v2956_v51  ;;  %v2162_v10 = vadd.f32 %v2161_v2, %v2160_v63  ;;  %v2225_v35 = vpop.f32.mrb[59].mxu1 }
 0x16b   :  { %v2226_v11 = vadd.f32 %v2225_v35, %v2224_v8 }
 0x16c   :  { %v1322_v12 = vadd.f32 %v2162_v10, %v2958_v53  ;;  %v1416_v55 = vadd.f32 %v2223_v4, %v1319_v9 }
 0x16e   :  { %v2163_v37 = vpop.f32.mrb[60].mxu0  ;;  %v1419_v13 = vadd.f32 %v2226_v11, %v1322_v12 }
 0x16f   :  { %v2164_v14 = vpop.f32.mrb[61].mxu0  ;;  %v2227_v15 = vpop.f32.mrb[60].mxu1 }
 0x170   :  { %v2165_v57 = vadd.f32 %v2164_v14, %v2163_v37  ;;  %v2166_v17 = vpop.f32.mrb[62].mxu0  ;;  %v2228_v20 = vpop.f32.mrb[61].mxu1 }
 0x171   :  { %v2167_v22 = vpop.f32.mrb[63].mxu0  ;;  %v2229_v23 = vadd.f32 %v2228_v20, %v2227_v15  ;;  %v2230_v25 = vpop.f32.mrb[62].mxu1 }
 0x172   :  { %v1327_v28 = vadd.f32 %v2165_v57, %v2960_v3  ;;  %v2168_v30 = vadd.f32 %v2167_v22, %v2166_v17  ;;  %v2231_v51 = vpop.f32.mrb[63].mxu1 }
 0x173   :  { %v2232_v31 = vadd.f32 %v2231_v51, %v2230_v25 }
 0x174   :  { %v1330_v32 = vadd.f32 %v2168_v30, %v2962_v6  ;;  %v1424_v5 = vadd.f32 %v2229_v23, %v1327_v28 }
 0x176   :  { %v2267_v53 = vpop.f32.mrb[64].mxu0  ;;  %v1427_v33 = vadd.f32 %v2232_v31, %v1330_v32 }
 0x177   :  { %v2999_v34 = vadd.f32 %v2267_v53, %v2972_v44  ;;  %v2275_v36 = vpop.f32.mrb[64].mxu1  ;;  %v1464_v7 = vpop.f32.mrb[65].mxu0 }
 0x178   :  { %v3001_v27 = vadd.f32 %v2275_v36, %v1408_v21  ;;  %v3004_v40 = vadd.f32 %v1464_v7, %v2966_v24  ;;  %v1496_v42 = vpop.f32.mrb[65].mxu1  ;;  %v2268_v3 = vpop.f32.mrb[66].mxu0 }
 0x179   :  { %v3006_v29 = vadd.f32 %v1496_v42, %v1400_v38  ;;  %v3009_v45 = vadd.f32 %v2268_v3, %v2974_v46  ;;  %v2276_v6 = vpop.f32.mrb[66].mxu1  ;;  %v1467_v47 = vpop.f32.mrb[67].mxu0 }
 0x17a   :  { %v3011_v48 = vadd.f32 %v2276_v6, %v1411_v59  ;;  %v3014_v44 = vadd.f32 %v1467_v47, %v2968_v26  ;;  %v1499_v49 = vpop.f32.mrb[67].mxu1 }
 0x17b   :  { %v3017_v50 = vadd.f32 %v1499_v49, %v2990_v39 }
 0x17c   :  { %v1529_v24 = vadd.f32 %v3014_v44, %v3004_v40 }
 0x17e   :  { %v1530_v38 = vadd.f32 %v1529_v24, %v2999_v34  ;;  %v2271_v52 = vpop.f32.mrb[68].mxu0 }
 0x17f   :  { %v3023_v46 = vadd.f32 %v2271_v52, %v2984_v16  ;;  %v2279_v19 = vpop.f32.mrb[68].mxu1  ;;  %v1480_v54 = vpop.f32.mrb[69].mxu0 }
 0x180   :  { %v3025_v56 = vadd.f32 %v2279_v19, %v1424_v5  ;;  %v3028_v26 = vadd.f32 %v1480_v54, %v2978_v62  ;;  %v1531_v58 = vadd.f32 %v1530_v38, %v3009_v45  ;;  %v1512_v39 = vpop.f32.mrb[69].mxu1  ;;  %v2272_v21 = vpop.f32.mrb[70].mxu0 }
 0x181   :  { %v3031_v41 = vadd.f32 %v1512_v39, %v1416_v55  ;;  %v3034_v59 = vadd.f32 %v2272_v21, %v2986_v18  ;;  %v2280_v60 = vpop.f32.mrb[70].mxu1  ;;  %v1483_v61 = vpop.f32.mrb[71].mxu0 }
 0x182   :  { %v1532_v16 = vadd.f32 %v1531_v58, %v3028_v26  ;;  %v3037_v43 = vadd.f32 %v2280_v60, %v1427_v33  ;;  %v3040_v63 = vadd.f32 %v1483_v61, %v2980_v0  ;;  %v1515_v62 = vpop.f32.mrb[71].mxu1 }
 0x183   :  { %v3042_v1 = vadd.f32 %v1515_v62, %v1419_v13 }
 0x184   :  { %v1533_v2 = vadd.f32 %v1532_v16, %v3040_v63 }
 0x186   :  { %v1534_v4 = vadd.f32 %v1533_v2, %v3023_v46 }
 0x188   :  { %v1535_v8 = vadd.f32 %v1534_v4, %v3034_v59 }
 0x18a   :  { %v1536_v18 = vadd.f32 %v1535_v8, %v3006_v29 }
 0x18c   :  { %v1537_v9 = vadd.f32 %v1536_v18, %v3017_v50 }
 0x18e   :  { %v1538_v10 = vadd.f32 %v1537_v9, %v3001_v27 }
 0x190   :  { %v1539_v35 = vadd.f32 %v1538_v10, %v3011_v48 }
 0x192   :  { %v1540_v0 = vadd.f32 %v1539_v35, %v3031_v41 }
 0x194   :  { %v1541_v11 = vadd.f32 %v1540_v0, %v3042_v1 }
 0x196   :  { %v1542_v12 = vadd.f32 %v1541_v11, %v3025_v56 }
 0x198   :  { %v1543_v55 = vadd.f32 %v1542_v12, %v3037_v43 }
 0x19a   :  { %v1544_v37 = vrot.slane %v1543_v55, 4 }
 0x19c   :  { %v1545_v13 = vadd.f32 %v1544_v37, %v1543_v55 }
 0x19e   :  { %v1546_v14 = vrot.slane %v1545_v13, 2 }
 0x1a0   :  { %v1547_v15 = vadd.f32 %v1546_v14, %v1545_v13 }
 0x1a2   :  { %v1548_v57 = vrot.slane %v1547_v15, 1 }
 0x1a4   :  { %v1549_v17 = vadd.f32 %v1548_v57, %v1547_v15 }
 0x1a6   :  { %v3055_v20 = vmul.f32 0.0078125, %v1549_v17 }
 0x1a8   :  { %v1551_v22 = vsub.f32 %v3004_v40, %v3055_v20  ;;  %v1552_v23 = vsub.f32 %v3014_v44, %v3055_v20  ;;  %v1553_v25 = vsub.f32 %v2999_v34, %v3055_v20  ;;  %v1554_v51 = vsub.f32 %v3009_v45, %v3055_v20 }
 0x1a9   :  { %v1555_v31 = vsub.f32 %v3028_v26, %v3055_v20  ;;  %v1556_v53 = vsub.f32 %v3040_v63, %v3055_v20  ;;  %v1557_v7 = vsub.f32 %v3023_v46, %v3055_v20  ;;  %v1558_v6 = vsub.f32 %v3034_v59, %v3055_v20 }
 0x1aa   :  { %v1567_v28 = vmul.f32 %v1551_v22, %v1551_v22  ;;  %v1568_v30 = vmul.f32 %v1552_v23, %v1552_v23  ;;  %v1569_v32 = vmul.f32 %v1553_v25, %v1553_v25  ;;  %v1570_v33 = vmul.f32 %v1554_v51, %v1554_v51 }
 0x1ab   :  { %v1571_v42 = vmul.f32 %v1555_v31, %v1555_v31  ;;  %v1572_v47 = vmul.f32 %v1556_v53, %v1556_v53  ;;  %v1559_v24 = vsub.f32 %v3006_v29, %v3055_v20  ;;  %v1573_v38 = vmul.f32 %v1557_v7, %v1557_v7 }
 0x1ac   :  { %v1583_v5 = vadd.f32 %v1568_v30, %v1567_v28  ;;  %v1560_v19 = vsub.f32 %v3017_v50, %v3055_v20  ;;  %v1574_v54 = vmul.f32 %v1558_v6, %v1558_v6  ;;  %v1561_v39 = vsub.f32 %v3001_v27, %v3055_v20 }
 0x1ad   :  { %v1575_v21 = vmul.f32 %v1559_v24, %v1559_v24  ;;  %v1562_v61 = vsub.f32 %v3011_v48, %v3055_v20  ;;  %v1563_v2 = vsub.f32 %v3031_v41, %v3055_v20  ;;  %v1564_v18 = vsub.f32 %v3042_v1, %v3055_v20 }
 0x1ae   :  { %v1584_v36 = vadd.f32 %v1583_v5, %v1569_v32  ;;  %v1576_v16 = vmul.f32 %v1560_v19, %v1560_v19  ;;  %v1577_v4 = vmul.f32 %v1561_v39, %v1561_v39  ;;  %v1565_v35 = vsub.f32 %v3025_v56, %v3055_v20 }
 0x1af   :  { %v1578_v9 = vmul.f32 %v1562_v61, %v1562_v61  ;;  %v1579_v0 = vmul.f32 %v1563_v2, %v1563_v2  ;;  %v1566_v12 = vsub.f32 %v3037_v43, %v3055_v20  ;;  %v1580_v55 = vmul.f32 %v1564_v18, %v1564_v18 }
 0x1b0   :  { %v1585_v3 = vadd.f32 %v1584_v36, %v1570_v33  ;;  %v1581_v13 = vmul.f32 %v1565_v35, %v1565_v35  ;;  %v1611_v5 = vlaneseq  ;;  %v1527_v33 = vld [vmem:[%s3138_s2] sm:$0x1] }
 0x1b1   :  { %v1582_v15 = vmul.f32 %v1566_v12, %v1566_v12 }
 0x1b2   :  { %v1586_v49 = vadd.f32 %v1585_v3, %v1571_v42  ;;  %v1612_v53 = vshrl.u32 %v1611_v5, 7  ;;  %v1528_v3 = vld [vmem:[%s3139_s3] sm:$0x1] }
 0x1b4   :  { %v1587_v52 = vadd.f32 %v1586_v49, %v1572_v47  ;;  %v1613_v36 = vsub.s32 0, %v1612_v53 }
 0x1b6   :  { %v1588_v58 = vadd.f32 %v1587_v52, %v1573_v38 }
 0x1b8   :  { %v1589_v60 = vadd.f32 %v1588_v58, %v1574_v54 }
 0x1ba   :  { %v1590_v62 = vadd.f32 %v1589_v60, %v1575_v21 }
 0x1bc   :  { %v1591_v8 = vadd.f32 %v1590_v62, %v1576_v16 }
 0x1be   :  { %v1592_v10 = vadd.f32 %v1591_v8, %v1577_v4 }
 0x1c0   :  { %v1593_v11 = vadd.f32 %v1592_v10, %v1578_v9 }
 0x1c2   :  { %v1594_v37 = vadd.f32 %v1593_v11, %v1579_v0 }
 0x1c4   :  { %v1595_v14 = vadd.f32 %v1594_v37, %v1580_v55 }
 0x1c6   :  { %v1596_v57 = vadd.f32 %v1595_v14, %v1581_v13 }
 0x1c8   :  { %v1597_v17 = vadd.f32 %v1596_v57, %v1582_v15 }
 0x1ca   :  { %v1598_v22 = vrot.slane %v1597_v17, 4 }
 0x1cc   :  { %v1599_v23 = vadd.f32 %v1598_v22, %v1597_v17 }
 0x1ce   :  { %v1600_v25 = vrot.slane %v1599_v23, 2 }
 0x1d0   :  { %v1601_v28 = vadd.f32 %v1600_v25, %v1599_v23 }
 0x1d2   :  { %v1602_v30 = vrot.slane %v1601_v28, 1 }
 0x1d4   :  { %v1603_v51 = vadd.f32 %v1602_v30, %v1601_v28 }
 0x1d6   :  { %v1604_v31 = vmul.f32 0.0078125, %v1603_v51 }
 0x1d8   :  { %v1605_v32 = vadd.f32 1e-05, %v1604_v31 }
 0x1da   :  { %2473 = vrsqrt.f32 %v1605_v32 }
 0x1e4   :  { %v2474_v7 = vpop.eup %2473 }
 0x1e5   :  { %v1607_v42 = vmul.f32 %v2474_v7, %v1527_v33 }
 0x1e7   :  { %v1608_v6 = vmul.f32 %v1607_v42, %v3055_v20  ;;  %v1614_v47 = vrot.slane %v1607_v42, %v1613_v36 }
 0x1e9   :  { %v1609_v49 = vsub.f32 %v1528_v3, %v1608_v6  ;;  %v1616_v24 = vmul.f32 %v1614_v47, %v3004_v40  ;;  %v1617_v38 = vmul.f32 %v1614_v47, %v3014_v44  ;;  %v1618_v52 = vmul.f32 %v1614_v47, %v2999_v34 }
 0x1ea   :  { %v1619_v19 = vmul.f32 %v1614_v47, %v3009_v45  ;;  %v1620_v54 = vmul.f32 %v1614_v47, %v3028_v26  ;;  %v1621_v58 = vmul.f32 %v1614_v47, %v3040_v63  ;;  %v1622_v39 = vmul.f32 %v1614_v47, %v3023_v46 }
 0x1eb   :  { %v1623_v21 = vmul.f32 %v1614_v47, %v3034_v59  ;;  %v1624_v20 = vmul.f32 %v1614_v47, %v3006_v29  ;;  %v1625_v60 = vmul.f32 %v1614_v47, %v3017_v50  ;;  %v1626_v40 = vmul.f32 %v1614_v47, %v3001_v27 }
 0x1ec   :  { %v1627_v44 = vmul.f32 %v1614_v47, %v3011_v48  ;;  %v1636_v61 = vrot.slane %v1609_v49, %v1613_v36  ;;  %v1628_v34 = vmul.f32 %v1614_v47, %v3031_v41  ;;  %v1629_v45 = vmul.f32 %v1614_v47, %v3042_v1 }
 0x1ed   :  { %v1630_v26 = vmul.f32 %v1614_v47, %v3025_v56  ;;  %v1631_v63 = vmul.f32 %v1614_v47, %v3037_v43 }
 0x1ee   :  { %v1638_v46 = vadd.f32 %v1636_v61, %v1616_v24  ;;  %v1639_v16 = vadd.f32 %v1636_v61, %v1617_v38  ;;  %v1640_v59 = vadd.f32 %v1636_v61, %v1618_v52  ;;  %v1641_v62 = vadd.f32 %v1636_v61, %v1619_v19 }
 0x1ef   :  { %v1642_v29 = vadd.f32 %v1636_v61, %v1620_v54  ;;  %v1643_v2 = vadd.f32 %v1636_v61, %v1621_v58  ;;  %v1644_v50 = vadd.f32 %v1636_v61, %v1622_v39  ;;  %v1645_v4 = vadd.f32 %v1636_v61, %v1623_v21 }
 0x1f0   :  { %v1646_v27 = vadd.f32 %v1636_v61, %v1624_v20  ;;  %v1647_v8 = vadd.f32 %v1636_v61, %v1625_v60  ;;  %v1648_v48 = vadd.f32 %v1636_v61, %v1626_v40  ;;  %v1649_v18 = vadd.f32 %v1636_v61, %v1627_v44 }
 0x1f1   :  { %v1650_v9 = vadd.f32 %v1636_v61, %v1628_v34  ;;  %v1651_v41 = vadd.f32 %v1636_v61, %v1629_v45  ;;  %v1652_v10 = vadd.f32 %v1636_v61, %v1630_v26  ;;  %v1653_v1 = vadd.f32 %v1636_v61, %v1631_v63 }
 0x1f2   :  { %v1654_v35 = vmax.f32 %v1638_v46, 0.0  ;;  %v1655_v56 = vmax.f32 %v1639_v16, 0.0  ;;  %v1656_v0 = vmax.f32 %v1640_v59, 0.0  ;;  %v1657_v43 = vmax.f32 %v1641_v62, 0.0 }
 0x1f3   :  { %v1658_v11 = vmax.f32 %v1642_v29, 0.0  ;;  %v1659_v12 = vmax.f32 %v1643_v2, 0.0  ;;  %v1660_v55 = vmax.f32 %v1644_v50, 0.0  ;;  %v1661_v37 = vmax.f32 %v1645_v4, 0.0 }
 0x1f4   :  { %v1662_v13 = vmax.f32 %v1646_v27, 0.0  ;;  %v1663_v14 = vmax.f32 %v1647_v8, 0.0  ;;  %v1664_v15 = vmax.f32 %v1648_v48, 0.0  ;;  %v1665_v57 = vmax.f32 %v1649_v18, 0.0 }
 0x1f5   :  { %v1666_v17 = vmax.f32 %v1650_v9, 0.0  ;;  %v1667_v22 = vmax.f32 %v1651_v41, 0.0  ;;  %v1668_v23 = vmax.f32 %v1652_v10, 0.0  ;;  %v1669_v25 = vmax.f32 %v1653_v1, 0.0 }
 0x1f6   :  { %v1933_v28 = vpack.c.bf16 %v1655_v56, %v1654_v35  ;;  %v1938_v30 = vpack.c.bf16 %v1657_v43, %v1656_v0  ;;  %v1943_v51 = vpack.c.bf16 %v1659_v12, %v1658_v11  ;;  %v1948_v31 = vpack.c.bf16 %v1661_v37, %v1660_v55 }
 0x1f7   :  { %v1953_v32 = vpack.c.bf16 %v1663_v14, %v1662_v13  ;;  %v1958_v5 = vpack.c.bf16 %v1665_v57, %v1664_v15  ;;  %v1963_v53 = vpack.c.bf16 %v1667_v22, %v1666_v17  ;;  %v1968_v33 = vpack.c.bf16 %v1669_v25, %v1668_v23 }
 0x1f8   :  { %1934 = vst [vmem:[%s3140_s4] sm:$0xff] %v1933_v28   ;;  %1970 = vst [vmem:[%s3140_s4 + $0x8] sm:$0xff] %v1938_v30  }
 0x1f9   :  { %1971 = vst [vmem:[%s3140_s4 + $0x10] sm:$0xff] %v1943_v51   ;;  %1972 = vst [vmem:[%s3140_s4 + $0x18] sm:$0xff] %v1948_v31  }
 0x1fa   :  { %1973 = vst [vmem:[%s3140_s4 + $0x20] sm:$0xff] %v1953_v32   ;;  %1974 = vst [vmem:[%s3140_s4 + $0x28] sm:$0xff] %v1958_v5  }
 0x1fb   :  { %1975 = vst [vmem:[%s3140_s4 + $0x30] sm:$0xff] %v1963_v53   ;;  %1976 = vst [vmem:[%s3140_s4 + $0x38] sm:$0xff] %v1968_v33  }

// kernel: _lambda_.11
= control target key start
LH: loop header
LB: loop body
LE: loop exit
PB: predicated region body
PF: predicated region fallthrough
CT: control target
= control target key end

     0   :  { %s716_s2 = inlined_call_operand.vmem [shape: bf16[128,128], index: 2, kind: input, shape index: {}]   ;;  %s717_s3 = inlined_call_operand.vmem [shape: bf16[128,128], index: 3, kind: input, shape index: {}]   ;;  %s718_s0 = inlined_call_operand.vmem [shape: bf16[32,128], index: 0, kind: input, shape index: {}]   ;;  %s719_s1 = inlined_call_operand.vmem [shape: bf16[32,128], index: 1, kind: input, shape index: {}]   ;;  %s720_s4 = inlined_call_operand.vmem [shape: f32[1,128], index: 4, kind: input, shape index: {}, may-alias: {4,6}]   ;;  %s721_s6 = inlined_call_operand.vmem [shape: f32[1,128], index: 6, kind: input, shape index: {}, may-alias: {4,6}]   ;;  %s722_s5 = inlined_call_operand.vmem [shape: f32[1,128], index: 5, kind: input, shape index: {}, may-alias: {5,7}]   ;;  %s723_s7 = inlined_call_operand.vmem [shape: f32[1,128], index: 7, kind: input, shape index: {}, may-alias: {5,7}]   ;;  %s724_s8 = inlined_call_operand.vmem [shape: bf16[32,128], index: 8, kind: output, shape index: {}]  }
   0x1   :  { %v529_v0 = vld [vmem:[%s716_s2] sm:$0xff]   ;;  %v531_v2 = vld [vmem:[%s716_s2 + $0x8] sm:$0xff]   ;;  %v533_v4 = vld [vmem:[%s716_s2 + $0x10] sm:$0xff]  }
   0x2   :  { %v530_v1 = vld [vmem:[%s717_s3] sm:$0xff]   ;;  %489 = vmatprep.subr.bf16.mxu0 %v529_v0  ;;  %v532_v3 = vld [vmem:[%s717_s3 + $0x8] sm:$0xff]   ;;  %v534_v5 = vld [vmem:[%s717_s3 + $0x10] sm:$0xff]  }
   0x3   :  { %509 = vmatprep.subr.bf16.mxu1 %v530_v1  ;;  %490 = vmatpush3.bf16.msra.mxu0 %v529_v0  ;;  %v535_v6 = vld [vmem:[%s716_s2 + $0x18] sm:$0xff]   ;;  %v537_v8 = vld [vmem:[%s716_s2 + $0x20] sm:$0xff]   ;;  %v539_v10 = vld [vmem:[%s716_s2 + $0x28] sm:$0xff]  }
   0x4   :  { %510 = vmatpush3.bf16.msra.mxu1 %v530_v1  ;;  %491 = vmatprep.subr.bf16.mxu0 %v531_v2  ;;  %v536_v7 = vld [vmem:[%s717_s3 + $0x18] sm:$0xff]   ;;  %v538_v9 = vld [vmem:[%s717_s3 + $0x20] sm:$0xff]   ;;  %v540_v11 = vld [vmem:[%s717_s3 + $0x28] sm:$0xff]  }
   0x5   :  { %511 = vmatprep.subr.bf16.mxu1 %v532_v3  ;;  %v545_v12 = vld [vmem:[%s718_s0] sm:$0xff]   ;;  %v541_v14 = vld [vmem:[%s716_s2 + $0x30] sm:$0xff]   ;;  %v543_v16 = vld [vmem:[%s716_s2 + $0x38] sm:$0xff]  }
   0x6   :  { %v546_v13 = vld [vmem:[%s719_s1] sm:$0xff]   ;;  %505 = vmatprep.mubr.bf16.mxu0 %v545_v12  ;;  %v542_v15 = vld [vmem:[%s717_s3 + $0x30] sm:$0xff]   ;;  %v544_v17 = vld [vmem:[%s717_s3 + $0x38] sm:$0xff]  }
   0x7   :  { %492 = vmatpush3.bf16.msra.mxu0 %v531_v2  ;;  %525 = vmatprep.mubr.bf16.mxu1 %v546_v13  ;;  %v547_v18 = vld [vmem:[%s718_s0 + $0x8] sm:$0xff]  }
   0x8   :  { %512 = vmatpush3.bf16.msra.mxu1 %v532_v3  ;;  %493 = vmatprep.subr.bf16.mxu0 %v533_v4  ;;  %v548_v19 = vld [vmem:[%s719_s1 + $0x8] sm:$0xff]  }
   0x9   :  { %513 = vmatprep.subr.bf16.mxu1 %v534_v5 }
   0xb   :  { %494 = vmatpush3.bf16.msra.mxu0 %v533_v4 }
   0xc   :  { %514 = vmatpush3.bf16.msra.mxu1 %v534_v5  ;;  %495 = vmatprep.subr.bf16.mxu0 %v535_v6 }
   0xd   :  { %515 = vmatprep.subr.bf16.mxu1 %v536_v7 }
   0xf   :  { %496 = vmatpush3.bf16.msra.mxu0 %v535_v6 }
  0x10   :  { %516 = vmatpush3.bf16.msra.mxu1 %v536_v7  ;;  %497 = vmatprep.subr.bf16.mxu0 %v537_v8 }
  0x11   :  { %517 = vmatprep.subr.bf16.mxu1 %v538_v9 }
  0x13   :  { %498 = vmatpush3.bf16.msra.mxu0 %v537_v8 }
  0x14   :  { %518 = vmatpush3.bf16.msra.mxu1 %v538_v9  ;;  %499 = vmatprep.subr.bf16.mxu0 %v539_v10 }
  0x15   :  { %519 = vmatprep.subr.bf16.mxu1 %v540_v11 }
  0x17   :  { %500 = vmatpush3.bf16.msra.mxu0 %v539_v10 }
  0x18   :  { %520 = vmatpush3.bf16.msra.mxu1 %v540_v11  ;;  %501 = vmatprep.subr.bf16.mxu0 %v541_v14 }
  0x19   :  { %521 = vmatprep.subr.bf16.mxu1 %v542_v15 }
  0x1b   :  { %502 = vmatpush3.bf16.msra.mxu0 %v541_v14 }
  0x1c   :  { %522 = vmatpush3.bf16.msra.mxu1 %v542_v15  ;;  %503 = vmatprep.subr.bf16.mxu0 %v543_v16 }
  0x1d   :  { %523 = vmatprep.subr.bf16.mxu1 %v544_v17 }
  0x1f   :  { %504 = vmatpush3.bf16.msra.mxu0 %v543_v16 }
  0x20   :  { %524 = vmatpush3.bf16.msra.mxu1 %v544_v17 }
  0x22   :  { %506 = vmatmul.mubr.bf16.vlgmr.msra.gmra.mrb[0].mxu0 %v547_v18 }
  0x23   :  { %526 = vmatmul.mubr.bf16.vlgmr.msra.gmra.mrb[0].mxu1 %v548_v19 }
  0xf5   :  { %v658_v20 = vpop.f32.mrb[0].mxu0 }
  0xf6   :  { %v660_v21 = vpop.f32.mrb[0].mxu1  ;;  %v662_v22 = vpop.f32.mrb[1].mxu0 }
  0xf7   :  { %v664_v23 = vpop.f32.mrb[1].mxu1  ;;  %v666_v24 = vpop.f32.mrb[2].mxu0 }
  0xf8   :  { %v668_v25 = vpop.f32.mrb[2].mxu1  ;;  %v670_v26 = vpop.f32.mrb[3].mxu0 }
  0xf9   :  { %v290_v27 = vadd.f32 %v670_v26, %v662_v22  ;;  %v674_v28 = vpop.f32.mrb[3].mxu1 }
  0xfa   :  { %v325_v29 = vadd.f32 %v674_v28, %v664_v23 }
  0xfb   :  { %v291_v30 = vadd.f32 %v658_v20, %v290_v27 }
  0xfc   :  { %v326_v31 = vadd.f32 %v660_v21, %v325_v29 }
  0xfd   :  { %v292_v32 = vadd.f32 %v666_v24, %v291_v30  ;;  %v359_v30 = vlaneseq }
  0xfe   :  { %v327_v33 = vadd.f32 %v668_v25, %v326_v31 }
  0xff   :  { %v293_v34 = vrot.slane %v292_v32, 4  ;;  %v360_v31 = vshrl.u32 %v359_v30, 7 }
 0x100   :  { %v328_v35 = vrot.slane %v327_v33, 4 }
 0x101   :  { %v294_v36 = vadd.f32 %v293_v34, %v292_v32  ;;  %v288_v32 = vld [vmem:[%s720_s4] sm:$0x1] }
 0x102   :  { %v329_v37 = vadd.f32 %v328_v35, %v327_v33  ;;  %v361_v33 = vsub.s32 0, %v360_v31  ;;  %v323_v34 = vld [vmem:[%s721_s6] sm:$0x1] }
 0x103   :  { %v295_v38 = vrot.slane %v294_v36, 2 }
 0x104   :  { %v330_v39 = vrot.slane %v329_v37, 2 }
 0x105   :  { %v296_v40 = vadd.f32 %v295_v38, %v294_v36  ;;  %v289_v38 = vld [vmem:[%s722_s5] sm:$0x1] }
 0x106   :  { %v331_v41 = vadd.f32 %v330_v39, %v329_v37 }
 0x107   :  { %v297_v42 = vrot.slane %v296_v40, 1 }
 0x108   :  { %v332_v43 = vrot.slane %v331_v41, 1 }
 0x109   :  { %v298_v44 = vadd.f32 %v297_v42, %v296_v40  ;;  %v324_v42 = vld [vmem:[%s723_s7] sm:$0x1] }
 0x10a   :  { %v333_v45 = vadd.f32 %v332_v43, %v331_v41 }
 0x10b   :  { %v299_v46 = vmul.f32 0.03125, %v298_v44 }
 0x10c   :  { %v334_v47 = vmul.f32 0.03125, %v333_v45 }
 0x10d   :  { %v300_v48 = vsub.f32 %v662_v22, %v299_v46  ;;  %v301_v49 = vsub.f32 %v670_v26, %v299_v46  ;;  %v302_v50 = vsub.f32 %v658_v20, %v299_v46  ;;  %v303_v51 = vsub.f32 %v666_v24, %v299_v46 }
 0x10e   :  { %v335_v52 = vsub.f32 %v664_v23, %v334_v47  ;;  %v336_v53 = vsub.f32 %v674_v28, %v334_v47  ;;  %v337_v54 = vsub.f32 %v660_v21, %v334_v47  ;;  %v338_v55 = vsub.f32 %v668_v25, %v334_v47 }
 0x10f   :  { %v304_v56 = vmul.f32 %v300_v48, %v300_v48  ;;  %v305_v57 = vmul.f32 %v301_v49, %v301_v49  ;;  %v306_v60 = vmul.f32 %v302_v50, %v302_v50  ;;  %v307_v0 = vmul.f32 %v303_v51, %v303_v51 }
 0x110   :  { %v339_v58 = vmul.f32 %v335_v52, %v335_v52  ;;  %v340_v59 = vmul.f32 %v336_v53, %v336_v53  ;;  %v341_v62 = vmul.f32 %v337_v54, %v337_v54  ;;  %v342_v2 = vmul.f32 %v338_v55, %v338_v55 }
 0x111   :  { %v308_v61 = vadd.f32 %v305_v57, %v304_v56 }
 0x112   :  { %v343_v63 = vadd.f32 %v340_v59, %v339_v58 }
 0x113   :  { %v309_v1 = vadd.f32 %v308_v61, %v306_v60 }
 0x114   :  { %v344_v3 = vadd.f32 %v343_v63, %v341_v62 }
 0x115   :  { %v310_v4 = vadd.f32 %v309_v1, %v307_v0 }
 0x116   :  { %v345_v5 = vadd.f32 %v344_v3, %v342_v2 }
 0x117   :  { %v311_v6 = vrot.slane %v310_v4, 4 }
 0x118   :  { %v346_v7 = vrot.slane %v345_v5, 4 }
 0x119   :  { %v312_v8 = vadd.f32 %v311_v6, %v310_v4 }
 0x11a   :  { %v347_v9 = vadd.f32 %v346_v7, %v345_v5 }
 0x11b   :  { %v313_v10 = vrot.slane %v312_v8, 2 }
 0x11c   :  { %v348_v11 = vrot.slane %v347_v9, 2 }
 0x11d   :  { %v314_v12 = vadd.f32 %v313_v10, %v312_v8 }
 0x11e   :  { %v349_v13 = vadd.f32 %v348_v11, %v347_v9 }
 0x11f   :  { %v315_v14 = vrot.slane %v314_v12, 1 }
 0x120   :  { %v350_v15 = vrot.slane %v349_v13, 1 }
 0x121   :  { %v316_v16 = vadd.f32 %v315_v14, %v314_v12 }
 0x122   :  { %v351_v17 = vadd.f32 %v350_v15, %v349_v13 }
 0x123   :  { %v317_v18 = vmul.f32 0.03125, %v316_v16 }
 0x124   :  { %v352_v19 = vmul.f32 0.03125, %v351_v17 }
 0x125   :  { %v318_v27 = vadd.f32 1e-05, %v317_v18 }
 0x126   :  { %v353_v29 = vadd.f32 1e-05, %v352_v19 }
 0x127   :  { %549 = vrsqrt.f32 %v318_v27 }
 0x128   :  { %551 = vrsqrt.f32 %v353_v29 }
 0x131   :  { %v550_v35 = vpop.eup %549 }
 0x132   :  { %v552_v36 = vpop.eup %551  ;;  %v320_v37 = vmul.f32 %v550_v35, %v288_v32 }
 0x133   :  { %v355_v39 = vmul.f32 %v552_v36, %v323_v34 }
 0x134   :  { %v321_v40 = vmul.f32 %v320_v37, %v299_v46  ;;  %v362_v41 = vrot.slane %v320_v37, %v361_v33 }
 0x135   :  { %v356_v43 = vmul.f32 %v355_v39, %v334_v47  ;;  %v382_v44 = vrot.slane %v355_v39, %v361_v33 }
 0x136   :  { %v322_v45 = vsub.f32 %v289_v38, %v321_v40  ;;  %v365_v48 = vmul.f32 %v362_v41, %v670_v26  ;;  %v366_v49 = vmul.f32 %v658_v20, %v362_v41  ;;  %v367_v50 = vmul.f32 %v666_v24, %v362_v41 }
 0x137   :  { %v357_v51 = vsub.f32 %v324_v42, %v356_v43  ;;  %v364_v52 = vmul.f32 %v362_v41, %v662_v22  ;;  %v384_v53 = vmul.f32 %v382_v44, %v664_v23  ;;  %v385_v46 = vmul.f32 %v382_v44, %v674_v28 }
 0x138   :  { %v372_v54 = vrot.slane %v322_v45, %v361_v33  ;;  %v386_v55 = vmul.f32 %v660_v21, %v382_v44  ;;  %v387_v47 = vmul.f32 %v668_v25, %v382_v44 }
 0x139   :  { %v392_v56 = vrot.slane %v357_v51, %v361_v33 }
 0x13a   :  { %v375_v57 = vadd.f32 %v372_v54, %v365_v48  ;;  %v374_v58 = vadd.f32 %v372_v54, %v364_v52  ;;  %v376_v26 = vadd.f32 %v372_v54, %v366_v49  ;;  %v377_v59 = vadd.f32 %v372_v54, %v367_v50 }
 0x13b   :  { %v394_v20 = vadd.f32 %v392_v56, %v384_v53  ;;  %v395_v60 = vadd.f32 %v392_v56, %v385_v46  ;;  %v396_v24 = vadd.f32 %v392_v56, %v386_v55  ;;  %v397_v61 = vadd.f32 %v392_v56, %v387_v47 }
 0x13d   :  { %v398_v62 = vadd.f32 %v394_v20, %v374_v58  ;;  %v399_v22 = vadd.f32 %v395_v60, %v375_v57  ;;  %v400_v63 = vadd.f32 %v396_v24, %v376_v26  ;;  %v401_v23 = vadd.f32 %v397_v61, %v377_v59 }
 0x13f   :  { %v402_v0 = vmax.f32 %v398_v62, 0.0  ;;  %v403_v28 = vmax.f32 %v399_v22, 0.0  ;;  %v404_v1 = vmax.f32 %v400_v63, 0.0  ;;  %v405_v2 = vmax.f32 %v401_v23, 0.0 }
 0x141   :  { %v461_v21 = vpack.c.bf16 %v403_v28, %v402_v0  ;;  %v466_v3 = vpack.c.bf16 %v405_v2, %v404_v1 }
 0x143   :  { %462 = vst [vmem:[%s724_s8] sm:$0xff] %v461_v21   ;;  %468 = vst [vmem:[%s724_s8 + $0x8] sm:$0xff] %v466_v3  }

// kernel: _lambda_.12
= control target key start
LH: loop header
LB: loop body
LE: loop exit
PB: predicated region body
PF: predicated region fallthrough
CT: control target
= control target key end

     0   :  { %v183_v43 = vlaneseq  ;;  %s368_s1 = inlined_call_operand.vmem [shape: bf16[128,128], index: 1, kind: input, shape index: {}]   ;;  %s369_s0 = inlined_call_operand.vmem [shape: bf16[32,128], index: 0, kind: input, shape index: {}]   ;;  %s370_s2 = inlined_call_operand.vmem [shape: f32[1,128], index: 2, kind: input, shape index: {}]   ;;  %s371_s3 = inlined_call_operand.vmem [shape: f32[1,128], index: 3, kind: input, shape index: {}]   ;;  %s372_s4 = inlined_call_operand.vmem [shape: bf16[32,128], index: 4, kind: output, shape index: {}]  }
   0x1   :  { %v289_v0 = vld [vmem:[%s368_s1] sm:$0xff]   ;;  %v290_v1 = vld [vmem:[%s368_s1 + $0x8] sm:$0xff]   ;;  %v291_v2 = vld [vmem:[%s368_s1 + $0x10] sm:$0xff]  }
   0x2   :  { %269 = vmatprep.subr.bf16.mxu0 %v289_v0  ;;  %v292_v3 = vld [vmem:[%s368_s1 + $0x18] sm:$0xff]   ;;  %v297_v4 = vld [vmem:[%s369_s0] sm:$0xff]   ;;  %v294_v6 = vld [vmem:[%s368_s1 + $0x28] sm:$0xff]   ;;  %v184_v44 = vshrl.u32 %v183_v43, 7 }
   0x3   :  { %270 = vmatpush3.bf16.msra.mxu0 %v289_v0  ;;  %285 = vmatprep.mubr.bf16.mxu0 %v297_v4  ;;  %v293_v5 = vld [vmem:[%s368_s1 + $0x20] sm:$0xff]   ;;  %v295_v7 = vld [vmem:[%s368_s1 + $0x30] sm:$0xff]   ;;  %v296_v8 = vld [vmem:[%s368_s1 + $0x38] sm:$0xff]  }
   0x4   :  { %271 = vmatprep.subr.bf16.mxu0 %v290_v1  ;;  %v298_v9 = vld [vmem:[%s369_s0 + $0x8] sm:$0xff]   ;;  %v147_v45 = vld [vmem:[%s370_s2] sm:$0x1]  ;;  %v185_v46 = vsub.s32 0, %v184_v44 }
   0x5   :  { %v148_v49 = vld [vmem:[%s371_s3] sm:$0x1] }
   0x7   :  { %272 = vmatpush3.bf16.msra.mxu0 %v290_v1 }
   0x8   :  { %273 = vmatprep.subr.bf16.mxu0 %v291_v2 }
   0xb   :  { %274 = vmatpush3.bf16.msra.mxu0 %v291_v2 }
   0xc   :  { %275 = vmatprep.subr.bf16.mxu0 %v292_v3 }
   0xf   :  { %276 = vmatpush3.bf16.msra.mxu0 %v292_v3 }
  0x10   :  { %277 = vmatprep.subr.bf16.mxu0 %v293_v5 }
  0x13   :  { %278 = vmatpush3.bf16.msra.mxu0 %v293_v5 }
  0x14   :  { %279 = vmatprep.subr.bf16.mxu0 %v294_v6 }
  0x17   :  { %280 = vmatpush3.bf16.msra.mxu0 %v294_v6 }
  0x18   :  { %281 = vmatprep.subr.bf16.mxu0 %v295_v7 }
  0x1b   :  { %282 = vmatpush3.bf16.msra.mxu0 %v295_v7 }
  0x1c   :  { %283 = vmatprep.subr.bf16.mxu0 %v296_v8 }
  0x1f   :  { %284 = vmatpush3.bf16.msra.mxu0 %v296_v8 }
  0x22   :  { %286 = vmatmul.mubr.bf16.vlgmr.msra.gmra.mrb[0].mxu0 %v298_v9 }
  0xf5   :  { %v287_v10 = vpop.f32.mrb[0].mxu0 }
  0xf6   :  { %v132_v11 = vpop.f32.mrb[1].mxu0 }
  0xf7   :  { %v288_v12 = vpop.f32.mrb[2].mxu0 }
  0xf8   :  { %v135_v13 = vpop.f32.mrb[3].mxu0 }
  0xf9   :  { %v149_v14 = vadd.f32 %v135_v13, %v132_v11 }
  0xfb   :  { %v150_v15 = vadd.f32 %v287_v10, %v149_v14 }
  0xfd   :  { %v151_v16 = vadd.f32 %v288_v12, %v150_v15 }
  0xff   :  { %v152_v17 = vrot.slane %v151_v16, 4 }
 0x101   :  { %v153_v18 = vadd.f32 %v152_v17, %v151_v16 }
 0x103   :  { %v154_v19 = vrot.slane %v153_v18, 2 }
 0x105   :  { %v155_v20 = vadd.f32 %v154_v19, %v153_v18 }
 0x107   :  { %v156_v21 = vrot.slane %v155_v20, 1 }
 0x109   :  { %v157_v22 = vadd.f32 %v156_v21, %v155_v20 }
 0x10b   :  { %v158_v23 = vmul.f32 0.03125, %v157_v22 }
 0x10d   :  { %v159_v24 = vsub.f32 %v132_v11, %v158_v23  ;;  %v160_v25 = vsub.f32 %v135_v13, %v158_v23  ;;  %v161_v26 = vsub.f32 %v287_v10, %v158_v23  ;;  %v162_v27 = vsub.f32 %v288_v12, %v158_v23 }
 0x10f   :  { %v163_v28 = vmul.f32 %v159_v24, %v159_v24  ;;  %v164_v29 = vmul.f32 %v160_v25, %v160_v25  ;;  %v165_v30 = vmul.f32 %v161_v26, %v161_v26  ;;  %v166_v32 = vmul.f32 %v162_v27, %v162_v27 }
 0x111   :  { %v167_v31 = vadd.f32 %v164_v29, %v163_v28 }
 0x113   :  { %v168_v33 = vadd.f32 %v167_v31, %v165_v30 }
 0x115   :  { %v169_v34 = vadd.f32 %v168_v33, %v166_v32 }
 0x117   :  { %v170_v35 = vrot.slane %v169_v34, 4 }
 0x119   :  { %v171_v36 = vadd.f32 %v170_v35, %v169_v34 }
 0x11b   :  { %v172_v37 = vrot.slane %v171_v36, 2 }
 0x11d   :  { %v173_v38 = vadd.f32 %v172_v37, %v171_v36 }
 0x11f   :  { %v174_v39 = vrot.slane %v173_v38, 1 }
 0x121   :  { %v175_v40 = vadd.f32 %v174_v39, %v173_v38 }
 0x123   :  { %v176_v41 = vmul.f32 0.03125, %v175_v40 }
 0x125   :  { %v177_v42 = vadd.f32 1e-05, %v176_v41 }
 0x127   :  { %299 = vrsqrt.f32 %v177_v42 }
 0x131   :  { %v300_v47 = vpop.eup %299 }
 0x132   :  { %v179_v48 = vmul.f32 %v300_v47, %v147_v45 }
 0x134   :  { %v180_v50 = vmul.f32 %v179_v48, %v158_v23  ;;  %v186_v51 = vrot.slane %v179_v48, %v185_v46 }
 0x136   :  { %v181_v52 = vsub.f32 %v148_v49, %v180_v50  ;;  %v188_v53 = vmul.f32 %v186_v51, %v132_v11  ;;  %v189_v54 = vmul.f32 %v186_v51, %v135_v13  ;;  %v190_v55 = vmul.f32 %v287_v10, %v186_v51 }
 0x137   :  { %v191_v56 = vmul.f32 %v288_v12, %v186_v51 }
 0x138   :  { %v196_v57 = vrot.slane %v181_v52, %v185_v46 }
 0x13a   :  { %v198_v58 = vadd.f32 %v196_v57, %v188_v53  ;;  %v199_v59 = vadd.f32 %v196_v57, %v189_v54  ;;  %v200_v60 = vadd.f32 %v196_v57, %v190_v55  ;;  %v201_v61 = vadd.f32 %v196_v57, %v191_v56 }
 0x13c   :  { %v202_v62 = vmax.f32 %v198_v58, 0.0  ;;  %v203_v63 = vmax.f32 %v199_v59, 0.0  ;;  %v204_v0 = vmax.f32 %v200_v60, 0.0  ;;  %v205_v1 = vmax.f32 %v201_v61, 0.0 }
 0x13e   :  { %v251_v2 = vpack.c.bf16 %v203_v63, %v202_v62  ;;  %v256_v3 = vpack.c.bf16 %v205_v1, %v204_v0 }
 0x140   :  { %252 = vst [vmem:[%s372_s4] sm:$0xff] %v251_v2   ;;  %258 = vst [vmem:[%s372_s4 + $0x8] sm:$0xff] %v256_v3  }

// kernel: _lambda_.10
= control target key start
LH: loop header
LB: loop body
LE: loop exit
PB: predicated region body
PF: predicated region fallthrough
CT: control target
= control target key end

     0   :  { %s1692_s1 = inlined_call_operand.vmem [shape: bf16[1152,128], index: 1, kind: input, shape index: {}]   ;;  %s1693_s0 = inlined_call_operand.vmem [shape: bf16[32,1152], index: 0, kind: input, shape index: {}]   ;;  %s1694_s2 = inlined_call_operand.vmem [shape: f32[1,128], index: 2, kind: input, shape index: {}]   ;;  %s1695_s3 = inlined_call_operand.vmem [shape: f32[1,128], index: 3, kind: input, shape index: {}]   ;;  %s1696_s4 = inlined_call_operand.vmem [shape: bf16[32,128], index: 4, kind: output, shape index: {}]  }
   0x1   :  { %v1285_v0 = vld [vmem:[%s1692_s1 + $0x40] sm:$0xff]   ;;  %v1289_v4 = vld [vmem:[%s1692_s1 + $0x48] sm:$0xff]   ;;  %v1293_v8 = vld [vmem:[%s1692_s1 + $0x50] sm:$0xff]  }
   0x2   :  { %v1286_v1 = vld [vmem:[%s1692_s1 + $0xc0] sm:$0xff]   ;;  %1143 = vmatprep.subr.bf16.mxu0 %v1285_v0  ;;  %v1290_v5 = vld [vmem:[%s1692_s1 + $0xc8] sm:$0xff]   ;;  %v1294_v9 = vld [vmem:[%s1692_s1 + $0xd0] sm:$0xff]  }
   0x3   :  { %v1287_v2 = vld [vmem:[%s1692_s1] sm:$0xff]   ;;  %1171 = vmatprep.subr.bf16.mxu1 %v1286_v1  ;;  %v1291_v6 = vld [vmem:[%s1692_s1 + $0x8] sm:$0xff]   ;;  %v1295_v10 = vld [vmem:[%s1692_s1 + $0x10] sm:$0xff]  }
   0x4   :  { %v1288_v3 = vld [vmem:[%s1692_s1 + $0x80] sm:$0xff]   ;;  %1144 = vmatpush3.bf16.msra.mxu0 %v1287_v2  ;;  %v1292_v7 = vld [vmem:[%s1692_s1 + $0x88] sm:$0xff]   ;;  %v1296_v11 = vld [vmem:[%s1692_s1 + $0x90] sm:$0xff]  }
   0x5   :  { %1172 = vmatpush3.bf16.msra.mxu1 %v1288_v3  ;;  %1145 = vmatprep.subr.bf16.mxu0 %v1289_v4  ;;  %v1297_v12 = vld [vmem:[%s1692_s1 + $0x58] sm:$0xff]   ;;  %v1301_v16 = vld [vmem:[%s1692_s1 + $0x60] sm:$0xff]   ;;  %v1305_v20 = vld [vmem:[%s1692_s1 + $0x68] sm:$0xff]  }
   0x6   :  { %1173 = vmatprep.subr.bf16.mxu1 %v1290_v5  ;;  %v1298_v13 = vld [vmem:[%s1692_s1 + $0xd8] sm:$0xff]   ;;  %v1302_v17 = vld [vmem:[%s1692_s1 + $0xe0] sm:$0xff]   ;;  %v1306_v21 = vld [vmem:[%s1692_s1 + $0xe8] sm:$0xff]  }
   0x7   :  { %v1299_v14 = vld [vmem:[%s1692_s1 + $0x18] sm:$0xff]   ;;  %v1303_v18 = vld [vmem:[%s1692_s1 + $0x20] sm:$0xff]   ;;  %v1307_v22 = vld [vmem:[%s1692_s1 + $0x28] sm:$0xff]  }
   0x8   :  { %1146 = vmatpush3.bf16.msra.mxu0 %v1291_v6  ;;  %v1300_v15 = vld [vmem:[%s1692_s1 + $0x98] sm:$0xff]   ;;  %v1304_v19 = vld [vmem:[%s1692_s1 + $0xa0] sm:$0xff]   ;;  %v1308_v23 = vld [vmem:[%s1692_s1 + $0xa8] sm:$0xff]  }
   0x9   :  { %1174 = vmatpush3.bf16.msra.mxu1 %v1292_v7  ;;  %1147 = vmatprep.subr.bf16.mxu0 %v1293_v8  ;;  %v1309_v24 = vld [vmem:[%s1692_s1 + $0x70] sm:$0xff]   ;;  %v1313_v28 = vld [vmem:[%s1692_s1 + $0x78] sm:$0xff]   ;;  %v1317_v32 = vld [vmem:[%s1693_s0] ss:$36 sps:$4 sm:$0xff]  }
   0xa   :  { %1175 = vmatprep.subr.bf16.mxu1 %v1294_v9  ;;  %v1310_v25 = vld [vmem:[%s1692_s1 + $0xf0] sm:$0xff]   ;;  %v1314_v29 = vld [vmem:[%s1692_s1 + $0xf8] sm:$0xff]   ;;  %v1319_v33 = vld [vmem:[%s1693_s0 + $0x4] ss:$36 sps:$4 sm:$0xff]  }
   0xb   :  { %v1311_v26 = vld [vmem:[%s1692_s1 + $0x30] sm:$0xff]   ;;  %v1315_v30 = vld [vmem:[%s1692_s1 + $0x38] sm:$0xff]   ;;  %v1320_v34 = vld [vmem:[%s1693_s0 + $0x8] ss:$36 sps:$4 sm:$0xff]   ;;  %738 = vmatprep.mubr.bf16.mxu0 %v1319_v33 }
   0xc   :  { %1148 = vmatpush3.bf16.msra.mxu0 %v1295_v10  ;;  %v1312_v27 = vld [vmem:[%s1692_s1 + $0xb0] sm:$0xff]   ;;  %v1316_v31 = vld [vmem:[%s1692_s1 + $0xb8] sm:$0xff]   ;;  %v1323_v36 = vld [vmem:[%s1692_s1 + $0x140] sm:$0xff]  }
   0xd   :  { %1176 = vmatpush3.bf16.msra.mxu1 %v1296_v11  ;;  %1149 = vmatprep.subr.bf16.mxu0 %v1297_v12  ;;  %v1322_v35 = vld [vmem:[%s1693_s0 + $0xc] ss:$36 sps:$4 sm:$0xff]   ;;  %v1324_v37 = vld [vmem:[%s1692_s1 + $0x100] sm:$0xff]   ;;  %v1335_v48 = vld [vmem:[%s1692_s1 + $0x158] sm:$0xff]  }
   0xe   :  { %1177 = vmatprep.subr.bf16.mxu1 %v1298_v13  ;;  %787 = vmatprep.mubr.bf16.mxu1 %v1322_v35  ;;  %v1325_v38 = vld [vmem:[%s1692_s1 + $0x1c0] sm:$0xff]   ;;  %v1327_v40 = vld [vmem:[%s1692_s1 + $0x148] sm:$0xff]   ;;  %v1331_v44 = vld [vmem:[%s1692_s1 + $0x150] sm:$0xff]  }
   0xf   :  { %v1326_v39 = vld [vmem:[%s1692_s1 + $0x180] sm:$0xff]   ;;  %v1328_v41 = vld [vmem:[%s1692_s1 + $0x108] sm:$0xff]   ;;  %v1332_v45 = vld [vmem:[%s1692_s1 + $0x110] sm:$0xff]  }
  0x10   :  { %1150 = vmatpush3.bf16.msra.mxu0 %v1299_v14  ;;  %v1329_v42 = vld [vmem:[%s1692_s1 + $0x1c8] sm:$0xff]   ;;  %v1333_v46 = vld [vmem:[%s1692_s1 + $0x1d0] sm:$0xff]   ;;  %v1336_v49 = vld [vmem:[%s1692_s1 + $0x118] sm:$0xff]  }
  0x11   :  { %1178 = vmatpush3.bf16.msra.mxu1 %v1300_v15  ;;  %1151 = vmatprep.subr.bf16.mxu0 %v1301_v16  ;;  %v1330_v43 = vld [vmem:[%s1692_s1 + $0x188] sm:$0xff]   ;;  %v1334_v47 = vld [vmem:[%s1692_s1 + $0x190] sm:$0xff]   ;;  %v1337_v50 = vld [vmem:[%s1692_s1 + $0x1d8] sm:$0xff]  }
  0x12   :  { %1179 = vmatprep.subr.bf16.mxu1 %v1302_v17  ;;  %v1338_v51 = vld [vmem:[%s1692_s1 + $0x198] sm:$0xff]   ;;  %v1339_v52 = vld [vmem:[%s1692_s1 + $0x160] sm:$0xff]   ;;  %v1343_v56 = vld [vmem:[%s1692_s1 + $0x168] sm:$0xff]  }
  0x13   :  { %v1340_v53 = vld [vmem:[%s1692_s1 + $0x120] sm:$0xff]   ;;  %v1344_v57 = vld [vmem:[%s1693_s0 + $0x4c] ss:$36 sps:$4 sm:$0xff]   ;;  %v1346_v58 = vld [vmem:[%s1693_s0 + $0x54] ss:$36 sps:$4 sm:$0xff]  }
  0x14   :  { %1152 = vmatpush3.bf16.msra.mxu0 %v1303_v18  ;;  %v1341_v54 = vld [vmem:[%s1692_s1 + $0x1e0] sm:$0xff]   ;;  %v1348_v59 = vld [vmem:[%s1692_s1 + $0x128] sm:$0xff]   ;;  %v1350_v61 = vld [vmem:[%s1693_s0 + $0x50] ss:$36 sps:$4 sm:$0xff]  }
  0x15   :  { %1180 = vmatpush3.bf16.msra.mxu1 %v1304_v19  ;;  %1153 = vmatprep.subr.bf16.mxu0 %v1305_v20  ;;  %v1342_v55 = vld [vmem:[%s1692_s1 + $0x1a0] sm:$0xff]   ;;  %v1349_v60 = vld [vmem:[%s1693_s0 + $0x48] ss:$36 sps:$4 sm:$0xff]   ;;  %v1353_v0 = vld [vmem:[%s1692_s1 + $0x170] sm:$0xff]  }
  0x16   :  { %1181 = vmatprep.subr.bf16.mxu1 %v1306_v21  ;;  %v1351_v62 = vld [vmem:[%s1692_s1 + $0x1e8] sm:$0xff]   ;;  %v1354_v1 = vld [vmem:[%s1692_s1 + $0x130] sm:$0xff]   ;;  %v1357_v4 = vld [vmem:[%s1692_s1 + $0x178] sm:$0xff]  }
  0x17   :  { %v1352_v63 = vld [vmem:[%s1692_s1 + $0x1a8] sm:$0xff]   ;;  %v1355_v2 = vld [vmem:[%s1692_s1 + $0x1f0] sm:$0xff]   ;;  %v1358_v5 = vld [vmem:[%s1692_s1 + $0x138] sm:$0xff]  }
  0x18   :  { %1154 = vmatpush3.bf16.msra.mxu0 %v1307_v22  ;;  %v1356_v3 = vld [vmem:[%s1692_s1 + $0x1b0] sm:$0xff]   ;;  %v1359_v6 = vld [vmem:[%s1692_s1 + $0x1f8] sm:$0xff]   ;;  %v1364_v10 = vld [vmem:[%s1692_s1 + $0x200] sm:$0xff]  }
  0x19   :  { %1182 = vmatpush3.bf16.msra.mxu1 %v1308_v23  ;;  %1155 = vmatprep.subr.bf16.mxu0 %v1309_v24  ;;  %v1360_v7 = vld [vmem:[%s1693_s0 + $0x10] ss:$36 sps:$4 sm:$0xff]   ;;  %v1363_v9 = vld [vmem:[%s1692_s1 + $0x1b8] sm:$0xff]   ;;  %v1368_v13 = vld [vmem:[%s1692_s1 + $0x208] sm:$0xff]  }
  0x1a   :  { %1183 = vmatprep.subr.bf16.mxu1 %v1310_v25  ;;  %v1362_v8 = vld [vmem:[%s1693_s0 + $0x14] ss:$36 sps:$4 sm:$0xff]   ;;  %v1367_v12 = vld [vmem:[%s1693_s0 + $0x1c] ss:$36 sps:$4 sm:$0xff]   ;;  %v1373_v17 = vld [vmem:[%s1693_s0 + $0x64] ss:$36 sps:$4 sm:$0xff]  }
  0x1b   :  { %v1365_v11 = vld [vmem:[%s1693_s0 + $0x18] ss:$36 sps:$4 sm:$0xff]   ;;  %v1372_v16 = vld [vmem:[%s1692_s1 + $0x210] sm:$0xff]   ;;  %v1375_v18 = vld [vmem:[%s1693_s0 + $0x60] ss:$36 sps:$4 sm:$0xff]  }
  0x1c   :  { %1156 = vmatpush3.bf16.msra.mxu0 %v1311_v26  ;;  %v1369_v14 = vld [vmem:[%s1693_s0 + $0x5c] ss:$36 sps:$4 sm:$0xff]   ;;  %v1378_v22 = vld [vmem:[%s1692_s1 + $0x228] sm:$0xff]   ;;  %v1379_v23 = vld [vmem:[%s1692_s1 + $0x230] sm:$0xff]  }
  0x1d   :  { %1184 = vmatpush3.bf16.msra.mxu1 %v1312_v27  ;;  %1157 = vmatprep.subr.bf16.mxu0 %v1313_v28  ;;  %v1371_v15 = vld [vmem:[%s1693_s0 + $0x58] ss:$36 sps:$4 sm:$0xff]   ;;  %v1377_v20 = vld [vmem:[%s1692_s1 + $0x220] sm:$0xff]   ;;  %v1382_v25 = vld [vmem:[%s1693_s0 + $0x68] ss:$36 sps:$4 sm:$0xff]  }
  0x1e   :  { %1185 = vmatprep.subr.bf16.mxu1 %v1314_v29  ;;  %v1376_v19 = vld [vmem:[%s1692_s1 + $0x218] sm:$0xff]   ;;  %v1381_v21 = vld [vmem:[%s1693_s0 + $0x20] ss:$36 sps:$4 sm:$0xff]  }
  0x1f   :  { %v1380_v24 = vld [vmem:[%s1692_s1 + $0x238] sm:$0xff]  }
  0x20   :  { %1158 = vmatpush3.bf16.msra.mxu0 %v1315_v30 }
  0x21   :  { %1186 = vmatpush3.bf16.msra.mxu1 %v1316_v31  ;;  %1199 = vmatprep.subr.bf16.mxu0 %v1323_v36 }
  0x22   :  { %1227 = vmatprep.subr.bf16.mxu1 %v1325_v38 }
  0x23   :  { %739 = vmatmul.mubr.bf16.vlgmr.msra.gmra.mrb[0].mxu0 %v1317_v32 }
  0x24   :  { %788 = vmatmul.mubr.bf16.vlgmr.msra.gmra.mrb[0].mxu1 %v1320_v34  ;;  %1200 = vmatpush3.bf16.msra.mxu0 %v1324_v37 }
  0x25   :  { %1228 = vmatpush3.bf16.msra.mxu1 %v1326_v39  ;;  %1201 = vmatprep.subr.bf16.mxu0 %v1327_v40 }
  0x26   :  { %1229 = vmatprep.subr.bf16.mxu1 %v1329_v42  ;;  %746 = vmatprep.mubr.bf16.mxu0 %v1344_v57 }
  0x27   :  { %795 = vmatprep.mubr.bf16.mxu1 %v1346_v58 }
  0x28   :  { %1202 = vmatpush3.bf16.msra.mxu0 %v1328_v41 }
  0x29   :  { %1230 = vmatpush3.bf16.msra.mxu1 %v1330_v43  ;;  %1203 = vmatprep.subr.bf16.mxu0 %v1331_v44 }
  0x2a   :  { %1231 = vmatprep.subr.bf16.mxu1 %v1333_v46 }
  0x2b   :  { %747 = vmatmul.mubr.bf16.gmra.mrb[4].mxu0 %v1349_v60 }
  0x2c   :  { %1204 = vmatpush3.bf16.msra.mxu0 %v1332_v45  ;;  %796 = vmatmul.mubr.bf16.gmra.mrb[4].mxu1 %v1350_v61 }
  0x2d   :  { %1232 = vmatpush3.bf16.msra.mxu1 %v1334_v47  ;;  %1205 = vmatprep.subr.bf16.mxu0 %v1335_v48 }
  0x2e   :  { %1233 = vmatprep.subr.bf16.mxu1 %v1337_v50  ;;  %836 = vmatprep.mubr.bf16.mxu0 %v1362_v8 }
  0x2f   :  { %885 = vmatprep.mubr.bf16.mxu1 %v1367_v12 }
  0x30   :  { %1206 = vmatpush3.bf16.msra.mxu0 %v1336_v49 }
  0x31   :  { %1234 = vmatpush3.bf16.msra.mxu1 %v1338_v51  ;;  %1207 = vmatprep.subr.bf16.mxu0 %v1339_v52 }
  0x32   :  { %1235 = vmatprep.subr.bf16.mxu1 %v1341_v54 }
  0x34   :  { %1208 = vmatpush3.bf16.msra.mxu0 %v1340_v53 }
  0x35   :  { %1236 = vmatpush3.bf16.msra.mxu1 %v1342_v55  ;;  %1209 = vmatprep.subr.bf16.mxu0 %v1343_v56 }
  0x36   :  { %1237 = vmatprep.subr.bf16.mxu1 %v1351_v62 }
  0x38   :  { %1210 = vmatpush3.bf16.msra.mxu0 %v1348_v59 }
  0x39   :  { %1238 = vmatpush3.bf16.msra.mxu1 %v1352_v63  ;;  %1211 = vmatprep.subr.bf16.mxu0 %v1353_v0 }
  0x3a   :  { %1239 = vmatprep.subr.bf16.mxu1 %v1355_v2 }
  0x3c   :  { %1212 = vmatpush3.bf16.msra.mxu0 %v1354_v1 }
  0x3d   :  { %1240 = vmatpush3.bf16.msra.mxu1 %v1356_v3  ;;  %1213 = vmatprep.subr.bf16.mxu0 %v1357_v4 }
  0x3e   :  { %1241 = vmatprep.subr.bf16.mxu1 %v1359_v6 }
  0x40   :  { %1214 = vmatpush3.bf16.msra.mxu0 %v1358_v5 }
  0x41   :  { %1242 = vmatpush3.bf16.msra.mxu1 %v1363_v9  ;;  %1265 = vmatprep.subr.bf16.mxu0 %v1364_v10 }
  0x43   :  { %837 = vmatmul.mubr.bf16.vlgmr.msra.gmra.mrb[8].mxu0 %v1360_v7 }
  0x44   :  { %1266 = vmatpush3.bf16.msra.mxu0 %v1364_v10  ;;  %886 = vmatmul.mubr.bf16.vlgmr.msra.gmra.mrb[8].mxu1 %v1365_v11 }
  0x45   :  { %1267 = vmatprep.subr.bf16.mxu0 %v1368_v13  ;;  %844 = vmatprep.mubr.bf16.mxu0 %v1369_v14 }
  0x46   :  { %893 = vmatprep.mubr.bf16.mxu1 %v1373_v17 }
  0x48   :  { %1268 = vmatpush3.bf16.msra.mxu0 %v1368_v13 }
  0x49   :  { %1269 = vmatprep.subr.bf16.mxu0 %v1372_v16 }
  0x4b   :  { %845 = vmatmul.mubr.bf16.gmra.mrb[12].mxu0 %v1371_v15 }
  0x4c   :  { %1270 = vmatpush3.bf16.msra.mxu0 %v1372_v16  ;;  %894 = vmatmul.mubr.bf16.gmra.mrb[12].mxu1 %v1375_v18 }
  0x4d   :  { %1271 = vmatprep.subr.bf16.mxu0 %v1376_v19  ;;  %1281 = vmatprep.mubr.bf16.mxu0 %v1381_v21 }
  0x50   :  { %1272 = vmatpush3.bf16.msra.mxu0 %v1376_v19 }
  0x51   :  { %1273 = vmatprep.subr.bf16.mxu0 %v1377_v20 }
  0x54   :  { %1274 = vmatpush3.bf16.msra.mxu0 %v1377_v20 }
  0x55   :  { %1275 = vmatprep.subr.bf16.mxu0 %v1378_v22 }
  0x58   :  { %1276 = vmatpush3.bf16.msra.mxu0 %v1378_v22 }
  0x59   :  { %1277 = vmatprep.subr.bf16.mxu0 %v1379_v23 }
  0x5c   :  { %1278 = vmatpush3.bf16.msra.mxu0 %v1379_v23 }
  0x5d   :  { %1279 = vmatprep.subr.bf16.mxu0 %v1380_v24 }
  0x60   :  { %1280 = vmatpush3.bf16.msra.mxu0 %v1380_v24 }
  0x63   :  { %1282 = vmatmul.mubr.bf16.vlgmr.msra.gmra.mrb[16].mxu0 %v1382_v25 }
  0xf6   :  { %v1159_v26 = vpop.f32.mrb[0].mxu0 }
  0xf7   :  { %v1187_v27 = vpop.f32.mrb[0].mxu1  ;;  %v1160_v28 = vpop.f32.mrb[1].mxu0 }
  0xf8   :  { %v1161_v29 = vadd.f32 %v1160_v28, %v1159_v26  ;;  %v1188_v30 = vpop.f32.mrb[1].mxu1  ;;  %v1162_v31 = vpop.f32.mrb[2].mxu0 }
  0xf9   :  { %v1189_v32 = vadd.f32 %v1188_v30, %v1187_v27  ;;  %v1190_v33 = vpop.f32.mrb[2].mxu1  ;;  %v1163_v34 = vpop.f32.mrb[3].mxu0 }
  0xfa   :  { %v1164_v35 = vadd.f32 %v1163_v34, %v1162_v31  ;;  %v1191_v36 = vpop.f32.mrb[3].mxu1 }
  0xfb   :  { %v790_v37 = vadd.f32 %v1189_v32, %v1161_v29  ;;  %v1192_v38 = vadd.f32 %v1191_v36, %v1190_v33 }
  0xfd   :  { %v793_v39 = vadd.f32 %v1192_v38, %v1164_v35 }
  0xfe   :  { %v1165_v40 = vpop.f32.mrb[4].mxu0 }
  0xff   :  { %v1193_v41 = vpop.f32.mrb[4].mxu1  ;;  %v1166_v42 = vpop.f32.mrb[5].mxu0 }
 0x100   :  { %v1194_v43 = vpop.f32.mrb[5].mxu1  ;;  %v1167_v44 = vadd.f32 %v1166_v42, %v1165_v40  ;;  %v1168_v46 = vpop.f32.mrb[6].mxu0 }
 0x101   :  { %v1195_v45 = vadd.f32 %v1194_v43, %v1193_v41  ;;  %v1196_v47 = vpop.f32.mrb[6].mxu1  ;;  %v1169_v48 = vpop.f32.mrb[7].mxu0 }
 0x102   :  { %v1197_v49 = vpop.f32.mrb[7].mxu1  ;;  %v1170_v51 = vadd.f32 %v1169_v48, %v1168_v46 }
 0x103   :  { %v798_v50 = vadd.f32 %v1195_v45, %v1167_v44  ;;  %v1198_v52 = vadd.f32 %v1197_v49, %v1196_v47 }
 0x105   :  { %v801_v53 = vadd.f32 %v1198_v52, %v1170_v51 }
 0x116   :  { %v1215_v54 = vpop.f32.mrb[8].mxu0 }
 0x117   :  { %v1216_v55 = vpop.f32.mrb[9].mxu0  ;;  %v1243_v58 = vpop.f32.mrb[8].mxu1 }
 0x118   :  { %v1217_v56 = vadd.f32 %v1216_v55, %v1215_v54  ;;  %v1218_v57 = vpop.f32.mrb[10].mxu0  ;;  %v1244_v62 = vpop.f32.mrb[9].mxu1 }
 0x119   :  { %v1219_v59 = vpop.f32.mrb[11].mxu0  ;;  %v1245_v63 = vadd.f32 %v1244_v62, %v1243_v58  ;;  %v1246_v0 = vpop.f32.mrb[10].mxu1 }
 0x11a   :  { %v839_v60 = vadd.f32 %v1217_v56, %v790_v37  ;;  %v1220_v61 = vadd.f32 %v1219_v59, %v1218_v57  ;;  %v1247_v2 = vpop.f32.mrb[11].mxu1  ;;  %v987_v59 = vlaneseq }
 0x11b   :  { %v1248_v3 = vadd.f32 %v1247_v2, %v1246_v0 }
 0x11c   :  { %v842_v1 = vadd.f32 %v1220_v61, %v793_v39  ;;  %v888_v4 = vadd.f32 %v1245_v63, %v839_v60  ;;  %v988_v60 = vshrl.u32 %v987_v59, 7  ;;  %v951_v61 = vld [vmem:[%s1694_s2] sm:$0x1] }
 0x11e   :  { %v1221_v5 = vpop.f32.mrb[12].mxu0  ;;  %v891_v7 = vadd.f32 %v1248_v3, %v842_v1  ;;  %v989_v62 = vsub.s32 0, %v988_v60  ;;  %v952_v1 = vld [vmem:[%s1695_s3] sm:$0x1] }
 0x11f   :  { %v1222_v6 = vpop.f32.mrb[13].mxu0  ;;  %v1249_v10 = vpop.f32.mrb[12].mxu1 }
 0x120   :  { %v1223_v8 = vadd.f32 %v1222_v6, %v1221_v5  ;;  %v1224_v9 = vpop.f32.mrb[14].mxu0  ;;  %v1250_v14 = vpop.f32.mrb[13].mxu1 }
 0x121   :  { %v1225_v11 = vpop.f32.mrb[15].mxu0  ;;  %v1251_v15 = vadd.f32 %v1250_v14, %v1249_v10  ;;  %v1252_v16 = vpop.f32.mrb[14].mxu1 }
 0x122   :  { %v847_v12 = vadd.f32 %v1223_v8, %v798_v50  ;;  %v1226_v13 = vadd.f32 %v1225_v11, %v1224_v9  ;;  %v1253_v18 = vpop.f32.mrb[15].mxu1 }
 0x123   :  { %v1254_v19 = vadd.f32 %v1253_v18, %v1252_v16 }
 0x124   :  { %v850_v17 = vadd.f32 %v1226_v13, %v801_v53  ;;  %v896_v20 = vadd.f32 %v1251_v15, %v847_v12 }
 0x126   :  { %v899_v21 = vadd.f32 %v1254_v19, %v850_v17 }
 0x136   :  { %v1283_v22 = vpop.f32.mrb[16].mxu0 }
 0x137   :  { %v945_v23 = vadd.f32 %v1283_v22, %v896_v20  ;;  %v936_v24 = vpop.f32.mrb[17].mxu0 }
 0x138   :  { %v937_v25 = vadd.f32 %v936_v24, %v888_v4  ;;  %v1284_v26 = vpop.f32.mrb[18].mxu0 }
 0x139   :  { %v948_v27 = vadd.f32 %v1284_v26, %v899_v21  ;;  %v939_v28 = vpop.f32.mrb[19].mxu0 }
 0x13a   :  { %v940_v29 = vadd.f32 %v939_v28, %v891_v7 }
 0x13c   :  { %v953_v30 = vadd.f32 %v940_v29, %v937_v25 }
 0x13e   :  { %v954_v31 = vadd.f32 %v953_v30, %v945_v23 }
 0x140   :  { %v955_v32 = vadd.f32 %v954_v31, %v948_v27 }
 0x142   :  { %v956_v33 = vrot.slane %v955_v32, 4 }
 0x144   :  { %v957_v34 = vadd.f32 %v956_v33, %v955_v32 }
 0x146   :  { %v958_v35 = vrot.slane %v957_v34, 2 }
 0x148   :  { %v959_v36 = vadd.f32 %v958_v35, %v957_v34 }
 0x14a   :  { %v960_v37 = vrot.slane %v959_v36, 1 }
 0x14c   :  { %v961_v38 = vadd.f32 %v960_v37, %v959_v36 }
 0x14e   :  { %v962_v39 = vmul.f32 0.03125, %v961_v38 }
 0x150   :  { %v963_v40 = vsub.f32 %v937_v25, %v962_v39  ;;  %v964_v41 = vsub.f32 %v940_v29, %v962_v39  ;;  %v965_v42 = vsub.f32 %v945_v23, %v962_v39  ;;  %v966_v43 = vsub.f32 %v948_v27, %v962_v39 }
 0x152   :  { %v967_v44 = vmul.f32 %v963_v40, %v963_v40  ;;  %v968_v45 = vmul.f32 %v964_v41, %v964_v41  ;;  %v969_v46 = vmul.f32 %v965_v42, %v965_v42  ;;  %v970_v48 = vmul.f32 %v966_v43, %v966_v43 }
 0x154   :  { %v971_v47 = vadd.f32 %v968_v45, %v967_v44 }
 0x156   :  { %v972_v49 = vadd.f32 %v971_v47, %v969_v46 }
 0x158   :  { %v973_v50 = vadd.f32 %v972_v49, %v970_v48 }
 0x15a   :  { %v974_v51 = vrot.slane %v973_v50, 4 }
 0x15c   :  { %v975_v52 = vadd.f32 %v974_v51, %v973_v50 }
 0x15e   :  { %v976_v53 = vrot.slane %v975_v52, 2 }
 0x160   :  { %v977_v54 = vadd.f32 %v976_v53, %v975_v52 }
 0x162   :  { %v978_v55 = vrot.slane %v977_v54, 1 }
 0x164   :  { %v979_v56 = vadd.f32 %v978_v55, %v977_v54 }
 0x166   :  { %v980_v57 = vmul.f32 0.03125, %v979_v56 }
 0x168   :  { %v981_v58 = vadd.f32 1e-05, %v980_v57 }
 0x16a   :  { %1383 = vrsqrt.f32 %v981_v58 }
 0x174   :  { %v1384_v63 = vpop.eup %1383 }
 0x175   :  { %v983_v0 = vmul.f32 %v1384_v63, %v951_v61 }
 0x177   :  { %v984_v2 = vmul.f32 %v983_v0, %v962_v39  ;;  %v990_v3 = vrot.slane %v983_v0, %v989_v62 }
 0x179   :  { %v985_v4 = vsub.f32 %v952_v1, %v984_v2  ;;  %v992_v5 = vmul.f32 %v990_v3, %v937_v25  ;;  %v993_v6 = vmul.f32 %v990_v3, %v940_v29  ;;  %v994_v7 = vmul.f32 %v990_v3, %v945_v23 }
 0x17a   :  { %v995_v8 = vmul.f32 %v990_v3, %v948_v27 }
 0x17b   :  { %v1000_v9 = vrot.slane %v985_v4, %v989_v62 }
 0x17d   :  { %v1002_v10 = vadd.f32 %v1000_v9, %v992_v5  ;;  %v1003_v11 = vadd.f32 %v1000_v9, %v993_v6  ;;  %v1004_v12 = vadd.f32 %v1000_v9, %v994_v7  ;;  %v1005_v13 = vadd.f32 %v1000_v9, %v995_v8 }
 0x17f   :  { %v1006_v14 = vmax.f32 %v1002_v10, 0.0  ;;  %v1007_v15 = vmax.f32 %v1003_v11, 0.0  ;;  %v1008_v16 = vmax.f32 %v1004_v12, 0.0  ;;  %v1009_v17 = vmax.f32 %v1005_v13, 0.0 }
 0x181   :  { %v1135_v18 = vpack.c.bf16 %v1007_v15, %v1006_v14  ;;  %v1140_v19 = vpack.c.bf16 %v1009_v17, %v1008_v16 }
 0x183   :  { %1136 = vst [vmem:[%s1696_s4] sm:$0xff] %v1135_v18   ;;  %1142 = vst [vmem:[%s1696_s4 + $0x8] sm:$0xff] %v1140_v19  }

// kernel: _lambda_.14
= control target key start
LH: loop header
LB: loop body
LE: loop exit
PB: predicated region body
PF: predicated region fallthrough
CT: control target
= control target key end

     0   :  { %v186_v43 = vlaneseq  ;;  %s403_s2 = inlined_call_operand.vmem [shape: bf16[128,128], index: 2, kind: input, shape index: {}]   ;;  %s404_s0 = inlined_call_operand.vmem [shape: bf16[32,128], index: 0, kind: input, shape index: {}]   ;;  %s405_s3 = inlined_call_operand.vmem [shape: f32[1,128], index: 3, kind: input, shape index: {}]   ;;  %s406_s4 = inlined_call_operand.vmem [shape: f32[1,128], index: 4, kind: input, shape index: {}]   ;;  %s407_s1 = inlined_call_operand.vmem [shape: bf16[32,128], index: 1, kind: input, shape index: {}]   ;;  %s408_s5 = inlined_call_operand.vmem [shape: bf16[32,128], index: 5, kind: output, shape index: {}]  }
   0x1   :  { %v313_v0 = vld [vmem:[%s403_s2] sm:$0xff]   ;;  %v314_v1 = vld [vmem:[%s403_s2 + $0x8] sm:$0xff]   ;;  %v315_v2 = vld [vmem:[%s403_s2 + $0x10] sm:$0xff]  }
   0x2   :  { %293 = vmatprep.subr.bf16.mxu0 %v313_v0  ;;  %v316_v3 = vld [vmem:[%s403_s2 + $0x18] sm:$0xff]   ;;  %v321_v4 = vld [vmem:[%s404_s0] sm:$0xff]   ;;  %v318_v6 = vld [vmem:[%s403_s2 + $0x28] sm:$0xff]   ;;  %v187_v44 = vshrl.u32 %v186_v43, 7 }
   0x3   :  { %294 = vmatpush3.bf16.msra.mxu0 %v313_v0  ;;  %309 = vmatprep.mubr.bf16.mxu0 %v321_v4  ;;  %v317_v5 = vld [vmem:[%s403_s2 + $0x20] sm:$0xff]   ;;  %v319_v7 = vld [vmem:[%s403_s2 + $0x30] sm:$0xff]   ;;  %v320_v8 = vld [vmem:[%s403_s2 + $0x38] sm:$0xff]  }
   0x4   :  { %295 = vmatprep.subr.bf16.mxu0 %v314_v1  ;;  %v322_v9 = vld [vmem:[%s404_s0 + $0x8] sm:$0xff]   ;;  %v150_v45 = vld [vmem:[%s405_s3] sm:$0x1]  ;;  %v188_v46 = vsub.s32 0, %v187_v44 }
   0x5   :  { %v151_v49 = vld [vmem:[%s406_s4] sm:$0x1]  ;;  %v281_v53 = vld [vmem:[%s407_s1 + $0x8] sm:$0xff]  }
   0x6   :  { %v264_v52 = vld [vmem:[%s407_s1] sm:$0xff]   ;;  %v269_v62 = vunpack.c.l.bf16 %v281_v53  ;;  %v270_v63 = vunpack.c.h.bf16 %v281_v53 }
   0x7   :  { %296 = vmatpush3.bf16.msra.mxu0 %v314_v1  ;;  %v265_v59 = vunpack.c.l.bf16 %v264_v52  ;;  %v266_v61 = vunpack.c.h.bf16 %v264_v52 }
   0x8   :  { %297 = vmatprep.subr.bf16.mxu0 %v315_v2 }
   0xb   :  { %298 = vmatpush3.bf16.msra.mxu0 %v315_v2 }
   0xc   :  { %299 = vmatprep.subr.bf16.mxu0 %v316_v3 }
   0xf   :  { %300 = vmatpush3.bf16.msra.mxu0 %v316_v3 }
  0x10   :  { %301 = vmatprep.subr.bf16.mxu0 %v317_v5 }
  0x13   :  { %302 = vmatpush3.bf16.msra.mxu0 %v317_v5 }
  0x14   :  { %303 = vmatprep.subr.bf16.mxu0 %v318_v6 }
  0x17   :  { %304 = vmatpush3.bf16.msra.mxu0 %v318_v6 }
  0x18   :  { %305 = vmatprep.subr.bf16.mxu0 %v319_v7 }
  0x1b   :  { %306 = vmatpush3.bf16.msra.mxu0 %v319_v7 }
  0x1c   :  { %307 = vmatprep.subr.bf16.mxu0 %v320_v8 }
  0x1f   :  { %308 = vmatpush3.bf16.msra.mxu0 %v320_v8 }
  0x22   :  { %310 = vmatmul.mubr.bf16.vlgmr.msra.gmra.mrb[0].mxu0 %v322_v9 }
  0xf5   :  { %v311_v10 = vpop.f32.mrb[0].mxu0 }
  0xf6   :  { %v135_v11 = vpop.f32.mrb[1].mxu0 }
  0xf7   :  { %v312_v12 = vpop.f32.mrb[2].mxu0 }
  0xf8   :  { %v138_v13 = vpop.f32.mrb[3].mxu0 }
  0xf9   :  { %v152_v14 = vadd.f32 %v138_v13, %v135_v11 }
  0xfb   :  { %v153_v15 = vadd.f32 %v311_v10, %v152_v14 }
  0xfd   :  { %v154_v16 = vadd.f32 %v312_v12, %v153_v15 }
  0xff   :  { %v155_v17 = vrot.slane %v154_v16, 4 }
 0x101   :  { %v156_v18 = vadd.f32 %v155_v17, %v154_v16 }
 0x103   :  { %v157_v19 = vrot.slane %v156_v18, 2 }
 0x105   :  { %v158_v20 = vadd.f32 %v157_v19, %v156_v18 }
 0x107   :  { %v159_v21 = vrot.slane %v158_v20, 1 }
 0x109   :  { %v160_v22 = vadd.f32 %v159_v21, %v158_v20 }
 0x10b   :  { %v161_v23 = vmul.f32 0.03125, %v160_v22 }
 0x10d   :  { %v162_v24 = vsub.f32 %v135_v11, %v161_v23  ;;  %v163_v25 = vsub.f32 %v138_v13, %v161_v23  ;;  %v164_v26 = vsub.f32 %v311_v10, %v161_v23  ;;  %v165_v27 = vsub.f32 %v312_v12, %v161_v23 }
 0x10f   :  { %v166_v28 = vmul.f32 %v162_v24, %v162_v24  ;;  %v167_v29 = vmul.f32 %v163_v25, %v163_v25  ;;  %v168_v30 = vmul.f32 %v164_v26, %v164_v26  ;;  %v169_v32 = vmul.f32 %v165_v27, %v165_v27 }
 0x111   :  { %v170_v31 = vadd.f32 %v167_v29, %v166_v28 }
 0x113   :  { %v171_v33 = vadd.f32 %v170_v31, %v168_v30 }
 0x115   :  { %v172_v34 = vadd.f32 %v171_v33, %v169_v32 }
 0x117   :  { %v173_v35 = vrot.slane %v172_v34, 4 }
 0x119   :  { %v174_v36 = vadd.f32 %v173_v35, %v172_v34 }
 0x11b   :  { %v175_v37 = vrot.slane %v174_v36, 2 }
 0x11d   :  { %v176_v38 = vadd.f32 %v175_v37, %v174_v36 }
 0x11f   :  { %v177_v39 = vrot.slane %v176_v38, 1 }
 0x121   :  { %v178_v40 = vadd.f32 %v177_v39, %v176_v38 }
 0x123   :  { %v179_v41 = vmul.f32 0.03125, %v178_v40 }
 0x125   :  { %v180_v42 = vadd.f32 1e-05, %v179_v41 }
 0x127   :  { %323 = vrsqrt.f32 %v180_v42 }
 0x131   :  { %v324_v47 = vpop.eup %323 }
 0x132   :  { %v182_v48 = vmul.f32 %v324_v47, %v150_v45 }
 0x134   :  { %v183_v50 = vmul.f32 %v182_v48, %v161_v23  ;;  %v189_v51 = vrot.slane %v182_v48, %v188_v46 }
 0x136   :  { %v184_v54 = vsub.f32 %v151_v49, %v183_v50  ;;  %v191_v55 = vmul.f32 %v189_v51, %v135_v11  ;;  %v192_v56 = vmul.f32 %v189_v51, %v138_v13  ;;  %v193_v57 = vmul.f32 %v311_v10, %v189_v51 }
 0x137   :  { %v194_v58 = vmul.f32 %v312_v12, %v189_v51 }
 0x138   :  { %v199_v60 = vrot.slane %v184_v54, %v188_v46 }
 0x13a   :  { %v201_v0 = vadd.f32 %v199_v60, %v191_v55  ;;  %v202_v1 = vadd.f32 %v199_v60, %v192_v56  ;;  %v203_v2 = vadd.f32 %v199_v60, %v193_v57  ;;  %v204_v3 = vadd.f32 %v199_v60, %v194_v58 }
 0x13c   :  { %v213_v4 = vadd.f32 %v265_v59, %v201_v0  ;;  %v214_v5 = vadd.f32 %v266_v61, %v202_v1  ;;  %v215_v6 = vadd.f32 %v269_v62, %v203_v2  ;;  %v216_v7 = vadd.f32 %v270_v63, %v204_v3 }
 0x13e   :  { %v217_v8 = vmax.f32 %v213_v4, 0.0  ;;  %v218_v9 = vmax.f32 %v214_v5, 0.0  ;;  %v219_v14 = vmax.f32 %v215_v6, 0.0  ;;  %v220_v11 = vmax.f32 %v216_v7, 0.0 }
 0x140   :  { %v274_v13 = vpack.c.bf16 %v218_v9, %v217_v8  ;;  %v279_v10 = vpack.c.bf16 %v220_v11, %v219_v14 }
 0x142   :  { %275 = vst [vmem:[%s408_s5] sm:$0xff] %v274_v13   ;;  %282 = vst [vmem:[%s408_s5 + $0x8] sm:$0xff] %v279_v10  }

// kernel: _lambda_.15
= control target key start
LH: loop header
LB: loop body
LE: loop exit
PB: predicated region body
PF: predicated region fallthrough
CT: control target
= control target key end

     0   :  { %v258_v1 = vmov 0.0   ;;  %vm259_vm0 = vmmov 0   ;;  %s326_s0 = inlined_call_operand.vmem [shape: bf16[2,16,128], index: 0, kind: input, shape index: {}]   ;;  %s327_s1 = inlined_call_operand.vmem [shape: bf16[128,128], index: 1, kind: input, shape index: {}]   ;;  %s328_s2 = inlined_call_operand.vmem [shape: f32[1,128], index: 2, kind: input, shape index: {}]   ;;  %s329_s3 = inlined_call_operand.hbm [shape: f32[2,128], index: 3, kind: output, shape index: {}]  }
   0x1   :  { %v226_v0 = vld [vmem:[%s327_s1] sm:$0xff]   ;;  %203 = vmatprep.subr.bf16.mxu0 %v258_v1  ;;  %v227_v2 = vld [vmem:[%s327_s1 + $0x8] sm:$0xff]   ;;  %219 = vmatprep.mubr.msk.bf16.mxu0 %vm259_vm0, %v258_v1  ;;  %v228_v3 = vld [vmem:[%s327_s1 + $0x10] sm:$0xff]  }
   0x2   :  { %204 = vmatpush3.bf16.msra.mxu0 %v226_v0  ;;  %v186_v4 = vld [vmem:[%s326_s0] sm:$0xff]   ;;  %v193_v5 = vld [vmem:[%s326_s0 + $0x8] sm:$0xff]  }
   0x3   :  { %205 = vmatprep.subr.bf16.mxu0 %v258_v1  ;;  %v187_v6 = vunpack.c.l.bf16 %v186_v4  ;;  %v188_v7 = vunpack.c.h.bf16 %v186_v4  ;;  %v191_v8 = vunpack.c.l.bf16 %v193_v5  ;;  %v192_v9 = vunpack.c.h.bf16 %v193_v5 }
   0x6   :  { %206 = vmatpush3.bf16.msra.mxu0 %v227_v2 }
   0x7   :  { %207 = vmatprep.subr.bf16.mxu0 %v258_v1 }
   0x8   :  { %8 = vsyncpa [#allocation3], 0  ;;  %v229_v10 = vld [vmem:[%s327_s1 + $0x18] sm:$0xff]   ;;  %v24_v11 = vadd.f32 %v188_v7, %v187_v6  ;;  %v31_v12 = vadd.f32 %v192_v9, %v191_v8  ;;  %v230_v15 = vld [vmem:[%s327_s1 + $0x20] sm:$0xff]   ;;  %vm69_vm1 = vcmask 1041409   ;;  %s260_s6 = smov [#allocation2]  }
   0x9   :  { %v231_v20 = vld [vmem:[%s327_s1 + $0x28] sm:$0xff]   ;;  %v232_v25 = vld [vmem:[%s327_s1 + $0x30] sm:$0xff]   ;;  %v233_v30 = vld [vmem:[%s327_s1 + $0x38] sm:$0xff]   ;;  %s168_s7 = sshll.u32 %s260_s6, 4  ;;  %s169_s7 = int_to_ptr.vmem [resolvable:$true] %s168_s7 }
   0xa   :  { %208 = vmatpush3.bf16.msra.mxu0 %v228_v3  ;;  %v25_v13 = vrot.slane %v24_v11, 4  ;;  %v32_v14 = vrot.slane %v31_v12, 4  ;;  %v176_v37 = vld [vmem:[%s328_s2] ss:$0 sm:$0xff]  ;;  %s234_s1 = scalar_lea.vmem %s169_s7, 32  ;;  %p239_p1 = scmp.lt.s32.totalorder %s169_s7, %s169_s7 }
   0xb   :  { %209 = vmatprep.subr.bf16.mxu0 %v258_v1  ;;  %p235_p0 = scmp.ne.s32.totalorder %s169_s7, %s234_s1  ;;  %p240_p2 = scmp.lt.s32.totalorder %s234_s1, %s234_s1 }
   0xc   :  { %v26_v16 = vadd.f32 %v25_v13, %v24_v11  ;;  %v33_v17 = vadd.f32 %v32_v14, %v31_v12 }
   0xd   :  { %p241_p3 = por %p240_p2, %p239_p1 }
   0xe   :  { %210 = vmatpush3.bf16.msra.mxu0 %v229_v10  ;;  %v27_v18 = vrot.slane %v26_v16, 2  ;;  %v34_v19 = vrot.slane %v33_v17, 2 }
   0xf   :  { %211 = vmatprep.subr.bf16.mxu0 %v258_v1  ;;  %p242_p4 = pnand %p241_p3, %p235_p0 }
  0x10   :  { %v28_v21 = vadd.f32 %v27_v18, %v26_v16  ;;  %v35_v22 = vadd.f32 %v34_v19, %v33_v17 }
  0x12   :  { %212 = vmatpush3.bf16.msra.mxu0 %v230_v15  ;;  %v29_v23 = vrot.slane %v28_v21, 1  ;;  %v36_v24 = vrot.slane %v35_v22, 1 }
  0x13   :  { %213 = vmatprep.subr.bf16.mxu0 %v258_v1 }
  0x14   :  { %v30_v26 = vadd.f32 %v29_v23, %v28_v21  ;;  %v37_v27 = vadd.f32 %v36_v24, %v35_v22 }
  0x16   :  { %214 = vmatpush3.bf16.msra.mxu0 %v231_v20  ;;  %v38_v28 = vmul.f32 0.0625, %v30_v26  ;;  %v39_v29 = vmul.f32 0.0625, %v37_v27 }
  0x17   :  { %215 = vmatprep.subr.bf16.mxu0 %v258_v1 }
  0x18   :  { %v40_v31 = vpack.c.bf16 %v38_v28, %v38_v28  ;;  %v41_v32 = vpack.c.bf16 %v39_v29, %v39_v29 }
  0x1a   :  { %216 = vmatpush3.bf16.msra.mxu0 %v232_v25  ;;  %v67_v33 = vunpack.c.l.b16 %v40_v31  ;;  %v68_v34 = vunpack.c.l.b16 %v41_v32 }
  0x1b   :  { %217 = vmatprep.subr.bf16.mxu0 %v258_v1 }
  0x1c   :  { %v70_v35 = vsel %vm69_vm1, %v68_v34, %v67_v33 }
  0x1d   :  { %v71_v36 = vpack.c.b16 %v70_v35, %v70_v35 }
  0x1e   :  { %218 = vmatpush3.bf16.msra.mxu0 %v233_v30 }
  0x21   :  { %220 = vmatmul.mubr.bf16.vlgmr.msra.gmra.mrb[0].mxu0 %v71_v36 }
  0xf4   :  { %v155_v38 = vpop.f32.mrb[0].mxu0 }
  0xf5   :  { %v156_v39 = vadd.f32 %v176_v37, %v155_v38  ;;  %v221_v40 = vpop.f32.mrb[1].mxu0 }
  0xf6   :  { %v158_v41 = vpop.f32.mrb[2].mxu0 }
  0xf7   :  { %161 = vst [vmem:[#allocation2] sm:$0x3] %v156_v39  ;;  %v222_v42 = vpop.f32.mrb[3].mxu0 }
  0xf8   :  { %245 = shalt.err (!%p242_p4)
}
  0xf9   :  { %s246_s2 = scalar_lea.hbm %s329_s3, 32 }
  0xfa   :  { %p247_p5 = scmp.ne.s32.totalorder %s329_s3, %s246_s2  ;;  %p250_p6 = scmp.lt.u32.totalorder %s246_s2, %s329_s3 }
  0xfc   :  { %p252_p7 = pnand %p250_p6, %p247_p5 }
  0xfe   :  { %255 = shalt.err (!%p252_p7)
}
  0xff   :  { %171 = dma.vmem_to_hbm [thread:$0]  %s169_s7, 32, %s329_s3, [#allocation3]  }
 0x100   :  { %256 = dma.done.wait [#allocation3], 32  }
 0x101   :  { %257 = vsyncadd [#allocation3], 4294967264 }
 0x102   :  { %175 = vsyncpa [#allocation3], 1 }

</bundles_post_ra>
